<compile_context>
chip_gen: v7x
topology: tpu7x:2x2x1
jax: 0.10.0
libtpu: 0.0.40
codegen_flags: <defaults>
</compile_context>

<pallas_src>
import functools

import jax
import jax.numpy as jnp
from jax import lax
from jax.experimental import pallas as pl
from jax.experimental.pallas import tpu as pltpu

_EPS = 1e-5  # nn.BatchNorm2d default eps


# ----------------------------------------------------------------------------
# helpers
# ----------------------------------------------------------------------------
@functools.lru_cache(maxsize=1)
def _vmem_caps():
    """(vmem_limit_bytes for the compiler, per-call working-set budget)."""
    cap = 64 * 1024 * 1024
    try:
        cap = int(pltpu.get_tpu_info().vmem_capacity_bytes)
    except Exception:
        pass
    limit = max(32 * 1024 * 1024, min(int(cap * 0.8), 112 * 1024 * 1024))
    budget = int(limit * 0.85)
    return limit, budget


def _pick_block_h(H, W, Cin, Cout, in_bytes, mxu_bytes, out_bytes, budget):
    """LARGEST row-band height whose estimated VMEM working set fits `budget`."""
    for bh in range(H, 0, -1):
        if H % bh:
            continue
        P = bh * W
        if bh != H and P % 8:          # (8,128) sublane rule on the pixel dim
            continue
        est = (2 * P * Cin * in_bytes             # body blocks (double-buffered)
               + 2 * 2 * W * Cin * in_bytes       # halo blocks
               + 9 * Cin * Cout * mxu_bytes       # weights (single-buffered)
               + 2 * P * Cout * out_bytes         # raw-output blocks
               + 2 * 2 * Cout * 4                 # BN-stat blocks
               + 2 * 2 * W * Cout * out_bytes     # edge-row blocks
               + (P + 2 * W + 2) * Cin * mxu_bytes  # row-extended scratch slab
               + 2 * P * Cout * 4)                # f32 accumulator headroom
        if est <= budget:
            return bh
    return 1


def maxpool2x2(x_nhwc):
    # glue: 2x2 / stride-2 max-pool; XLA fuses it with the NCHW->NHWC transpose.
    N, H, W, C = x_nhwc.shape
    return jnp.max(x_nhwc.reshape(N, H // 2, 2, W // 2, 2, C), axis=(2, 4))


def _make_row_halos(x4, block_h):
    """Image rows just above/below each row band -> (N, nb, 2, W, C).

    Boundary slots are exact zeros (== the conv's 'same' zero padding).
    """
    N, H, W, C = x4.shape
    nb = H // block_h
    zero = jnp.zeros((N, 1, W, C), x4.dtype)
    above_rows = x4[:, block_h - 1::block_h][:, :nb - 1]   # rows above bands 1..nb-1
    below_rows = x4[:, block_h::block_h]                   # rows below bands 0..nb-2
    above = jnp.concatenate([zero, above_rows], axis=1)    # (N, nb, W, C)
    below = jnp.concatenate([below_rows, zero], axis=1)    # (N, nb, W, C)
    return jnp.stack([above, below], axis=2)               # (N, nb, 2, W, C)


def _halos_from_edges(edges, act):
    """Layer-2 halos from layer-1's emitted band-edge rows (no re-read of raw1).

    edges: (N, nb, 2, W, C) raw conv1 band-edge rows ([...,0]=first, [...,1]=last).
    `act` (BN1+ReLU) is applied only to real rows; boundary rows stay exact zeros.
    """
    N, nb, _, W, C = edges.shape
    zero = jnp.zeros((N, 1, W, C), jnp.float32)
    first = act(edges[:, :, 0].astype(jnp.float32))         # (N, nb, W, C)
    last = act(edges[:, :, 1].astype(jnp.float32))          # (N, nb, W, C)
    above = jnp.concatenate([zero, last[:, :-1]], axis=1)   # row above band b
    below = jnp.concatenate([first[:, 1:], zero], axis=1)   # row below band b
    return jnp.stack([above, below], axis=2)                # (N, nb, 2, W, C)


def _bn_affine(stats, count, gamma, beta):
    """Finalize two-pass BN: per-channel [sum, sum^2] partials -> (scale, shift)."""
    s = jnp.sum(stats, axis=0)                              # (2, C)
    mean = s[0] / count
    var = jnp.maximum(s[1] / count - mean * mean, 0.0)
    scale = gamma * lax.rsqrt(var + _EPS)
    shift = beta - mean * scale
    return scale, shift


# ----------------------------------------------------------------------------
# Pallas kernel: one (batch, row-band) tile of a 3x3 'same' conv
#   + optional fused BN/ReLU of the previous layer on the input path
#   + band-edge rows (next layer's halos) and per-channel [sum, sum^2] partials
# ----------------------------------------------------------------------------
def _make_band_conv_kernel(block_h, W, Cin, Cout, fuse_input_bn_relu):
    P = block_h * W                 # pixels per band
    E = P + 2 * W + 2               # row-extended slab: halo | body | halo + 2 ends

    def kernel(*refs):
        if fuse_input_bn_relu:
            (body_ref, halo_ref, sc_ref, sh_ref, w_ref,
             out_ref, stats_ref, edge_ref, xext_ref) = refs
        else:
            (body_ref, halo_ref, w_ref,
             out_ref, stats_ref, edge_ref, xext_ref) = refs

        band = pl.program_id(1)
        dt = xext_ref.dtype

        # ---- input prep: fused BN+ReLU of the previous layer (if any), then
        # place body + top/bottom halo rows in the row-extended slab.  No
        # memset: the left/right zero padding is handled by the dx masks below
        # and the two never-unmasked end slots are covered by jnp.where.
        body = body_ref[0]                                       # (P, Cin)
        if fuse_input_bn_relu:
            body = jnp.maximum(
                body.astype(jnp.float32) * sc_ref[...] + sh_ref[...], 0.0)
        xext_ref[pl.ds(1, W), :] = halo_ref[0, 0, 0]             # row above band
        xext_ref[pl.ds(W + 1, P), :] = body.astype(dt)           # band body
        xext_ref[pl.ds(W + 1 + P, W), :] = halo_ref[0, 0, 1]     # row below band

        # ---- left/right 'same'-padding masks per flat pixel index
        col = lax.broadcasted_iota(jnp.int32, (P, 1), 0) % W
        not_left = col > 0
        not_right = col < (W - 1)
        zero_tap = jnp.zeros((P, Cin), dt)

        # ---- 3x3 conv = 9 accumulated MXU matmuls over contiguous row-shifted
        # views of the slab (no im2col slab, no copies beyond the operand load).
        acc = jnp.zeros((P, Cout), jnp.float32)
        for dy in range(3):
            for dx in range(3):
                tap = xext_ref[pl.ds(dy * W + dx, P), :]          # (P, Cin)
                if dx == 0:
                    tap = jnp.where(not_left, tap, zero_tap)
                elif dx == 2:
                    tap = jnp.where(not_right, tap, zero_tap)
                acc = acc + jnp.dot(tap, w_ref[dy * 3 + dx],
                                    preferred_element_type=jnp.float32)

        # ---- stores first (raw pre-BN conv + band-edge rows for next halos)
        out_ref[0] = acc.astype(out_ref.dtype)
        edge_ref[0, 0, 0] = acc[0:W, :].astype(edge_ref.dtype)        # first row
        edge_ref[0, 0, 1] = acc[P - W:P, :].astype(edge_ref.dtype)    # last row

        # ---- BatchNorm partials (f32), accumulated across the band axis
        ssum = jnp.sum(acc, axis=0, keepdims=True)               # (1, Cout)
        ssq = jnp.sum(acc * acc, axis=0, keepdims=True)          # (1, Cout)

        @pl.when(band == 0)
        def _():
            stats_ref[0, 0:1, :] = ssum
            stats_ref[0, 1:2, :] = ssq

        @pl.when(band > 0)
        def _():
            stats_ref[0, 0:1, :] = stats_ref[0, 0:1, :] + ssum
            stats_ref[0, 1:2, :] = stats_ref[0, 1:2, :] + ssq

    return kernel


def _band_conv(x_pix, halos, w9, scale_shift, *, H, W, Cin, Cout, block_h,
               mxu_dtype, out_dtype, vmem_limit):
    """One 3x3 conv layer over the whole batch, tiled over (batch, row-bands)."""
    N = x_pix.shape[0]
    nb = H // block_h
    P = block_h * W
    fuse = scale_shift is not None

    kernel = _make_band_conv_kernel(block_h, W, Cin, Cout, fuse)

    in_specs = [
        pl.BlockSpec((1, P, Cin), lambda n, b: (n, b, 0)),               # body
        pl.BlockSpec((1, 1, 2, W, Cin), lambda n, b: (n, b, 0, 0, 0)),   # halos
    ]
    args = [x_pix, halos]
    if fuse:
        scale, shift = scale_shift
        in_specs += [pl.BlockSpec((1, Cin), lambda n, b: (0, 0)),
                     pl.BlockSpec((1, Cin), lambda n, b: (0, 0))]
        args += [scale.reshape(1, Cin).astype(jnp.float32),
                 shift.reshape(1, Cin).astype(jnp.float32)]
    # grid-invariant weights -> single-buffered (double-buffering buys nothing)
    w_kwargs = {}
    if hasattr(pl, "Buffered"):
        w_kwargs["pipeline_mode"] = pl.Buffered(1)
    in_specs += [pl.BlockSpec((9, Cin, Cout), lambda n, b: (0, 0, 0), **w_kwargs)]
    args += [w9.astype(mxu_dtype)]

    out_shape = (jax.ShapeDtypeStruct((N, H * W, Cout), out_dtype),       # raw conv
                 jax.ShapeDtypeStruct((N, 2, Cout), jnp.float32),         # BN partials
                 jax.ShapeDtypeStruct((N, nb, 2, W, Cout), out_dtype))    # edge rows
    out_specs = (pl.BlockSpec((1, P, Cout), lambda n, b: (n, b, 0)),
                 pl.BlockSpec((1, 2, Cout), lambda n, b: (n, 0, 0)),
                 pl.BlockSpec((1, 1, 2, W, Cout), lambda n, b: (n, b, 0, 0, 0)))

    flops = int(2 * N * H * W * 9 * Cin * Cout)
    bytes_accessed = int(x_pix.size * x_pix.dtype.itemsize
                         + N * H * W * Cout * jnp.dtype(out_dtype).itemsize
                         + w9.size * jnp.dtype(mxu_dtype).itemsize)

    raw, stats, edges = pl.pallas_call(
        kernel,
        grid=(N, nb),
        in_specs=in_specs,
        out_specs=out_specs,
        out_shape=out_shape,
        scratch_shapes=[
            pltpu.VMEM((P + 2 * W + 2, Cin), mxu_dtype),   # row-extended slab
        ],
        compiler_params=pltpu.CompilerParams(
            dimension_semantics=("parallel", "arbitrary"),
            vmem_limit_bytes=vmem_limit),
        cost_estimate=pl.CostEstimate(flops=flops, transcendentals=0,
                                      bytes_accessed=bytes_accessed),
    )(*args)
    return raw, stats, edges


# ----------------------------------------------------------------------------
# module forward
# ----------------------------------------------------------------------------
def init_params(key, in_channels, out_channels):
    k = jax.random.split(key, 4)
    return dict(
        w1=0.1 * jax.random.normal(k[0], (3, 3, in_channels, out_channels), jnp.float32),
        b1=0.1 * jax.random.normal(k[1], (out_channels,), jnp.float32),
        g1=jnp.ones((out_channels,), jnp.float32),      # BatchNorm2d init: weight = 1
        beta1=jnp.zeros((out_channels,), jnp.float32),  # BatchNorm2d init: bias = 0
        w2=0.1 * jax.random.normal(k[2], (3, 3, out_channels, out_channels), jnp.float32),
        b2=0.1 * jax.random.normal(k[3], (out_channels,), jnp.float32),
        g2=jnp.ones((out_channels,), jnp.float32),
        beta2=jnp.zeros((out_channels,), jnp.float32),
    )


def unet_down_forward(x_nchw, params, downsample=True, mxu_dtype=jnp.bfloat16):
    x = jnp.transpose(x_nchw, (0, 2, 3, 1)).astype(jnp.float32)   # NCHW -> NHWC
    if downsample:
        x = maxpool2x2(x)   # glue; XLA fuses with the transpose
    N, H, W, Cin = x.shape
    C1 = params["w1"].shape[-1]
    C2 = params["w2"].shape[-1]

    act_dtype = jnp.dtype(mxu_dtype)     # MXU operand dtype
    io_dtype = act_dtype                 # HBM dtype of intermediate activations
    mb, ob = act_dtype.itemsize, jnp.dtype(io_dtype).itemsize
    vmem_limit, budget = _vmem_caps()
    # one common band split for both layers (largest band that fits both)
    block_h = min(_pick_block_h(H, W, Cin, C1, mb, mb, ob, budget),
                  _pick_block_h(H, W, C1, C2, ob, mb, ob, budget))
    count = N * H * W

    # conv weights as 9 x (Cin, Cout) tap matrices (k = dy*3 + dx).
    w1m = params["w1"].reshape(9, Cin, C1)
    w2m = params["w2"].reshape(9, C1, C2)
    # NOTE: conv biases b1/b2 are intentionally NOT applied: a per-channel bias
    # added before training-mode BatchNorm cancels exactly.

    # ---- layer 1: pooled input -> conv1 (raw) + band-edge rows + BN1 partials
    x_pix = x.reshape(N, H * W, Cin).astype(act_dtype)
    halos1 = _make_row_halos(x, block_h).astype(act_dtype)
    raw1, stats1, edges1 = _band_conv(
        x_pix, halos1, w1m, None, H=H, W=W, Cin=Cin, Cout=C1, block_h=block_h,
        mxu_dtype=act_dtype, out_dtype=io_dtype, vmem_limit=vmem_limit)
    scale1, shift1 = _bn_affine(stats1, count, params["g1"], params["beta1"])

    # ---- layer 2: BN1+ReLU1 fused into conv2's input path; halos come from
    # the band-edge rows emitted by layer 1 (no strided re-read of raw1).
    act1 = lambda v: jnp.maximum(v * scale1 + shift1, 0.0)
    halos2 = _halos_from_edges(edges1, act1).astype(act_dtype)
    raw2, stats2, _ = _band_conv(
        raw1, halos2, w2m, (scale1, shift1), H=H, W=W, Cin=C1, Cout=C2,
        block_h=block_h, mxu_dtype=act_dtype, out_dtype=io_dtype,
        vmem_limit=vmem_limit)
    scale2, shift2 = _bn_affine(stats2, count, params["g2"], params["beta2"])

    # ---- epilogue: BN2 + ReLU2 (elementwise; XLA fuses it with the NHWC->NCHW
    # transpose: one read + one write of the final activation).
    y = jnp.maximum(raw2.astype(jnp.float32) * scale2 + shift2, 0.0)
    y = y.reshape(N, H, W, C2)
    return jnp.transpose(y, (0, 3, 1, 2))


# ---- pure-JAX reference (numerical sanity check) ---------------------------
def _ref_block(x_nhwc, w, b, g, beta):
    y = lax.conv_general_dilated(
        x_nhwc, w, window_strides=(1, 1), padding="SAME",
        dimension_numbers=("NHWC", "HWIO", "NHWC")) + b
    mean = jnp.mean(y, axis=(0, 1, 2), keepdims=True)
    var = jnp.mean((y - mean) ** 2, axis=(0, 1, 2), keepdims=True)
    y = (y - mean) * lax.rsqrt(var + _EPS) * g + beta
    return jnp.maximum(y, 0.0)


def unet_down_ref(x_nchw, params, downsample=True):
    x = jnp.transpose(x_nchw, (0, 2, 3, 1))
    if downsample:
        x = maxpool2x2(x)
    x = _ref_block(x, params["w1"], params["b1"], params["g1"], params["beta1"])
    x = _ref_block(x, params["w2"], params["b2"], params["g2"], params["beta2"])
    return jnp.transpose(x, (0, 3, 1, 2))


if __name__ == "__main__":
    key = jax.random.PRNGKey(0)
    kx, kp = jax.random.split(key)
    N, Cin, H, W = 2, 4, 32, 32     # PyTorch-style NCHW input (pooled to 16x16)
    Cout = 8                        # UnetDownModule(in_channels=4, out_channels=8)

    x = jax.random.normal(kx, (N, Cin, H, W), jnp.float32)
    params = init_params(kp, Cin, Cout)

    fwd = jax.jit(unet_down_forward, static_argnames=("downsample", "mxu_dtype"))
    ref = unet_down_ref(x, params)

    # Tight check with f32 MXU operands / f32 intermediates (same math as torch).
    out_f32 = jax.block_until_ready(fwd(x, params, mxu_dtype=jnp.float32))
    assert out_f32.shape == (N, Cout, H // 2, W // 2), out_f32.shape
    err32 = float(jnp.max(jnp.abs(out_f32 - ref)))
    assert jnp.allclose(out_f32, ref, atol=1e-3, rtol=1e-3), err32

    # Default fast path: bf16 MXU operands + bf16 intermediates, f32 accumulation
    # and f32 BatchNorm statistics.
    out_bf16 = jax.block_until_ready(fwd(x, params))
    assert out_bf16.shape == (N, Cout, H // 2, W // 2), out_bf16.shape
    errbf = float(jnp.max(jnp.abs(out_bf16 - ref)))
    assert jnp.allclose(out_bf16, ref, atol=5e-2, rtol=5e-2), errbf

    print("KERNEL_OK")
</pallas_src>

<mosaic_0001>
module attributes {stable_mosaic.version = 11 : i64} {
  func.func @kernel(%arg0: i32, %arg1: i32, %arg2: memref<1x256x4xf32, #tpu.memory_space<vmem>>, %arg3: memref<1x1x2x16x4xf32, #tpu.memory_space<vmem>>, %arg4: memref<9x4x8xf32, #tpu.memory_space<vmem>>, %arg5: memref<1x256x8xf32, #tpu.memory_space<vmem>>, %arg6: memref<1x2x8xf32, #tpu.memory_space<vmem>>, %arg7: memref<1x1x2x16x8xf32, #tpu.memory_space<vmem>>, %arg8: memref<290x4xf32, #tpu.memory_space<vmem>>) attributes {dimension_semantics = [#tpu.dimension_semantics<parallel>, #tpu.dimension_semantics<arbitrary>], iteration_bounds = array<i64: 2, 1>, scalar_prefetch = 0 : i64, scratch_operands = 1 : i64, tpu.core_type = #tpu.core_type<tc>, window_params = [{transform_indices = @transform_0, window_bounds = array<i64: 1, 256, 4>}, {transform_indices = @transform_1, window_bounds = array<i64: 1, 1, 2, 16, 4>}, {pipeline_mode = #tpu.pipeline_mode<synchronous>, transform_indices = @transform_2, window_bounds = array<i64: 9, 4, 8>}, {transform_indices = @transform_3, window_bounds = array<i64: 1, 256, 8>}, {transform_indices = @transform_4, window_bounds = array<i64: 1, 2, 8>}, {transform_indices = @transform_5, window_bounds = array<i64: 1, 1, 2, 16, 8>}]} {
    %c0 = arith.constant 0 : index
    %c0_0 = arith.constant 0 : index
    %c0_1 = arith.constant 0 : index
    %0 = vector.load %arg2[%c0, %c0_0, %c0_1] : memref<1x256x4xf32, #tpu.memory_space<vmem>>, vector<1x256x4xf32>
    %1 = vector.shape_cast %0 : vector<1x256x4xf32> to vector<256x4xf32>
    %c0_2 = arith.constant 0 : index
    %c0_3 = arith.constant 0 : index
    %c0_4 = arith.constant 0 : index
    %c0_5 = arith.constant 0 : index
    %c0_6 = arith.constant 0 : index
    %2 = vector.load %arg3[%c0_2, %c0_3, %c0_4, %c0_5, %c0_6] : memref<1x1x2x16x4xf32, #tpu.memory_space<vmem>>, vector<1x1x1x16x4xf32>
    %3 = vector.shape_cast %2 : vector<1x1x1x16x4xf32> to vector<16x4xf32>
    %c1 = arith.constant 1 : index
    %c0_7 = arith.constant 0 : index
    %4 = vector.load %arg8[%c1, %c0_7] : memref<290x4xf32, #tpu.memory_space<vmem>>, vector<16x4xf32>
    tpu.vector_store %arg8[%c1, %c0_7], %3 {strides = array<i32>} : memref<290x4xf32, #tpu.memory_space<vmem>>, vector<16x4xf32>,
    %c17 = arith.constant 17 : index
    %c0_8 = arith.constant 0 : index
    %5 = vector.load %arg8[%c17, %c0_8] : memref<290x4xf32, #tpu.memory_space<vmem>>, vector<256x4xf32>
    tpu.vector_store %arg8[%c17, %c0_8], %1 {strides = array<i32>} : memref<290x4xf32, #tpu.memory_space<vmem>>, vector<256x4xf32>,
    %c0_9 = arith.constant 0 : index
    %c0_10 = arith.constant 0 : index
    %c1_11 = arith.constant 1 : index
    %c0_12 = arith.constant 0 : index
    %c0_13 = arith.constant 0 : index
    %6 = vector.load %arg3[%c0_9, %c0_10, %c1_11, %c0_12, %c0_13] : memref<1x1x2x16x4xf32, #tpu.memory_space<vmem>>, vector<1x1x1x16x4xf32>
    %7 = vector.shape_cast %6 : vector<1x1x1x16x4xf32> to vector<16x4xf32>
    %c273 = arith.constant 273 : index
    %c0_14 = arith.constant 0 : index
    %8 = vector.load %arg8[%c273, %c0_14] : memref<290x4xf32, #tpu.memory_space<vmem>>, vector<16x4xf32>
    tpu.vector_store %arg8[%c273, %c0_14], %7 {strides = array<i32>} : memref<290x4xf32, #tpu.memory_space<vmem>>, vector<16x4xf32>,
    %9 = tpu.iota {dimensions = array<i32: 0>} : vector<256x1xi32>
    %c16_i32 = arith.constant 16 : i32
    %c0_i32 = arith.constant 0 : i32
    %10 = arith.cmpi eq, %c16_i32, %c0_i32 : i32
    %c1_i32 = arith.constant 1 : i32
    %11 = arith.select %10, %c1_i32, %c16_i32 : i32
    %12 = vector.broadcast %11 : i32 to vector<256x1xi32>
    %13 = arith.remsi %9, %12 : vector<256x1xi32>
    %c0_i32_15 = arith.constant 0 : i32
    %14 = vector.broadcast %c0_i32_15 : i32 to vector<256x1xi32>
    %15 = arith.cmpi ne, %13, %14 : vector<256x1xi32>
    %c0_i32_16 = arith.constant 0 : i32
    %16 = vector.broadcast %c0_i32_16 : i32 to vector<256x1xi32>
    %17 = arith.cmpi slt, %13, %16 : vector<256x1xi32>
    %c0_i32_17 = arith.constant 0 : i32
    %18 = arith.cmpi slt, %11, %c0_i32_17 : i32
    %19 = vector.broadcast %18 : i1 to vector<256x1xi1>
    %20 = vector.broadcast %19 : vector<256x1xi1> to vector<256x1xi1>
    %21 = arith.xori %17, %20 : vector<256x1xi1>
    %22 = arith.andi %21, %15 : vector<256x1xi1>
    %23 = vector.broadcast %11 : i32 to vector<256x1xi32>
    %24 = arith.addi %13, %23 : vector<256x1xi32>
    %25 = arith.select %22, %24, %13 : vector<256x1xi1>, vector<256x1xi32>
    %c0_i32_18 = arith.constant 0 : i32
    %26 = vector.broadcast %c0_i32_18 : i32 to vector<256x1xi32>
    %27 = arith.cmpi sgt, %25, %26 : vector<256x1xi32>
    %c15_i32 = arith.constant 15 : i32
    %28 = vector.broadcast %c15_i32 : i32 to vector<256x1xi32>
    %29 = arith.cmpi slt, %25, %28 : vector<256x1xi32>
    %cst = arith.constant 0.000000e+00 : f32
    %30 = vector.broadcast %cst : f32 to vector<256x4xf32>
    %cst_19 = arith.constant 0.000000e+00 : f32
    %31 = vector.broadcast %cst_19 : f32 to vector<256x8xf32>
    %c0_20 = arith.constant 0 : index
    %c0_21 = arith.constant 0 : index
    %32 = vector.load %arg8[%c0_20, %c0_21] : memref<290x4xf32, #tpu.memory_space<vmem>>, vector<256x4xf32>
    %33 = vector.shape_cast %27 : vector<256x1xi1> to vector<256x1xi1>
    %34 = vector.broadcast %33 : vector<256x1xi1> to vector<256x4xi1>
    %35 = arith.select %34, %32, %30 : vector<256x4xi1>, vector<256x4xf32>
    %c0_22 = arith.constant 0 : index
    %c0_23 = arith.constant 0 : index
    %c0_24 = arith.constant 0 : index
    %36 = vector.load %arg4[%c0_22, %c0_23, %c0_24] : memref<9x4x8xf32, #tpu.memory_space<vmem>>, vector<1x4x8xf32>
    %37 = vector.shape_cast %36 : vector<1x4x8xf32> to vector<4x8xf32>
    %cst_25 = arith.constant dense<0.000000e+00> : vector<256x8xf32>
    %38 = tpu.matmul %35, %37, %cst_25 {dimension_numbers = #tpu.dot_dimension_numbers<[1], [0], [0], [1], [0, 0, 1, 1], [], []>} : vector<256x4xf32>, vector<4x8xf32>, vector<256x8xf32> -> vector<256x8xf32>
    %39 = arith.addf %31, %38 : vector<256x8xf32>
    %c1_26 = arith.constant 1 : index
    %c0_27 = arith.constant 0 : index
    %40 = vector.load %arg8[%c1_26, %c0_27] : memref<290x4xf32, #tpu.memory_space<vmem>>, vector<256x4xf32>
    %c1_28 = arith.constant 1 : index
    %c0_29 = arith.constant 0 : index
    %c0_30 = arith.constant 0 : index
    %41 = vector.load %arg4[%c1_28, %c0_29, %c0_30] : memref<9x4x8xf32, #tpu.memory_space<vmem>>, vector<1x4x8xf32>
    %42 = vector.shape_cast %41 : vector<1x4x8xf32> to vector<4x8xf32>
    %cst_31 = arith.constant dense<0.000000e+00> : vector<256x8xf32>
    %43 = tpu.matmul %40, %42, %cst_31 {dimension_numbers = #tpu.dot_dimension_numbers<[1], [0], [0], [1], [0, 0, 1, 1], [], []>} : vector<256x4xf32>, vector<4x8xf32>, vector<256x8xf32> -> vector<256x8xf32>
    %44 = arith.addf %39, %43 : vector<256x8xf32>
    %c2 = arith.constant 2 : index
    %c0_32 = arith.constant 0 : index
    %45 = vector.load %arg8[%c2, %c0_32] : memref<290x4xf32, #tpu.memory_space<vmem>>, vector<256x4xf32>
    %46 = vector.shape_cast %29 : vector<256x1xi1> to vector<256x1xi1>
    %47 = vector.broadcast %46 : vector<256x1xi1> to vector<256x4xi1>
    %48 = arith.select %47, %45, %30 : vector<256x4xi1>, vector<256x4xf32>
    %c2_33 = arith.constant 2 : index
    %c0_34 = arith.constant 0 : index
    %c0_35 = arith.constant 0 : index
    %49 = vector.load %arg4[%c2_33, %c0_34, %c0_35] : memref<9x4x8xf32, #tpu.memory_space<vmem>>, vector<1x4x8xf32>
    %50 = vector.shape_cast %49 : vector<1x4x8xf32> to vector<4x8xf32>
    %cst_36 = arith.constant dense<0.000000e+00> : vector<256x8xf32>
    %51 = tpu.matmul %48, %50, %cst_36 {dimension_numbers = #tpu.dot_dimension_numbers<[1], [0], [0], [1], [0, 0, 1, 1], [], []>} : vector<256x4xf32>, vector<4x8xf32>, vector<256x8xf32> -> vector<256x8xf32>
    %52 = arith.addf %44, %51 : vector<256x8xf32>
    %c16 = arith.constant 16 : index
    %c0_37 = arith.constant 0 : index
    %53 = vector.load %arg8[%c16, %c0_37] : memref<290x4xf32, #tpu.memory_space<vmem>>, vector<256x4xf32>
    %54 = vector.shape_cast %27 : vector<256x1xi1> to vector<256x1xi1>
    %55 = vector.broadcast %54 : vector<256x1xi1> to vector<256x4xi1>
    %56 = arith.select %55, %53, %30 : vector<256x4xi1>, vector<256x4xf32>
    %c3 = arith.constant 3 : index
    %c0_38 = arith.constant 0 : index
    %c0_39 = arith.constant 0 : index
    %57 = vector.load %arg4[%c3, %c0_38, %c0_39] : memref<9x4x8xf32, #tpu.memory_space<vmem>>, vector<1x4x8xf32>
    %58 = vector.shape_cast %57 : vector<1x4x8xf32> to vector<4x8xf32>
    %cst_40 = arith.constant dense<0.000000e+00> : vector<256x8xf32>
    %59 = tpu.matmul %56, %58, %cst_40 {dimension_numbers = #tpu.dot_dimension_numbers<[1], [0], [0], [1], [0, 0, 1, 1], [], []>} : vector<256x4xf32>, vector<4x8xf32>, vector<256x8xf32> -> vector<256x8xf32>
    %60 = arith.addf %52, %59 : vector<256x8xf32>
    %c17_41 = arith.constant 17 : index
    %c0_42 = arith.constant 0 : index
    %61 = vector.load %arg8[%c17_41, %c0_42] : memref<290x4xf32, #tpu.memory_space<vmem>>, vector<256x4xf32>
    %c4 = arith.constant 4 : index
    %c0_43 = arith.constant 0 : index
    %c0_44 = arith.constant 0 : index
    %62 = vector.load %arg4[%c4, %c0_43, %c0_44] : memref<9x4x8xf32, #tpu.memory_space<vmem>>, vector<1x4x8xf32>
    %63 = vector.shape_cast %62 : vector<1x4x8xf32> to vector<4x8xf32>
    %cst_45 = arith.constant dense<0.000000e+00> : vector<256x8xf32>
    %64 = tpu.matmul %61, %63, %cst_45 {dimension_numbers = #tpu.dot_dimension_numbers<[1], [0], [0], [1], [0, 0, 1, 1], [], []>} : vector<256x4xf32>, vector<4x8xf32>, vector<256x8xf32> -> vector<256x8xf32>
    %65 = arith.addf %60, %64 : vector<256x8xf32>
    %c18 = arith.constant 18 : index
    %c0_46 = arith.constant 0 : index
    %66 = vector.load %arg8[%c18, %c0_46] : memref<290x4xf32, #tpu.memory_space<vmem>>, vector<256x4xf32>
    %67 = vector.shape_cast %29 : vector<256x1xi1> to vector<256x1xi1>
    %68 = vector.broadcast %67 : vector<256x1xi1> to vector<256x4xi1>
    %69 = arith.select %68, %66, %30 : vector<256x4xi1>, vector<256x4xf32>
    %c5 = arith.constant 5 : index
    %c0_47 = arith.constant 0 : index
    %c0_48 = arith.constant 0 : index
    %70 = vector.load %arg4[%c5, %c0_47, %c0_48] : memref<9x4x8xf32, #tpu.memory_space<vmem>>, vector<1x4x8xf32>
    %71 = vector.shape_cast %70 : vector<1x4x8xf32> to vector<4x8xf32>
    %cst_49 = arith.constant dense<0.000000e+00> : vector<256x8xf32>
    %72 = tpu.matmul %69, %71, %cst_49 {dimension_numbers = #tpu.dot_dimension_numbers<[1], [0], [0], [1], [0, 0, 1, 1], [], []>} : vector<256x4xf32>, vector<4x8xf32>, vector<256x8xf32> -> vector<256x8xf32>
    %73 = arith.addf %65, %72 : vector<256x8xf32>
    %c32 = arith.constant 32 : index
    %c0_50 = arith.constant 0 : index
    %74 = vector.load %arg8[%c32, %c0_50] : memref<290x4xf32, #tpu.memory_space<vmem>>, vector<256x4xf32>
    %75 = vector.shape_cast %27 : vector<256x1xi1> to vector<256x1xi1>
    %76 = vector.broadcast %75 : vector<256x1xi1> to vector<256x4xi1>
    %77 = arith.select %76, %74, %30 : vector<256x4xi1>, vector<256x4xf32>
    %c6 = arith.constant 6 : index
    %c0_51 = arith.constant 0 : index
    %c0_52 = arith.constant 0 : index
    %78 = vector.load %arg4[%c6, %c0_51, %c0_52] : memref<9x4x8xf32, #tpu.memory_space<vmem>>, vector<1x4x8xf32>
    %79 = vector.shape_cast %78 : vector<1x4x8xf32> to vector<4x8xf32>
    %cst_53 = arith.constant dense<0.000000e+00> : vector<256x8xf32>
    %80 = tpu.matmul %77, %79, %cst_53 {dimension_numbers = #tpu.dot_dimension_numbers<[1], [0], [0], [1], [0, 0, 1, 1], [], []>} : vector<256x4xf32>, vector<4x8xf32>, vector<256x8xf32> -> vector<256x8xf32>
    %81 = arith.addf %73, %80 : vector<256x8xf32>
    %c33 = arith.constant 33 : index
    %c0_54 = arith.constant 0 : index
    %82 = vector.load %arg8[%c33, %c0_54] : memref<290x4xf32, #tpu.memory_space<vmem>>, vector<256x4xf32>
    %c7 = arith.constant 7 : index
    %c0_55 = arith.constant 0 : index
    %c0_56 = arith.constant 0 : index
    %83 = vector.load %arg4[%c7, %c0_55, %c0_56] : memref<9x4x8xf32, #tpu.memory_space<vmem>>, vector<1x4x8xf32>
    %84 = vector.shape_cast %83 : vector<1x4x8xf32> to vector<4x8xf32>
    %cst_57 = arith.constant dense<0.000000e+00> : vector<256x8xf32>
    %85 = tpu.matmul %82, %84, %cst_57 {dimension_numbers = #tpu.dot_dimension_numbers<[1], [0], [0], [1], [0, 0, 1, 1], [], []>} : vector<256x4xf32>, vector<4x8xf32>, vector<256x8xf32> -> vector<256x8xf32>
    %86 = arith.addf %81, %85 : vector<256x8xf32>
    %c34 = arith.constant 34 : index
    %c0_58 = arith.constant 0 : index
    %87 = vector.load %arg8[%c34, %c0_58] : memref<290x4xf32, #tpu.memory_space<vmem>>, vector<256x4xf32>
    %88 = vector.shape_cast %29 : vector<256x1xi1> to vector<256x1xi1>
    %89 = vector.broadcast %88 : vector<256x1xi1> to vector<256x4xi1>
    %90 = arith.select %89, %87, %30 : vector<256x4xi1>, vector<256x4xf32>
    %c8 = arith.constant 8 : index
    %c0_59 = arith.constant 0 : index
    %c0_60 = arith.constant 0 : index
    %91 = vector.load %arg4[%c8, %c0_59, %c0_60] : memref<9x4x8xf32, #tpu.memory_space<vmem>>, vector<1x4x8xf32>
    %92 = vector.shape_cast %91 : vector<1x4x8xf32> to vector<4x8xf32>
    %cst_61 = arith.constant dense<0.000000e+00> : vector<256x8xf32>
    %93 = tpu.matmul %90, %92, %cst_61 {dimension_numbers = #tpu.dot_dimension_numbers<[1], [0], [0], [1], [0, 0, 1, 1], [], []>} : vector<256x4xf32>, vector<4x8xf32>, vector<256x8xf32> -> vector<256x8xf32>
    %94 = arith.addf %86, %93 : vector<256x8xf32>
    %c0_62 = arith.constant 0 : index
    %c0_63 = arith.constant 0 : index
    %c0_64 = arith.constant 0 : index
    %95 = vector.load %arg5[%c0_62, %c0_63, %c0_64] : memref<1x256x8xf32, #tpu.memory_space<vmem>>, vector<1x256x8xf32>
    %96 = vector.shape_cast %95 : vector<1x256x8xf32> to vector<256x8xf32>
    %97 = vector.shape_cast %94 : vector<256x8xf32> to vector<1x256x8xf32>
    tpu.vector_store %arg5[%c0_62, %c0_63, %c0_64], %97 {strides = array<i32>} : memref<1x256x8xf32, #tpu.memory_space<vmem>>, vector<1x256x8xf32>,
    %98 = vector.extract_strided_slice %94 {offsets = [0, 0], sizes = [16, 8], strides = [1, 1]} : vector<256x8xf32> to vector<16x8xf32>
    %c0_65 = arith.constant 0 : index
    %c0_66 = arith.constant 0 : index
    %c0_67 = arith.constant 0 : index
    %c0_68 = arith.constant 0 : index
    %c0_69 = arith.constant 0 : index
    %99 = vector.load %arg7[%c0_65, %c0_66, %c0_67, %c0_68, %c0_69] : memref<1x1x2x16x8xf32, #tpu.memory_space<vmem>>, vector<1x1x1x16x8xf32>
    %100 = vector.shape_cast %99 : vector<1x1x1x16x8xf32> to vector<16x8xf32>
    %101 = vector.shape_cast %98 : vector<16x8xf32> to vector<1x1x1x16x8xf32>
    tpu.vector_store %arg7[%c0_65, %c0_66, %c0_67, %c0_68, %c0_69], %101 {strides = array<i32>} : memref<1x1x2x16x8xf32, #tpu.memory_space<vmem>>, vector<1x1x1x16x8xf32>,
    %102 = vector.extract_strided_slice %94 {offsets = [240, 0], sizes = [16, 8], strides = [1, 1]} : vector<256x8xf32> to vector<16x8xf32>
    %c0_70 = arith.constant 0 : index
    %c0_71 = arith.constant 0 : index
    %c1_72 = arith.constant 1 : index
    %c0_73 = arith.constant 0 : index
    %c0_74 = arith.constant 0 : index
    %103 = vector.load %arg7[%c0_70, %c0_71, %c1_72, %c0_73, %c0_74] : memref<1x1x2x16x8xf32, #tpu.memory_space<vmem>>, vector<1x1x1x16x8xf32>
    %104 = vector.shape_cast %103 : vector<1x1x1x16x8xf32> to vector<16x8xf32>
    %105 = vector.shape_cast %102 : vector<16x8xf32> to vector<1x1x1x16x8xf32>
    tpu.vector_store %arg7[%c0_70, %c0_71, %c1_72, %c0_73, %c0_74], %105 {strides = array<i32>} : memref<1x1x2x16x8xf32, #tpu.memory_space<vmem>>, vector<1x1x1x16x8xf32>,
    %cst_75 = arith.constant dense<0.000000e+00> : vector<8xf32>
    %106 = vector.multi_reduction <add>, %94, %cst_75 [0] : vector<256x8xf32> to vector<8xf32>
    %107 = vector.shape_cast %106 : vector<8xf32> to vector<1x8xf32>
    %108 = arith.mulf %94, %94 : vector<256x8xf32>
    %cst_76 = arith.constant dense<0.000000e+00> : vector<8xf32>
    %109 = vector.multi_reduction <add>, %108, %cst_76 [0] : vector<256x8xf32> to vector<8xf32>
    %110 = vector.shape_cast %109 : vector<8xf32> to vector<1x8xf32>
    %c0_i32_77 = arith.constant 0 : i32
    %111 = arith.cmpi eq, %arg1, %c0_i32_77 : i32
    %112 = arith.extui %111 : i1 to i32
    %c0_i32_78 = arith.constant 0 : i32
    %113 = arith.cmpi ne, %112, %c0_i32_78 : i32
    scf.if %113 {
      %c0_81 = arith.constant 0 : index
      %c0_82 = arith.constant 0 : index
      %c0_83 = arith.constant 0 : index
      %117 = vector.load %arg6[%c0_81, %c0_82, %c0_83] : memref<1x2x8xf32, #tpu.memory_space<vmem>>, vector<1x1x8xf32>
      %118 = vector.shape_cast %117 : vector<1x1x8xf32> to vector<1x8xf32>
      %119 = vector.shape_cast %107 : vector<1x8xf32> to vector<1x1x8xf32>
      tpu.vector_store %arg6[%c0_81, %c0_82, %c0_83], %119 {strides = array<i32>} : memref<1x2x8xf32, #tpu.memory_space<vmem>>, vector<1x1x8xf32>,
      %c0_84 = arith.constant 0 : index
      %c1_85 = arith.constant 1 : index
      %c0_86 = arith.constant 0 : index
      %120 = vector.load %arg6[%c0_84, %c1_85, %c0_86] : memref<1x2x8xf32, #tpu.memory_space<vmem>>, vector<1x1x8xf32>
      %121 = vector.shape_cast %120 : vector<1x1x8xf32> to vector<1x8xf32>
      %122 = vector.shape_cast %110 : vector<1x8xf32> to vector<1x1x8xf32>
      tpu.vector_store %arg6[%c0_84, %c1_85, %c0_86], %122 {strides = array<i32>} : memref<1x2x8xf32, #tpu.memory_space<vmem>>, vector<1x1x8xf32>,
    } else {
    }
    %c0_i32_79 = arith.constant 0 : i32
    %114 = arith.cmpi sgt, %arg1, %c0_i32_79 : i32
    %115 = arith.extui %114 : i1 to i32
    %c0_i32_80 = arith.constant 0 : i32
    %116 = arith.cmpi ne, %115, %c0_i32_80 : i32
    scf.if %116 {
      %c0_81 = arith.constant 0 : index
      %c0_82 = arith.constant 0 : index
      %c0_83 = arith.constant 0 : index
      %117 = vector.load %arg6[%c0_81, %c0_82, %c0_83] : memref<1x2x8xf32, #tpu.memory_space<vmem>>, vector<1x1x8xf32>
      %118 = vector.shape_cast %117 : vector<1x1x8xf32> to vector<1x8xf32>
      %119 = arith.addf %118, %107 : vector<1x8xf32>
      %c0_84 = arith.constant 0 : index
      %c0_85 = arith.constant 0 : index
      %c0_86 = arith.constant 0 : index
      %120 = vector.load %arg6[%c0_84, %c0_85, %c0_86] : memref<1x2x8xf32, #tpu.memory_space<vmem>>, vector<1x1x8xf32>
      %121 = vector.shape_cast %120 : vector<1x1x8xf32> to vector<1x8xf32>
      %122 = vector.shape_cast %119 : vector<1x8xf32> to vector<1x1x8xf32>
      tpu.vector_store %arg6[%c0_84, %c0_85, %c0_86], %122 {strides = array<i32>} : memref<1x2x8xf32, #tpu.memory_space<vmem>>, vector<1x1x8xf32>,
      %c0_87 = arith.constant 0 : index
      %c1_88 = arith.constant 1 : index
      %c0_89 = arith.constant 0 : index
      %123 = vector.load %arg6[%c0_87, %c1_88, %c0_89] : memref<1x2x8xf32, #tpu.memory_space<vmem>>, vector<1x1x8xf32>
      %124 = vector.shape_cast %123 : vector<1x1x8xf32> to vector<1x8xf32>
      %125 = arith.addf %124, %110 : vector<1x8xf32>
      %c0_90 = arith.constant 0 : index
      %c1_91 = arith.constant 1 : index
      %c0_92 = arith.constant 0 : index
      %126 = vector.load %arg6[%c0_90, %c1_91, %c0_92] : memref<1x2x8xf32, #tpu.memory_space<vmem>>, vector<1x1x8xf32>
      %127 = vector.shape_cast %126 : vector<1x1x8xf32> to vector<1x8xf32>
      %128 = vector.shape_cast %125 : vector<1x8xf32> to vector<1x1x8xf32>
      tpu.vector_store %arg6[%c0_90, %c1_91, %c0_92], %128 {strides = array<i32>} : memref<1x2x8xf32, #tpu.memory_space<vmem>>, vector<1x1x8xf32>,
    } else {
    }
    return
  }
  func.func @transform_0(%arg0: i32, %arg1: i32) -> (i32, i32, i32) {
    %c0_i32 = arith.constant 0 : i32
    %c0_i32_0 = arith.constant 0 : i32
    return %arg0, %arg1, %c0_i32 : i32, i32, i32
  }
  func.func @transform_1(%arg0: i32, %arg1: i32) -> (i32, i32, i32, i32, i32) {
    %c0_i32 = arith.constant 0 : i32
    %c0_i32_0 = arith.constant 0 : i32
    %c0_i32_1 = arith.constant 0 : i32
    %c0_i32_2 = arith.constant 0 : i32
    return %arg0, %arg1, %c0_i32, %c0_i32_0, %c0_i32_1 : i32, i32, i32, i32, i32
  }
  func.func @transform_2(%arg0: i32, %arg1: i32) -> (i32, i32, i32) {
    %c0_i32 = arith.constant 0 : i32
    %c0_i32_0 = arith.constant 0 : i32
    %c0_i32_1 = arith.constant 0 : i32
    %c0_i32_2 = arith.constant 0 : i32
    return %c0_i32, %c0_i32_0, %c0_i32_1 : i32, i32, i32
  }
  func.func @transform_3(%arg0: i32, %arg1: i32) -> (i32, i32, i32) {
    %c0_i32 = arith.constant 0 : i32
    %c0_i32_0 = arith.constant 0 : i32
    return %arg0, %arg1, %c0_i32 : i32, i32, i32
  }
  func.func @transform_4(%arg0: i32, %arg1: i32) -> (i32, i32, i32) {
    %c0_i32 = arith.constant 0 : i32
    %c0_i32_0 = arith.constant 0 : i32
    %c0_i32_1 = arith.constant 0 : i32
    return %arg0, %c0_i32, %c0_i32_0 : i32, i32, i32
  }
  func.func @transform_5(%arg0: i32, %arg1: i32) -> (i32, i32, i32, i32, i32) {
    %c0_i32 = arith.constant 0 : i32
    %c0_i32_0 = arith.constant 0 : i32
    %c0_i32_1 = arith.constant 0 : i32
    %c0_i32_2 = arith.constant 0 : i32
    return %arg0, %arg1, %c0_i32, %c0_i32_0, %c0_i32_1 : i32, i32, i32, i32, i32
  }
}

module attributes {stable_mosaic.version = 11 : i64} {
  func.func @kernel(%arg0: i32, %arg1: i32, %arg2: memref<1x256x8xf32, #tpu.memory_space<vmem>>, %arg3: memref<1x1x2x16x8xf32, #tpu.memory_space<vmem>>, %arg4: memref<1x8xf32, #tpu.memory_space<vmem>>, %arg5: memref<1x8xf32, #tpu.memory_space<vmem>>, %arg6: memref<9x8x8xf32, #tpu.memory_space<vmem>>, %arg7: memref<1x256x8xf32, #tpu.memory_space<vmem>>, %arg8: memref<1x2x8xf32, #tpu.memory_space<vmem>>, %arg9: memref<1x1x2x16x8xf32, #tpu.memory_space<vmem>>, %arg10: memref<290x8xf32, #tpu.memory_space<vmem>>) attributes {dimension_semantics = [#tpu.dimension_semantics<parallel>, #tpu.dimension_semantics<arbitrary>], iteration_bounds = array<i64: 2, 1>, scalar_prefetch = 0 : i64, scratch_operands = 1 : i64, tpu.core_type = #tpu.core_type<tc>, window_params = [{transform_indices = @transform_0, window_bounds = array<i64: 1, 256, 8>}, {transform_indices = @transform_1, window_bounds = array<i64: 1, 1, 2, 16, 8>}, {pipeline_mode = #tpu.pipeline_mode<synchronous>, transform_indices = @transform_2, window_bounds = array<i64: 1, 8>}, {pipeline_mode = #tpu.pipeline_mode<synchronous>, transform_indices = @transform_3, window_bounds = array<i64: 1, 8>}, {pipeline_mode = #tpu.pipeline_mode<synchronous>, transform_indices = @transform_4, window_bounds = array<i64: 9, 8, 8>}, {transform_indices = @transform_5, window_bounds = array<i64: 1, 256, 8>}, {transform_indices = @transform_6, window_bounds = array<i64: 1, 2, 8>}, {transform_indices = @transform_7, window_bounds = array<i64: 1, 1, 2, 16, 8>}]} {
    %c0 = arith.constant 0 : index
    %c0_0 = arith.constant 0 : index
    %c0_1 = arith.constant 0 : index
    %0 = vector.load %arg2[%c0, %c0_0, %c0_1] : memref<1x256x8xf32, #tpu.memory_space<vmem>>, vector<1x256x8xf32>
    %1 = vector.shape_cast %0 : vector<1x256x8xf32> to vector<256x8xf32>
    %c0_2 = arith.constant 0 : index
    %c0_3 = arith.constant 0 : index
    %2 = vector.load %arg4[%c0_2, %c0_3] : memref<1x8xf32, #tpu.memory_space<vmem>>, vector<1x8xf32>
    %3 = vector.broadcast %2 : vector<1x8xf32> to vector<256x8xf32>
    %4 = arith.mulf %1, %3 : vector<256x8xf32>
    %c0_4 = arith.constant 0 : index
    %c0_5 = arith.constant 0 : index
    %5 = vector.load %arg5[%c0_4, %c0_5] : memref<1x8xf32, #tpu.memory_space<vmem>>, vector<1x8xf32>
    %6 = vector.broadcast %5 : vector<1x8xf32> to vector<256x8xf32>
    %7 = arith.addf %4, %6 : vector<256x8xf32>
    %cst = arith.constant 0.000000e+00 : f32
    %8 = vector.broadcast %cst : f32 to vector<256x8xf32>
    %9 = arith.maximumf %7, %8 : vector<256x8xf32>
    %c0_6 = arith.constant 0 : index
    %c0_7 = arith.constant 0 : index
    %c0_8 = arith.constant 0 : index
    %c0_9 = arith.constant 0 : index
    %c0_10 = arith.constant 0 : index
    %10 = vector.load %arg3[%c0_6, %c0_7, %c0_8, %c0_9, %c0_10] : memref<1x1x2x16x8xf32, #tpu.memory_space<vmem>>, vector<1x1x1x16x8xf32>
    %11 = vector.shape_cast %10 : vector<1x1x1x16x8xf32> to vector<16x8xf32>
    %c1 = arith.constant 1 : index
    %c0_11 = arith.constant 0 : index
    %12 = vector.load %arg10[%c1, %c0_11] : memref<290x8xf32, #tpu.memory_space<vmem>>, vector<16x8xf32>
    tpu.vector_store %arg10[%c1, %c0_11], %11 {strides = array<i32>} : memref<290x8xf32, #tpu.memory_space<vmem>>, vector<16x8xf32>,
    %c17 = arith.constant 17 : index
    %c0_12 = arith.constant 0 : index
    %13 = vector.load %arg10[%c17, %c0_12] : memref<290x8xf32, #tpu.memory_space<vmem>>, vector<256x8xf32>
    tpu.vector_store %arg10[%c17, %c0_12], %9 {strides = array<i32>} : memref<290x8xf32, #tpu.memory_space<vmem>>, vector<256x8xf32>,
    %c0_13 = arith.constant 0 : index
    %c0_14 = arith.constant 0 : index
    %c1_15 = arith.constant 1 : index
    %c0_16 = arith.constant 0 : index
    %c0_17 = arith.constant 0 : index
    %14 = vector.load %arg3[%c0_13, %c0_14, %c1_15, %c0_16, %c0_17] : memref<1x1x2x16x8xf32, #tpu.memory_space<vmem>>, vector<1x1x1x16x8xf32>
    %15 = vector.shape_cast %14 : vector<1x1x1x16x8xf32> to vector<16x8xf32>
    %c273 = arith.constant 273 : index
    %c0_18 = arith.constant 0 : index
    %16 = vector.load %arg10[%c273, %c0_18] : memref<290x8xf32, #tpu.memory_space<vmem>>, vector<16x8xf32>
    tpu.vector_store %arg10[%c273, %c0_18], %15 {strides = array<i32>} : memref<290x8xf32, #tpu.memory_space<vmem>>, vector<16x8xf32>,
    %17 = tpu.iota {dimensions = array<i32: 0>} : vector<256x1xi32>
    %c16_i32 = arith.constant 16 : i32
    %c0_i32 = arith.constant 0 : i32
    %18 = arith.cmpi eq, %c16_i32, %c0_i32 : i32
    %c1_i32 = arith.constant 1 : i32
    %19 = arith.select %18, %c1_i32, %c16_i32 : i32
    %20 = vector.broadcast %19 : i32 to vector<256x1xi32>
    %21 = arith.remsi %17, %20 : vector<256x1xi32>
    %c0_i32_19 = arith.constant 0 : i32
    %22 = vector.broadcast %c0_i32_19 : i32 to vector<256x1xi32>
    %23 = arith.cmpi ne, %21, %22 : vector<256x1xi32>
    %c0_i32_20 = arith.constant 0 : i32
    %24 = vector.broadcast %c0_i32_20 : i32 to vector<256x1xi32>
    %25 = arith.cmpi slt, %21, %24 : vector<256x1xi32>
    %c0_i32_21 = arith.constant 0 : i32
    %26 = arith.cmpi slt, %19, %c0_i32_21 : i32
    %27 = vector.broadcast %26 : i1 to vector<256x1xi1>
    %28 = vector.broadcast %27 : vector<256x1xi1> to vector<256x1xi1>
    %29 = arith.xori %25, %28 : vector<256x1xi1>
    %30 = arith.andi %29, %23 : vector<256x1xi1>
    %31 = vector.broadcast %19 : i32 to vector<256x1xi32>
    %32 = arith.addi %21, %31 : vector<256x1xi32>
    %33 = arith.select %30, %32, %21 : vector<256x1xi1>, vector<256x1xi32>
    %c0_i32_22 = arith.constant 0 : i32
    %34 = vector.broadcast %c0_i32_22 : i32 to vector<256x1xi32>
    %35 = arith.cmpi sgt, %33, %34 : vector<256x1xi32>
    %c15_i32 = arith.constant 15 : i32
    %36 = vector.broadcast %c15_i32 : i32 to vector<256x1xi32>
    %37 = arith.cmpi slt, %33, %36 : vector<256x1xi32>
    %cst_23 = arith.constant 0.000000e+00 : f32
    %38 = vector.broadcast %cst_23 : f32 to vector<256x8xf32>
    %cst_24 = arith.constant 0.000000e+00 : f32
    %39 = vector.broadcast %cst_24 : f32 to vector<256x8xf32>
    %c0_25 = arith.constant 0 : index
    %c0_26 = arith.constant 0 : index
    %40 = vector.load %arg10[%c0_25, %c0_26] : memref<290x8xf32, #tpu.memory_space<vmem>>, vector<256x8xf32>
    %41 = vector.shape_cast %35 : vector<256x1xi1> to vector<256x1xi1>
    %42 = vector.broadcast %41 : vector<256x1xi1> to vector<256x8xi1>
    %43 = arith.select %42, %40, %38 : vector<256x8xi1>, vector<256x8xf32>
    %c0_27 = arith.constant 0 : index
    %c0_28 = arith.constant 0 : index
    %c0_29 = arith.constant 0 : index
    %44 = vector.load %arg6[%c0_27, %c0_28, %c0_29] : memref<9x8x8xf32, #tpu.memory_space<vmem>>, vector<1x8x8xf32>
    %45 = vector.shape_cast %44 : vector<1x8x8xf32> to vector<8x8xf32>
    %cst_30 = arith.constant dense<0.000000e+00> : vector<256x8xf32>
    %46 = tpu.matmul %43, %45, %cst_30 {dimension_numbers = #tpu.dot_dimension_numbers<[1], [0], [0], [1], [0, 0, 1, 1], [], []>} : vector<256x8xf32>, vector<8x8xf32>, vector<256x8xf32> -> vector<256x8xf32>
    %47 = arith.addf %39, %46 : vector<256x8xf32>
    %c1_31 = arith.constant 1 : index
    %c0_32 = arith.constant 0 : index
    %48 = vector.load %arg10[%c1_31, %c0_32] : memref<290x8xf32, #tpu.memory_space<vmem>>, vector<256x8xf32>
    %c1_33 = arith.constant 1 : index
    %c0_34 = arith.constant 0 : index
    %c0_35 = arith.constant 0 : index
    %49 = vector.load %arg6[%c1_33, %c0_34, %c0_35] : memref<9x8x8xf32, #tpu.memory_space<vmem>>, vector<1x8x8xf32>
    %50 = vector.shape_cast %49 : vector<1x8x8xf32> to vector<8x8xf32>
    %cst_36 = arith.constant dense<0.000000e+00> : vector<256x8xf32>
    %51 = tpu.matmul %48, %50, %cst_36 {dimension_numbers = #tpu.dot_dimension_numbers<[1], [0], [0], [1], [0, 0, 1, 1], [], []>} : vector<256x8xf32>, vector<8x8xf32>, vector<256x8xf32> -> vector<256x8xf32>
    %52 = arith.addf %47, %51 : vector<256x8xf32>
    %c2 = arith.constant 2 : index
    %c0_37 = arith.constant 0 : index
    %53 = vector.load %arg10[%c2, %c0_37] : memref<290x8xf32, #tpu.memory_space<vmem>>, vector<256x8xf32>
    %54 = vector.shape_cast %37 : vector<256x1xi1> to vector<256x1xi1>
    %55 = vector.broadcast %54 : vector<256x1xi1> to vector<256x8xi1>
    %56 = arith.select %55, %53, %38 : vector<256x8xi1>, vector<256x8xf32>
    %c2_38 = arith.constant 2 : index
    %c0_39 = arith.constant 0 : index
    %c0_40 = arith.constant 0 : index
    %57 = vector.load %arg6[%c2_38, %c0_39, %c0_40] : memref<9x8x8xf32, #tpu.memory_space<vmem>>, vector<1x8x8xf32>
    %58 = vector.shape_cast %57 : vector<1x8x8xf32> to vector<8x8xf32>
    %cst_41 = arith.constant dense<0.000000e+00> : vector<256x8xf32>
    %59 = tpu.matmul %56, %58, %cst_41 {dimension_numbers = #tpu.dot_dimension_numbers<[1], [0], [0], [1], [0, 0, 1, 1], [], []>} : vector<256x8xf32>, vector<8x8xf32>, vector<256x8xf32> -> vector<256x8xf32>
    %60 = arith.addf %52, %59 : vector<256x8xf32>
    %c16 = arith.constant 16 : index
    %c0_42 = arith.constant 0 : index
    %61 = vector.load %arg10[%c16, %c0_42] : memref<290x8xf32, #tpu.memory_space<vmem>>, vector<256x8xf32>
    %62 = vector.shape_cast %35 : vector<256x1xi1> to vector<256x1xi1>
    %63 = vector.broadcast %62 : vector<256x1xi1> to vector<256x8xi1>
    %64 = arith.select %63, %61, %38 : vector<256x8xi1>, vector<256x8xf32>
    %c3 = arith.constant 3 : index
    %c0_43 = arith.constant 0 : index
    %c0_44 = arith.constant 0 : index
    %65 = vector.load %arg6[%c3, %c0_43, %c0_44] : memref<9x8x8xf32, #tpu.memory_space<vmem>>, vector<1x8x8xf32>
    %66 = vector.shape_cast %65 : vector<1x8x8xf32> to vector<8x8xf32>
    %cst_45 = arith.constant dense<0.000000e+00> : vector<256x8xf32>
    %67 = tpu.matmul %64, %66, %cst_45 {dimension_numbers = #tpu.dot_dimension_numbers<[1], [0], [0], [1], [0, 0, 1, 1], [], []>} : vector<256x8xf32>, vector<8x8xf32>, vector<256x8xf32> -> vector<256x8xf32>
    %68 = arith.addf %60, %67 : vector<256x8xf32>
    %c17_46 = arith.constant 17 : index
    %c0_47 = arith.constant 0 : index
    %69 = vector.load %arg10[%c17_46, %c0_47] : memref<290x8xf32, #tpu.memory_space<vmem>>, vector<256x8xf32>
    %c4 = arith.constant 4 : index
    %c0_48 = arith.constant 0 : index
    %c0_49 = arith.constant 0 : index
    %70 = vector.load %arg6[%c4, %c0_48, %c0_49] : memref<9x8x8xf32, #tpu.memory_space<vmem>>, vector<1x8x8xf32>
    %71 = vector.shape_cast %70 : vector<1x8x8xf32> to vector<8x8xf32>
    %cst_50 = arith.constant dense<0.000000e+00> : vector<256x8xf32>
    %72 = tpu.matmul %69, %71, %cst_50 {dimension_numbers = #tpu.dot_dimension_numbers<[1], [0], [0], [1], [0, 0, 1, 1], [], []>} : vector<256x8xf32>, vector<8x8xf32>, vector<256x8xf32> -> vector<256x8xf32>
    %73 = arith.addf %68, %72 : vector<256x8xf32>
    %c18 = arith.constant 18 : index
    %c0_51 = arith.constant 0 : index
    %74 = vector.load %arg10[%c18, %c0_51] : memref<290x8xf32, #tpu.memory_space<vmem>>, vector<256x8xf32>
    %75 = vector.shape_cast %37 : vector<256x1xi1> to vector<256x1xi1>
    %76 = vector.broadcast %75 : vector<256x1xi1> to vector<256x8xi1>
    %77 = arith.select %76, %74, %38 : vector<256x8xi1>, vector<256x8xf32>
    %c5 = arith.constant 5 : index
    %c0_52 = arith.constant 0 : index
    %c0_53 = arith.constant 0 : index
    %78 = vector.load %arg6[%c5, %c0_52, %c0_53] : memref<9x8x8xf32, #tpu.memory_space<vmem>>, vector<1x8x8xf32>
    %79 = vector.shape_cast %78 : vector<1x8x8xf32> to vector<8x8xf32>
    %cst_54 = arith.constant dense<0.000000e+00> : vector<256x8xf32>
    %80 = tpu.matmul %77, %79, %cst_54 {dimension_numbers = #tpu.dot_dimension_numbers<[1], [0], [0], [1], [0, 0, 1, 1], [], []>} : vector<256x8xf32>, vector<8x8xf32>, vector<256x8xf32> -> vector<256x8xf32>
    %81 = arith.addf %73, %80 : vector<256x8xf32>
    %c32 = arith.constant 32 : index
    %c0_55 = arith.constant 0 : index
    %82 = vector.load %arg10[%c32, %c0_55] : memref<290x8xf32, #tpu.memory_space<vmem>>, vector<256x8xf32>
    %83 = vector.shape_cast %35 : vector<256x1xi1> to vector<256x1xi1>
    %84 = vector.broadcast %83 : vector<256x1xi1> to vector<256x8xi1>
    %85 = arith.select %84, %82, %38 : vector<256x8xi1>, vector<256x8xf32>
    %c6 = arith.constant 6 : index
    %c0_56 = arith.constant 0 : index
    %c0_57 = arith.constant 0 : index
    %86 = vector.load %arg6[%c6, %c0_56, %c0_57] : memref<9x8x8xf32, #tpu.memory_space<vmem>>, vector<1x8x8xf32>
    %87 = vector.shape_cast %86 : vector<1x8x8xf32> to vector<8x8xf32>
    %cst_58 = arith.constant dense<0.000000e+00> : vector<256x8xf32>
    %88 = tpu.matmul %85, %87, %cst_58 {dimension_numbers = #tpu.dot_dimension_numbers<[1], [0], [0], [1], [0, 0, 1, 1], [], []>} : vector<256x8xf32>, vector<8x8xf32>, vector<256x8xf32> -> vector<256x8xf32>
    %89 = arith.addf %81, %88 : vector<256x8xf32>
    %c33 = arith.constant 33 : index
    %c0_59 = arith.constant 0 : index
    %90 = vector.load %arg10[%c33, %c0_59] : memref<290x8xf32, #tpu.memory_space<vmem>>, vector<256x8xf32>
    %c7 = arith.constant 7 : index
    %c0_60 = arith.constant 0 : index
    %c0_61 = arith.constant 0 : index
    %91 = vector.load %arg6[%c7, %c0_60, %c0_61] : memref<9x8x8xf32, #tpu.memory_space<vmem>>, vector<1x8x8xf32>
    %92 = vector.shape_cast %91 : vector<1x8x8xf32> to vector<8x8xf32>
    %cst_62 = arith.constant dense<0.000000e+00> : vector<256x8xf32>
    %93 = tpu.matmul %90, %92, %cst_62 {dimension_numbers = #tpu.dot_dimension_numbers<[1], [0], [0], [1], [0, 0, 1, 1], [], []>} : vector<256x8xf32>, vector<8x8xf32>, vector<256x8xf32> -> vector<256x8xf32>
    %94 = arith.addf %89, %93 : vector<256x8xf32>
    %c34 = arith.constant 34 : index
    %c0_63 = arith.constant 0 : index
    %95 = vector.load %arg10[%c34, %c0_63] : memref<290x8xf32, #tpu.memory_space<vmem>>, vector<256x8xf32>
    %96 = vector.shape_cast %37 : vector<256x1xi1> to vector<256x1xi1>
    %97 = vector.broadcast %96 : vector<256x1xi1> to vector<256x8xi1>
    %98 = arith.select %97, %95, %38 : vector<256x8xi1>, vector<256x8xf32>
    %c8 = arith.constant 8 : index
    %c0_64 = arith.constant 0 : index
    %c0_65 = arith.constant 0 : index
    %99 = vector.load %arg6[%c8, %c0_64, %c0_65] : memref<9x8x8xf32, #tpu.memory_space<vmem>>, vector<1x8x8xf32>
    %100 = vector.shape_cast %99 : vector<1x8x8xf32> to vector<8x8xf32>
    %cst_66 = arith.constant dense<0.000000e+00> : vector<256x8xf32>
    %101 = tpu.matmul %98, %100, %cst_66 {dimension_numbers = #tpu.dot_dimension_numbers<[1], [0], [0], [1], [0, 0, 1, 1], [], []>} : vector<256x8xf32>, vector<8x8xf32>, vector<256x8xf32> -> vector<256x8xf32>
    %102 = arith.addf %94, %101 : vector<256x8xf32>
    %c0_67 = arith.constant 0 : index
    %c0_68 = arith.constant 0 : index
    %c0_69 = arith.constant 0 : index
    %103 = vector.load %arg7[%c0_67, %c0_68, %c0_69] : memref<1x256x8xf32, #tpu.memory_space<vmem>>, vector<1x256x8xf32>
    %104 = vector.shape_cast %103 : vector<1x256x8xf32> to vector<256x8xf32>
    %105 = vector.shape_cast %102 : vector<256x8xf32> to vector<1x256x8xf32>
    tpu.vector_store %arg7[%c0_67, %c0_68, %c0_69], %105 {strides = array<i32>} : memref<1x256x8xf32, #tpu.memory_space<vmem>>, vector<1x256x8xf32>,
    %106 = vector.extract_strided_slice %102 {offsets = [0, 0], sizes = [16, 8], strides = [1, 1]} : vector<256x8xf32> to vector<16x8xf32>
    %c0_70 = arith.constant 0 : index
    %c0_71 = arith.constant 0 : index
    %c0_72 = arith.constant 0 : index
    %c0_73 = arith.constant 0 : index
    %c0_74 = arith.constant 0 : index
    %107 = vector.load %arg9[%c0_70, %c0_71, %c0_72, %c0_73, %c0_74] : memref<1x1x2x16x8xf32, #tpu.memory_space<vmem>>, vector<1x1x1x16x8xf32>
    %108 = vector.shape_cast %107 : vector<1x1x1x16x8xf32> to vector<16x8xf32>
    %109 = vector.shape_cast %106 : vector<16x8xf32> to vector<1x1x1x16x8xf32>
    tpu.vector_store %arg9[%c0_70, %c0_71, %c0_72, %c0_73, %c0_74], %109 {strides = array<i32>} : memref<1x1x2x16x8xf32, #tpu.memory_space<vmem>>, vector<1x1x1x16x8xf32>,
    %110 = vector.extract_strided_slice %102 {offsets = [240, 0], sizes = [16, 8], strides = [1, 1]} : vector<256x8xf32> to vector<16x8xf32>
    %c0_75 = arith.constant 0 : index
    %c0_76 = arith.constant 0 : index
    %c1_77 = arith.constant 1 : index
    %c0_78 = arith.constant 0 : index
    %c0_79 = arith.constant 0 : index
    %111 = vector.load %arg9[%c0_75, %c0_76, %c1_77, %c0_78, %c0_79] : memref<1x1x2x16x8xf32, #tpu.memory_space<vmem>>, vector<1x1x1x16x8xf32>
    %112 = vector.shape_cast %111 : vector<1x1x1x16x8xf32> to vector<16x8xf32>
    %113 = vector.shape_cast %110 : vector<16x8xf32> to vector<1x1x1x16x8xf32>
    tpu.vector_store %arg9[%c0_75, %c0_76, %c1_77, %c0_78, %c0_79], %113 {strides = array<i32>} : memref<1x1x2x16x8xf32, #tpu.memory_space<vmem>>, vector<1x1x1x16x8xf32>,
    %cst_80 = arith.constant dense<0.000000e+00> : vector<8xf32>
    %114 = vector.multi_reduction <add>, %102, %cst_80 [0] : vector<256x8xf32> to vector<8xf32>
    %115 = vector.shape_cast %114 : vector<8xf32> to vector<1x8xf32>
    %116 = arith.mulf %102, %102 : vector<256x8xf32>
    %cst_81 = arith.constant dense<0.000000e+00> : vector<8xf32>
    %117 = vector.multi_reduction <add>, %116, %cst_81 [0] : vector<256x8xf32> to vector<8xf32>
    %118 = vector.shape_cast %117 : vector<8xf32> to vector<1x8xf32>
    %c0_i32_82 = arith.constant 0 : i32
    %119 = arith.cmpi eq, %arg1, %c0_i32_82 : i32
    %120 = arith.extui %119 : i1 to i32
    %c0_i32_83 = arith.constant 0 : i32
    %121 = arith.cmpi ne, %120, %c0_i32_83 : i32
    scf.if %121 {
      %c0_86 = arith.constant 0 : index
      %c0_87 = arith.constant 0 : index
      %c0_88 = arith.constant 0 : index
      %125 = vector.load %arg8[%c0_86, %c0_87, %c0_88] : memref<1x2x8xf32, #tpu.memory_space<vmem>>, vector<1x1x8xf32>
      %126 = vector.shape_cast %125 : vector<1x1x8xf32> to vector<1x8xf32>
      %127 = vector.shape_cast %115 : vector<1x8xf32> to vector<1x1x8xf32>
      tpu.vector_store %arg8[%c0_86, %c0_87, %c0_88], %127 {strides = array<i32>} : memref<1x2x8xf32, #tpu.memory_space<vmem>>, vector<1x1x8xf32>,
      %c0_89 = arith.constant 0 : index
      %c1_90 = arith.constant 1 : index
      %c0_91 = arith.constant 0 : index
      %128 = vector.load %arg8[%c0_89, %c1_90, %c0_91] : memref<1x2x8xf32, #tpu.memory_space<vmem>>, vector<1x1x8xf32>
      %129 = vector.shape_cast %128 : vector<1x1x8xf32> to vector<1x8xf32>
      %130 = vector.shape_cast %118 : vector<1x8xf32> to vector<1x1x8xf32>
      tpu.vector_store %arg8[%c0_89, %c1_90, %c0_91], %130 {strides = array<i32>} : memref<1x2x8xf32, #tpu.memory_space<vmem>>, vector<1x1x8xf32>,
    } else {
    }
    %c0_i32_84 = arith.constant 0 : i32
    %122 = arith.cmpi sgt, %arg1, %c0_i32_84 : i32
    %123 = arith.extui %122 : i1 to i32
    %c0_i32_85 = arith.constant 0 : i32
    %124 = arith.cmpi ne, %123, %c0_i32_85 : i32
    scf.if %124 {
      %c0_86 = arith.constant 0 : index
      %c0_87 = arith.constant 0 : index
      %c0_88 = arith.constant 0 : index
      %125 = vector.load %arg8[%c0_86, %c0_87, %c0_88] : memref<1x2x8xf32, #tpu.memory_space<vmem>>, vector<1x1x8xf32>
      %126 = vector.shape_cast %125 : vector<1x1x8xf32> to vector<1x8xf32>
      %127 = arith.addf %126, %115 : vector<1x8xf32>
      %c0_89 = arith.constant 0 : index
      %c0_90 = arith.constant 0 : index
      %c0_91 = arith.constant 0 : index
      %128 = vector.load %arg8[%c0_89, %c0_90, %c0_91] : memref<1x2x8xf32, #tpu.memory_space<vmem>>, vector<1x1x8xf32>
      %129 = vector.shape_cast %128 : vector<1x1x8xf32> to vector<1x8xf32>
      %130 = vector.shape_cast %127 : vector<1x8xf32> to vector<1x1x8xf32>
      tpu.vector_store %arg8[%c0_89, %c0_90, %c0_91], %130 {strides = array<i32>} : memref<1x2x8xf32, #tpu.memory_space<vmem>>, vector<1x1x8xf32>,
      %c0_92 = arith.constant 0 : index
      %c1_93 = arith.constant 1 : index
      %c0_94 = arith.constant 0 : index
      %131 = vector.load %arg8[%c0_92, %c1_93, %c0_94] : memref<1x2x8xf32, #tpu.memory_space<vmem>>, vector<1x1x8xf32>
      %132 = vector.shape_cast %131 : vector<1x1x8xf32> to vector<1x8xf32>
      %133 = arith.addf %132, %118 : vector<1x8xf32>
      %c0_95 = arith.constant 0 : index
      %c1_96 = arith.constant 1 : index
      %c0_97 = arith.constant 0 : index
      %134 = vector.load %arg8[%c0_95, %c1_96, %c0_97] : memref<1x2x8xf32, #tpu.memory_space<vmem>>, vector<1x1x8xf32>
      %135 = vector.shape_cast %134 : vector<1x1x8xf32> to vector<1x8xf32>
      %136 = vector.shape_cast %133 : vector<1x8xf32> to vector<1x1x8xf32>
      tpu.vector_store %arg8[%c0_95, %c1_96, %c0_97], %136 {strides = array<i32>} : memref<1x2x8xf32, #tpu.memory_space<vmem>>, vector<1x1x8xf32>,
    } else {
    }
    return
  }
  func.func @transform_0(%arg0: i32, %arg1: i32) -> (i32, i32, i32) {
    %c0_i32 = arith.constant 0 : i32
    %c0_i32_0 = arith.constant 0 : i32
    return %arg0, %arg1, %c0_i32 : i32, i32, i32
  }
  func.func @transform_1(%arg0: i32, %arg1: i32) -> (i32, i32, i32, i32, i32) {
    %c0_i32 = arith.constant 0 : i32
    %c0_i32_0 = arith.constant 0 : i32
    %c0_i32_1 = arith.constant 0 : i32
    %c0_i32_2 = arith.constant 0 : i32
    return %arg0, %arg1, %c0_i32, %c0_i32_0, %c0_i32_1 : i32, i32, i32, i32, i32
  }
  func.func @transform_2(%arg0: i32, %arg1: i32) -> (i32, i32) {
    %c0_i32 = arith.constant 0 : i32
    %c0_i32_0 = arith.constant 0 : i32
    %c0_i32_1 = arith.constant 0 : i32
    return %c0_i32, %c0_i32_0 : i32, i32
  }
  func.func @transform_3(%arg0: i32, %arg1: i32) -> (i32, i32) {
    %c0_i32 = arith.constant 0 : i32
    %c0_i32_0 = arith.constant 0 : i32
    %c0_i32_1 = arith.constant 0 : i32
    return %c0_i32, %c0_i32_0 : i32, i32
  }
  func.func @transform_4(%arg0: i32, %arg1: i32) -> (i32, i32, i32) {
    %c0_i32 = arith.constant 0 : i32
    %c0_i32_0 = arith.constant 0 : i32
    %c0_i32_1 = arith.constant 0 : i32
    %c0_i32_2 = arith.constant 0 : i32
    return %c0_i32, %c0_i32_0, %c0_i32_1 : i32, i32, i32
  }
  func.func @transform_5(%arg0: i32, %arg1: i32) -> (i32, i32, i32) {
    %c0_i32 = arith.constant 0 : i32
    %c0_i32_0 = arith.constant 0 : i32
    return %arg0, %arg1, %c0_i32 : i32, i32, i32
  }
  func.func @transform_6(%arg0: i32, %arg1: i32) -> (i32, i32, i32) {
    %c0_i32 = arith.constant 0 : i32
    %c0_i32_0 = arith.constant 0 : i32
    %c0_i32_1 = arith.constant 0 : i32
    return %arg0, %c0_i32, %c0_i32_0 : i32, i32, i32
  }
  func.func @transform_7(%arg0: i32, %arg1: i32) -> (i32, i32, i32, i32, i32) {
    %c0_i32 = arith.constant 0 : i32
    %c0_i32_0 = arith.constant 0 : i32
    %c0_i32_1 = arith.constant 0 : i32
    %c0_i32_2 = arith.constant 0 : i32
    return %arg0, %arg1, %c0_i32, %c0_i32_0, %c0_i32_1 : i32, i32, i32, i32, i32
  }
}

</mosaic_0001>

<bundles_post_ra>
// kernel: unet_down_forward.2
= control target key start
LH: loop header
LB: loop body
LE: loop exit
PB: predicated region body
PF: predicated region fallthrough
CT: control target
= control target key end

     0   :  { %11 = vsyncpa [#allocation4], 0  ;;  %s8064_s0 = inlined_call_operand.vmem [shape: f32[2,256,4], index: 0, kind: input, shape index: {}]   ;;  %s8065_s1 = inlined_call_operand.vmem [shape: f32[2,1,2,16,4], index: 1, kind: input, shape index: {}]   ;;  %s8066_s2 = inlined_call_operand.vmem [shape: f32[9,4,8], index: 2, kind: input, shape index: {}]   ;;  %s8067_s3 = inlined_call_operand.vmem [shape: f32[2,256,8], index: 3, kind: output, shape index: {0}]   ;;  %s8068_s4 = inlined_call_operand.vmem [shape: f32[2,2,8], index: 4, kind: output, shape index: {1}]   ;;  %s8069_s5 = inlined_call_operand.hbm [shape: f32[2,1,2,16,8], index: 5, kind: output, shape index: {2}]  }
   0x1   :  { %13 = vsyncpa [#allocation4 + $0x1], 0  ;;  %s6572_s18 = smov 0   ;;  %s6574_s19 = smov 0  }
   0x2   :  { %s6576_s20 = smov 0   ;;  %s6578_s21 = smov 0  }
   0x3   :  { %s6580_s22 = smov 0   ;;  %s6582_s23 = smov 0  }
   0x4 LB: > { %s5065_s24 = sadd.s32 4294967295, %s6537_s23   ;;  %s5066_s25 = sadd.s32 4294967294, %s6537_s23   ;;  %s6537_s23 = sphi %s6582_s23, %s19_s23   ;;  %s6533_s22 = sphi %s6580_s22, %s8586_s22   ;;  %s6529_s21 = sphi %s6578_s21, %s8585_s21   ;;  %s6525_s20 = sphi %s6576_s20, %s8584_s20   ;;  %s6521_s19 = sphi %s6574_s19, %s8583_s19   ;;  %s6517_s18 = sphi %s6572_s18, %s8582_s18  }
   0x5   : > { %s31_s26 = sadd.s32 1, %s6533_s22  ;;  %s171_s27 = sadd.s32 1, %s6525_s20 }
   0x6   : > { %p33_p0 = scmp.ge.s32.totalorder %s31_s26, 2  ;;  %p181_p1 = scmp.ne.s32.totalorder %s6525_s20, %s6521_s19 }
   0x7   : > { %p182_p2 = scmp.eq.s32.totalorder %s5065_s24, 1  ;;  %p187_p3 = scmp.ne.s32.totalorder %s6521_s19, %s6517_s18 }
   0x8   : > { %s8588_s26 = smov (%p33_p0, %s31_s26), 0  ;;  %p188_p5 = scmp.eq.s32.totalorder %s5066_s25, 1 }
   0x9   : > { %p6612_p4 = por %p182_p2, %p181_p1  ;;  %s166_s29 = ssub.s32 %s6533_s22, %s8588_s26 }
   0xa   : > { %p5069_p6 = scmp.ge.s32.totalorder %s6537_s23, 1  ;;  %p169_p7 = scmp.eq.s32.totalorder %s166_s29, 0 }
   0xb   : > { %p6619_p8 = por %p188_p5, %p187_p3  ;;  %p234_p9 = scmp.lt.s32.totalorder %s6537_s23, 3 }
   0xc   : > { %s6625_s6 = scalar_select %p169_p7, %s6525_s20, %s171_s27  }
   0xd   : > { %p235_p10 = pnand %p5069_p6, %p234_p9 }
   0xf   : > { %238 = sbr.rel (%p235_p10) target bundleno = 573 (0x23d), region = 32 }
  0x16   : > { %v5080_v0 = vld [vmem:[%s8066_s2 + $0x4] sm:$0xf]  ;;  %vm8077_vm0 = vcmask 1043456   ;;  %v6633_v1 = vld [vmem:[%s8066_s2 + $0x10] sm:$0xf]  ;;  %p289_p11 = scmp.lt.s32.totalorder %s6529_s21, 1  ;;  %v395_v43 = vlaneseq }
  0x17   : > { %5693 = vmatprep.subr.msk.mxu1 %vm8077_vm0, %v5080_v0  ;;  %5893 = vmatprep.subr.msk.mxu0 %vm8077_vm0, %v6633_v1  ;;  %v6642_v2 = vld [vmem:[%s8066_s2] sm:$0xf]  ;;  %v6647_v3 = vld [vmem:[%s8066_s2 + $0x14] sm:$0xf]  ;;  %vm8080_vm1 = vcmask 31744   ;;  %s6539_s29 = smov [#allocation3]  }
  0x18   : > { %5694 = vmatpush3.msk.msra.mxu1 %vm8077_vm0, %v5080_v0  ;;  %5894 = vmatpush3.msk.msra.mxu0 %vm8077_vm0, %v6633_v1  ;;  %s6653_s15 = scalar_select %p289_p11, %s6529_s21, 1  ;;  %v6728_v33 = vld [vmem:[%s8066_s2 + $0x18] sm:$0xf]  ;;  %v6733_v34 = vld [vmem:[%s8066_s2 + $0x8] sm:$0xf]  ;;  %v6772_v52 = vshrl.u32 %v395_v43, 7 }
  0x19   : > { %5743 = vmatprep.subr.msk.mxu1 %vm8077_vm0, %v6642_v2  ;;  %5943 = vmatprep.subr.msk.mxu0 %vm8077_vm0, %v6647_v3  ;;  %s6463_s7 = sshll.u32 %s6539_s29, 4  ;;  %s6464_s7 = int_to_ptr.vmem [resolvable:$false] %s6463_s7 }
  0x1a   : > { %s5392_s16 = sshll.u32 %s6653_s15, 8  ;;  %s5393_s17 = sshll.u32 %s6653_s15, 5  ;;  %v397_v55 = vadd.s32 8, %v6772_v52  ;;  %v399_v59 = vadd.s32 24, %v6772_v52 }
  0x1b   : > { %s6666_s27 = scalar_lea.vmem %s8064_s0, %s5392_s16  ;;  %s6671_s8 = scalar_lea.vmem %s8065_s1, %s5393_s17 }
  0x1c   : > { %v353_v4 = vld [vmem:[%s6671_s8] sm:$0xff]  ;;  %v354_v6 = vld [vmem:[%s6671_s8 + $0x8] sm:$0xff]  ;;  %v323_v8 = vld [vmem:[%s6666_s27 + $0x10] sm:$0xff]  ;;  %v439_v58 = vand.u32 15, %v397_v55  ;;  %s7855_s12 = scalar_lea.vmem %s8067_s3, %s5392_s16  ;;  %s5395_s16 = sshll.u32 %s6529_s21, 9 }
  0x1d   : > { %v321_v5 = vld [vmem:[%s6666_s27] sm:$0xff]  ;;  %356 = vst.msk [vmem:[#allocation2 + $0x1] sm:$0xff] %vm8080_vm1, %v353_v4  ;;  %357 = vst.msk [vmem:[#allocation2 + $0x9] sm:$0xff] %vm8080_vm1, %v354_v6  ;;  %v322_v7 = vld [vmem:[%s6666_s27 + $0x8] sm:$0xff]  ;;  %s7993_s24 = scalar_lea.hbm %s8069_s5, %s5395_s16 }
  0x1e   : > { %358 = vst.msk [vmem:[#allocation2 + $0x11] sm:$0xff] %vm8080_vm1, %v321_v5  ;;  %v324_v9 = vld [vmem:[%s6666_s27 + $0x18] sm:$0xff]  ;;  %359 = vst.msk [vmem:[#allocation2 + $0x19] sm:$0xff] %vm8080_vm1, %v322_v7  ;;  %v325_v10 = vld [vmem:[%s6666_s27 + $0x20] sm:$0xff]  ;;  %vm6792_vm2 = vcmp.lt.s32.totalorder %v439_v58, 15  ;;  %v398_v58 = vadd.s32 16, %v6772_v52 }
  0x1f   : > { %360 = vst.msk [vmem:[#allocation2 + $0x21] sm:$0xff] %vm8080_vm1, %v323_v8  ;;  %361 = vst.msk [vmem:[#allocation2 + $0x29] sm:$0xff] %vm8080_vm1, %v324_v9  ;;  %v326_v11 = vld [vmem:[%s6666_s27 + $0x28] sm:$0xff]  ;;  %v327_v12 = vld [vmem:[%s6666_s27 + $0x30] sm:$0xff] }
  0x20   : > { %362 = vst.msk [vmem:[#allocation2 + $0x31] sm:$0xff] %vm8080_vm1, %v325_v10  ;;  %363 = vst.msk [vmem:[#allocation2 + $0x39] sm:$0xff] %vm8080_vm1, %v326_v11  ;;  %v328_v13 = vld [vmem:[%s6666_s27 + $0x38] sm:$0xff]  ;;  %v329_v14 = vld [vmem:[%s6666_s27 + $0x40] sm:$0xff]  ;;  %v403_v11 = vadd.s32 56, %v6772_v52 }
  0x21   : > { %364 = vst.msk [vmem:[#allocation2 + $0x41] sm:$0xff] %vm8080_vm1, %v327_v12  ;;  %v330_v15 = vld [vmem:[%s6666_s27 + $0x48] sm:$0xff]  ;;  %365 = vst.msk [vmem:[#allocation2 + $0x49] sm:$0xff] %vm8080_vm1, %v328_v13  ;;  %v331_v16 = vld [vmem:[%s6666_s27 + $0x50] sm:$0xff] }
  0x22   : > { %366 = vst.msk [vmem:[#allocation2 + $0x51] sm:$0xff] %vm8080_vm1, %v329_v14  ;;  %367 = vst.msk [vmem:[#allocation2 + $0x59] sm:$0xff] %vm8080_vm1, %v330_v15  ;;  %v332_v17 = vld [vmem:[%s6666_s27 + $0x58] sm:$0xff]  ;;  %v333_v18 = vld [vmem:[%s6666_s27 + $0x60] sm:$0xff] }
  0x23   : > { %368 = vst.msk [vmem:[#allocation2 + $0x61] sm:$0xff] %vm8080_vm1, %v331_v16  ;;  %369 = vst.msk [vmem:[#allocation2 + $0x69] sm:$0xff] %vm8080_vm1, %v332_v17  ;;  %v334_v19 = vld [vmem:[%s6666_s27 + $0x68] sm:$0xff]  ;;  %v335_v20 = vld [vmem:[%s6666_s27 + $0x70] sm:$0xff] }
  0x24   : > { %370 = vst.msk [vmem:[#allocation2 + $0x71] sm:$0xff] %vm8080_vm1, %v333_v18  ;;  %v336_v21 = vld [vmem:[%s6666_s27 + $0x78] sm:$0xff]  ;;  %371 = vst.msk [vmem:[#allocation2 + $0x79] sm:$0xff] %vm8080_vm1, %v334_v19  ;;  %v337_v22 = vld [vmem:[%s6666_s27 + $0x80] sm:$0xff]  ;;  %v8185_v18 = vmov 0 }
  0x25   : > { %372 = vst.msk [vmem:[#allocation2 + $0x81] sm:$0xff] %vm8080_vm1, %v335_v20  ;;  %373 = vst.msk [vmem:[#allocation2 + $0x89] sm:$0xff] %vm8080_vm1, %v336_v21  ;;  %v338_v23 = vld [vmem:[%s6666_s27 + $0x88] sm:$0xff]  ;;  %v339_v24 = vld [vmem:[%s6666_s27 + $0x90] sm:$0xff]  ;;  %v481_v20 = vand.u32 15, %v403_v11  ;;  %v405_v21 = vadd.s32 72, %v6772_v52 }
  0x26   : > { %374 = vst.msk [vmem:[#allocation2 + $0x91] sm:$0xff] %vm8080_vm1, %v337_v22  ;;  %375 = vst.msk [vmem:[#allocation2 + $0x99] sm:$0xff] %vm8080_vm1, %v338_v23  ;;  %v340_v25 = vld [vmem:[%s6666_s27 + $0x98] sm:$0xff]  ;;  %v341_v26 = vld [vmem:[%s6666_s27 + $0xa0] sm:$0xff] }
  0x27   : > { %376 = vst.msk [vmem:[#allocation2 + $0xa1] sm:$0xff] %vm8080_vm1, %v339_v24  ;;  %v342_v27 = vld [vmem:[%s6666_s27 + $0xa8] sm:$0xff]  ;;  %v2596_v29 = vld [vmem:[#allocation2 + $0x11] sm:$0xff]  ;;  %377 = vst.msk [vmem:[#allocation2 + $0xa9] sm:$0xff] %vm8080_vm1, %v340_v25  ;;  %vm6872_vm5 = vcmp.lt.s32.totalorder %v481_v20, 15  ;;  %v400_v20 = vadd.s32 32, %v6772_v52 }
  0x28   : > { %v1005_v28 = vld [vmem:[#allocation2 + $0x1] sm:$0xff]  ;;  %v1006_v30 = vld [vmem:[#allocation2 + $0x9] sm:$0xff]  ;;  %378 = vst.msk [vmem:[#allocation2 + $0xb1] sm:$0xff] %vm8080_vm1, %v341_v26  ;;  %379 = vst.msk [vmem:[#allocation2 + $0xb9] sm:$0xff] %vm8080_vm1, %v342_v27  ;;  %5895 = vmatprep.mubr.msk.f32.mxu0 %vm8080_vm1, %v2596_v29  ;;  %v8189_v27 = vmov 0 }
  0x29   : > { %5695 = vmatprep.mubr.msk.f32.mxu1 %vm8080_vm1, %v1005_v28  ;;  %v2597_v31 = vld [vmem:[#allocation2 + $0x19] sm:$0xff]  ;;  %v2598_v32 = vld [vmem:[#allocation2 + $0x21] sm:$0xff]  ;;  %v2599_v35 = vld [vmem:[#allocation2 + $0x29] sm:$0xff]  ;;  %v8190_v27 = vsel %vm6872_vm5, 4294967295, %v8189_v27 }
  0x2a   : > { %5696 = vmatmul.mubr.msk.f32.vlgmr.msra.gmra.mrb[0].mxu1 %vm8080_vm1, %v1006_v30  ;;  %5896 = vmatmul.mubr.msk.f32.vlgmr.msra.gmra.mrb[0].mxu0 %vm8080_vm1, %v2597_v31  ;;  %v2600_v36 = vld [vmem:[#allocation2 + $0x31] sm:$0xff]  ;;  %v2601_v37 = vld [vmem:[#allocation2 + $0x39] sm:$0xff]  ;;  %v2602_v38 = vld [vmem:[#allocation2 + $0x41] sm:$0xff]  ;;  %v407_v30 = vadd.s32 88, %v6772_v52 }
  0x2b   : > { %5744 = vmatpush3.msk.msra.mxu1 %vm8077_vm0, %v6642_v2  ;;  %5944 = vmatpush3.msk.msra.mxu0 %vm8077_vm0, %v6647_v3  ;;  %v343_v39 = vld [vmem:[%s6666_s27 + $0xb0] sm:$0xff]  ;;  %v344_v41 = vld [vmem:[%s6666_s27 + $0xb8] sm:$0xff]  ;;  %v345_v44 = vld [vmem:[%s6666_s27 + $0xc0] sm:$0xff]  ;;  %v453_v2 = vand.u32 15, %v399_v59  ;;  %v401_v3 = vadd.s32 40, %v6772_v52 }
  0x2c   : > { %5698 = vmatprep.mubr.msk.f32.mxu1 %vm8080_vm1, %v2596_v29  ;;  %5898 = vmatprep.mubr.msk.f32.mxu0 %vm8080_vm1, %v2598_v32  ;;  %v2603_v40 = vld [vmem:[#allocation2 + $0x49] sm:$0xff]  ;;  %380 = vst.msk [vmem:[#allocation2 + $0xc1] sm:$0xff] %vm8080_vm1, %v343_v39  ;;  %v2604_v42 = vld [vmem:[#allocation2 + $0x51] sm:$0xff]  ;;  %381 = vst.msk [vmem:[#allocation2 + $0xc9] sm:$0xff] %vm8080_vm1, %v344_v41  ;;  %v495_v29 = vand.u32 15, %v405_v21  ;;  %v409_v39 = vadd.s32 104, %v6772_v52 }
  0x2d   : > { %5993 = vmatprep.subr.msk.mxu0 %vm8077_vm0, %v6728_v33  ;;  %5793 = vmatprep.subr.msk.mxu1 %vm8077_vm0, %v6733_v34  ;;  %v346_v45 = vld [vmem:[%s6666_s27 + $0xc8] sm:$0xff]  ;;  %382 = vst.msk [vmem:[#allocation2 + $0xd1] sm:$0xff] %vm8080_vm1, %v345_v44  ;;  %v347_v46 = vld [vmem:[%s6666_s27 + $0xd0] sm:$0xff]  ;;  %v348_v47 = vld [vmem:[%s6666_s27 + $0xd8] sm:$0xff]  ;;  %vm6814_vm3 = vcmp.lt.s32.totalorder %v453_v2, 15  ;;  %v467_v10 = vand.u32 15, %v401_v3 }
  0x2e   : > { %5699 = vmatmul.mubr.msk.f32.gmra.mrb[2].mxu1 %vm8080_vm1, %v2597_v31  ;;  %5899 = vmatmul.mubr.msk.f32.gmra.mrb[2].mxu0 %vm8080_vm1, %v2599_v35  ;;  %383 = vst.msk [vmem:[#allocation2 + $0xd9] sm:$0xff] %vm8080_vm1, %v346_v45  ;;  %384 = vst.msk [vmem:[#allocation2 + $0xe1] sm:$0xff] %vm8080_vm1, %v347_v46  ;;  %v349_v48 = vld [vmem:[%s6666_s27 + $0xe0] sm:$0xff]  ;;  %v350_v50 = vld [vmem:[%s6666_s27 + $0xe8] sm:$0xff]  ;;  %vm6895_vm6 = vcmp.lt.s32.totalorder %v495_v29, 15  ;;  %v8197_v44 = vmov 0 }
  0x2f   : > { %5701 = vmatprep.mubr.msk.f32.mxu1 %vm8080_vm1, %v2598_v32  ;;  %5901 = vmatprep.mubr.msk.f32.mxu0 %vm8080_vm1, %v2600_v36  ;;  %v2605_v49 = vld [vmem:[#allocation2 + $0x59] sm:$0xff]  ;;  %385 = vst.msk [vmem:[#allocation2 + $0xe9] sm:$0xff] %vm8080_vm1, %v348_v47  ;;  %386 = vst.msk [vmem:[#allocation2 + $0xf1] sm:$0xff] %vm8080_vm1, %v349_v48  ;;  %v2606_v51 = vld [vmem:[#allocation2 + $0x61] sm:$0xff]  ;;  %vm6845_vm4 = vcmp.lt.s32.totalorder %v467_v10, 15  ;;  %v523_v46 = vand.u32 15, %v409_v39 }
  0x30   : > { %387 = vst.msk [vmem:[#allocation2 + $0xf9] sm:$0xff] %vm8080_vm1, %v350_v50  ;;  %v2607_v53 = vld [vmem:[#allocation2 + $0x69] sm:$0xff]  ;;  %v2608_v54 = vld [vmem:[#allocation2 + $0x71] sm:$0xff]  ;;  %v2609_v56 = vld [vmem:[#allocation2 + $0x79] sm:$0xff]  ;;  %v8186_v18 = vsel %vm6845_vm4, 4294967295, %v8185_v18  ;;  %v411_v47 = vadd.s32 120, %v6772_v52 }
  0x31   : > { %v2610_v57 = vld [vmem:[#allocation2 + $0x81] sm:$0xff]  ;;  %v2611_v60 = vld [vmem:[#allocation2 + $0x89] sm:$0xff]  ;;  %v6790_v62 = vld [vmem:[#allocation2 + $0x12] sm:$0xff]  ;;  %vm6941_vm8 = vcmp.lt.s32.totalorder %v523_v46, 15  ;;  %v8207_v10 = vmov 0  ;;  %v417_v39 = vadd.s32 168, %v6772_v52 }
  0x32   : > { %5702 = vmatmul.mubr.msk.f32.gmra.mrb[4].mxu1 %vm8080_vm1, %v2599_v35  ;;  %5902 = vmatmul.mubr.msk.f32.gmra.mrb[4].mxu0 %vm8080_vm1, %v2601_v37  ;;  %v351_v61 = vld [vmem:[%s6666_s27 + $0xf0] sm:$0xff]  ;;  %v6796_v0 = vld [vmem:[#allocation2 + $0x1a] sm:$0xff]  ;;  %v6821_v12 = vld [vmem:[#allocation2 + $0x22] sm:$0xff]  ;;  %v537_v55 = vand.u32 15, %v411_v47  ;;  %v8213_v46 = vmov 0 }
  0x33   : > { %5704 = vmatprep.mubr.msk.f32.mxu1 %vm8080_vm1, %v2600_v36  ;;  %5904 = vmatprep.mubr.msk.f32.mxu0 %vm8080_vm1, %v2602_v38  ;;  %388 = vst.msk [vmem:[#allocation2 + $0x101] sm:$0xff] %vm8080_vm1, %v351_v61  ;;  %v352_v4 = vld [vmem:[%s6666_s27 + $0xf8] sm:$0xff]  ;;  %v5078_v5 = vld [vmem:[%s6671_s8 + $0x10] sm:$0xff]  ;;  %v3019_v6 = vsel %vm6792_vm2, %v6796_v0, 0.0  ;;  %v6841_v16 = vld [vmem:[#allocation2 + $0xa1] sm:$0xff]  ;;  %v8193_v36 = vmov 0 }
  0x34   : > { %389 = vst.msk [vmem:[#allocation2 + $0x109] sm:$0xff] %vm8080_vm1, %v352_v4  ;;  %393 = vst.msk [vmem:[#allocation2 + $0x111] sm:$0xff] %vm8080_vm1, %v5078_v5  ;;  %v6812_v7 = vld [vmem:[#allocation2 + $0x91] sm:$0xff]  ;;  %v6826_v13 = vld [vmem:[%s8066_s2 + $0x1c] sm:$0xf]  ;;  %v8194_v36 = vsel %vm6895_vm6, 4294967295, %v8193_v36 }
  0x35   : > { %8180 = vst [vmem:[#allocation6_spill] sm:$0xff] %v6812_v7  ;;  %v6818_v9 = vld [vmem:[#allocation2 + $0x2a] sm:$0xff]  ;;  %v6834_v14 = vld [vmem:[#allocation2 + $0x99] sm:$0xff]  ;;  %8184 = vst [vmem:[#allocation8_spill] sm:$0xff] %v6841_v16  ;;  %v415_v61 = vadd.s32 152, %v6772_v52  ;;  %vm6967_vm9 = vcmp.lt.s32.totalorder %v537_v55, 15 }
  0x36   : > { %5705 = vmatmul.mubr.msk.f32.gmra.mrb[6].mxu1 %vm8080_vm1, %v2601_v37  ;;  %5905 = vmatmul.mubr.msk.f32.gmra.mrb[6].mxu0 %vm8080_vm1, %v2603_v40  ;;  %8183 = vst [vmem:[#allocation7_spill] sm:$0xff] %v6834_v14  ;;  %v3021_v15 = vsel %vm6814_vm3, %v6818_v9, 0.0  ;;  %v6843_v17 = vld [vmem:[#allocation2 + $0x32] sm:$0xff]  ;;  %v6849_v19 = vld [vmem:[#allocation2 + $0x3a] sm:$0xff]  ;;  %v6862_v23 = vld [vmem:[#allocation2 + $0xa9] sm:$0xff]  ;;  %v8205_v4 = vmov 0 }
  0x37   : > { %5707 = vmatprep.mubr.msk.f32.mxu1 %vm8080_vm1, %v2602_v38  ;;  %5907 = vmatprep.mubr.msk.f32.mxu0 %vm8080_vm1, %v2604_v42  ;;  %v5079_v22 = vld [vmem:[%s6671_s8 + $0x18] sm:$0xff]  ;;  %8187 = vst [vmem:[#allocation9_spill] sm:$0xff] %v6862_v23  ;;  %v3023_v24 = vsel %vm6845_vm4, %v6849_v19, 0.0  ;;  %v6870_v26 = vld [vmem:[#allocation2 + $0x42] sm:$0xff]  ;;  %v6876_v28 = vld [vmem:[#allocation2 + $0x4a] sm:$0xff]  ;;  %v509_v38 = vand.u32 15, %v407_v30 }
  0x38   : > { %394 = vst.msk [vmem:[#allocation2 + $0x119] sm:$0xff] %vm8080_vm1, %v5079_v22  ;;  %v6868_v25 = vld [vmem:[#allocation2 + $0xb1] sm:$0xff]  ;;  %v6886_v31 = vld [vmem:[#allocation2 + $0xb9] sm:$0xff]  ;;  %v3025_v32 = vsel %vm6872_vm5, %v6876_v28, 0.0  ;;  %v6916_v43 = vld [vmem:[#allocation2 + $0x62] sm:$0xff]  ;;  %v8206_v4 = vsel %vm6967_vm9, 4294967295, %v8205_v4 }
  0x39   : > { %8188 = vst [vmem:[#allocation10_spill] sm:$0xff] %v6868_v25  ;;  %8191 = vst [vmem:[#allocation11_spill] sm:$0xff] %v6886_v31  ;;  %v6893_v35 = vld [vmem:[#allocation2 + $0x52] sm:$0xff]  ;;  %v6899_v37 = vld [vmem:[#allocation2 + $0x5a] sm:$0xff]  ;;  %vm6918_vm7 = vcmp.lt.s32.totalorder %v509_v38, 15  ;;  %s285_s8 = sand.u32 1, %s6521_s19  }
  0x3a   : > { %5708 = vmatmul.mubr.msk.f32.gmra.mrb[8].mxu1 %vm8080_vm1, %v2603_v40  ;;  %5908 = vmatmul.mubr.msk.f32.gmra.mrb[8].mxu0 %vm8080_vm1, %v2605_v49  ;;  %v6909_v40 = vld [vmem:[#allocation2 + $0xc9] sm:$0xff]  ;;  %v3027_v41 = vsel %vm6895_vm6, %v6899_v37, 0.0  ;;  %v8198_v44 = vsel %vm6918_vm7, 4294967295, %v8197_v44  ;;  %v6932_v48 = vld [vmem:[#allocation2 + $0xd9] sm:$0xff]  ;;  %v6937_v50 = vld [vmem:[#allocation2 + $0xe1] sm:$0xff]  ;;  %s5070_s9 = sshll.u32 %s285_s8, 5 }
  0x3b   : > { %5710 = vmatprep.mubr.msk.f32.mxu1 %vm8080_vm1, %v2604_v42  ;;  %5910 = vmatprep.mubr.msk.f32.mxu0 %vm8080_vm1, %v2606_v51  ;;  %8195 = vst [vmem:[#allocation13_spill] sm:$0xff] %v6909_v40  ;;  %v6914_v42 = vld [vmem:[#allocation2 + $0xd1] sm:$0xff]  ;;  %8199 = vst [vmem:[#allocation15_spill] sm:$0xff] %v6932_v48  ;;  %v6957_v59 = vld [vmem:[#allocation2 + $0xe9] sm:$0xff]  ;;  %s7859_s13 = scalar_lea.vmem [#allocation3], %s5070_s9  ;;  %s8012_s25 = scalar_lea.sflag [#allocation4], %s285_s8 }
  0x3c   : > { %8196 = vst [vmem:[#allocation14_spill] sm:$0xff] %v6914_v42  ;;  %v6922_v45 = vld [vmem:[#allocation2 + $0x6a] sm:$0xff]  ;;  %8200 = vst [vmem:[#allocation16_spill] sm:$0xff] %v6937_v50  ;;  %v6965_v3 = vld [vmem:[#allocation2 + $0x82] sm:$0xff]  ;;  %s4904_s14 = sshll.u32 %s7859_s13, 4  ;;  %s6465_s9 = scalar_lea.vmem %s6464_s7, 1024  ;;  %s7995_s14 = int_to_ptr.vmem [resolvable:$true] %s4904_s14 }
  0x3d   : > { %8203 = vst [vmem:[#allocation17_spill] sm:$0xff] %v6957_v59  ;;  %v6963_v2 = vld [vmem:[#allocation2 + $0xf1] sm:$0xff]  ;;  %v876_v11 = vld [vmem:[#allocation2] sm:$0xff]  ;;  %v7042_v55 = vld [vmem:[%s8066_s2 + $0xc] sm:$0xf]  ;;  %s6459_s27 = scalar_lea.vmem %s7995_s14, 512  ;;  %p6466_p1 = scmp.lt.s32.totalorder %s7995_s14, %s6464_s7 }
  0x3e   : > { %5711 = vmatmul.mubr.msk.f32.gmra.mrb[10].mxu1 %vm8080_vm1, %v2605_v49  ;;  %5911 = vmatmul.mubr.msk.f32.gmra.mrb[10].mxu0 %vm8080_vm1, %v2607_v53  ;;  %v3029_v49 = vsel %vm6918_vm7, %v6922_v45, 0.0  ;;  %8204 = vst [vmem:[#allocation18_spill] sm:$0xff] %v6963_v2  ;;  %v6971_v5 = vld [vmem:[#allocation2 + $0x8a] sm:$0xff]  ;;  %v6985_v21 = vld [vmem:[#allocation2 + $0xf9] sm:$0xff]  ;;  %p6460_p12 = scmp.ne.s32.totalorder %s7995_s14, %s6459_s27  ;;  %p6467_p2 = scmp.lt.s32.totalorder %s6465_s9, %s6459_s27 }
  0x3f   : > { %5713 = vmatprep.mubr.msk.f32.mxu1 %vm8080_vm1, %v2606_v51  ;;  %5913 = vmatprep.mubr.msk.f32.mxu0 %vm8080_vm1, %v2608_v54  ;;  %v6939_v51 = vld [vmem:[#allocation2 + $0x72] sm:$0xff]  ;;  %8210 = vst [vmem:[#allocation20_spill] sm:$0xff] %v6985_v21  ;;  %v3033_v22 = vsel %vm6967_vm9, %v6971_v5, 0.0  ;;  %v6998_v38 = vld [vmem:[#allocation2 + $0x9a] sm:$0xff] }
  0x40   : > { %v6992_v30 = vld [vmem:[#allocation2 + $0x92] sm:$0xff]  ;;  %p6461_p13 = pnand %p6460_p12, %p6612_p4  ;;  %p6468_p3 = por %p6467_p2, %p6466_p1 }
  0x41   : > { %v7006_v47 = vld [vmem:[#allocation2 + $0x10] sm:$0xff] }
  0x42   : > { %5714 = vmatmul.mubr.msk.f32.gmra.mrb[12].mxu1 %vm8080_vm1, %v2607_v53  ;;  %5914 = vmatmul.mubr.msk.f32.gmra.mrb[12].mxu0 %vm8080_vm1, %v2609_v56  ;;  %v8201_v53 = vmov 0  ;;  %8216 = vst [vmem:[#allocation22_spill] sm:$0xff] %v7006_v47  ;;  %p6462_p0 = pneg %p6461_p13 }
  0x43   : > { %5716 = vmatprep.mubr.msk.f32.mxu1 %vm8080_vm1, %v2608_v54  ;;  %5916 = vmatprep.mubr.msk.f32.mxu0 %vm8080_vm1, %v2610_v57  ;;  %v8202_v53 = vsel %vm6941_vm8, 4294967295, %v8201_v53  ;;  %v6945_v54 = vld [vmem:[#allocation2 + $0x7a] sm:$0xff] }
  0x44   : > { %p6469_p5 = pnand %p6468_p3, %p6462_p0 }
  0x46   : > { %5717 = vmatmul.mubr.msk.f32.gmra.mrb[14].mxu1 %vm8080_vm1, %v2609_v56  ;;  %5917 = vmatmul.mubr.msk.f32.gmra.mrb[14].mxu0 %vm8080_vm1, %v2611_v60  ;;  %v413_v56 = vadd.s32 136, %v6772_v52 }
  0x47   : > { %5719 = vmatprep.mubr.msk.f32.mxu1 %vm8080_vm1, %v2610_v57  ;;  %5945 = vmatprep.mubr.msk.f32.mxu0 %vm8080_vm1, %v6790_v62  ;;  %v432_v57 = vand.u32 15, %v6772_v52 }
  0x49   : > { %vm6973_vm10 = vcmp.gt.s32.totalorder %v432_v57, 0 }
  0x4a   : > { %5720 = vmatmul.mubr.msk.f32.gmra.mrb[16].mxu1 %vm8080_vm1, %v2611_v60  ;;  %5946 = vmatmul.mubr.msk.f32.vlgmr.msra.gmra.mrb[0].mxu0 %vm8080_vm1, %v3019_v6  ;;  %v3031_v60 = vsel %vm6941_vm8, %v6945_v54, 0.0  ;;  %v551_v6 = vand.u32 15, %v413_v56  ;;  %v8208_v10 = vsel %vm6973_vm10, 4294967295, %v8207_v10  ;;  %v972_v29 = vsel %vm6973_vm10, %v876_v11, 0.0  ;;  %v877_v56 = vld [vmem:[#allocation2 + $0x8] sm:$0xff] }
  0x4b   : > { %5994 = vmatpush3.msk.msra.mxu0 %vm8077_vm0, %v6728_v33  ;;  %5722 = vmatprep.mubr.msk.f32.mxu1 %vm8080_vm1, %v6812_v7  ;;  %v6891_v33 = vld [vmem:[#allocation2 + $0xc1] sm:$0xff]  ;;  %8209 = vst [vmem:[#allocation19_spill] sm:$0xff] %v8208_v10  ;;  %v8301_v10 = vmov 0 }
  0x4c   : > { %5948 = vmatprep.mubr.msk.f32.mxu0 %vm8080_vm1, %v6821_v12  ;;  %6043 = vmatprep.subr.msk.mxu0 %vm8077_vm0, %v6826_v13  ;;  %8192 = vst [vmem:[#allocation12_spill] sm:$0xff] %v6891_v33  ;;  %vm6994_vm11 = vcmp.lt.s32.totalorder %v551_v6, 15  ;;  %v579_v6 = vand.u32 15, %v417_v39  ;;  %v7049_v39 = vld [vmem:[#allocation2 + $0x18] sm:$0xff] }
  0x4d   : > { %v3035_v57 = vsel %vm6994_vm11, %v6998_v38, 0.0  ;;  %8226 = vst [vmem:[#allocation28_spill] sm:$0xff] %v7049_v39 }
  0x4e   : > { %5723 = vmatmul.mubr.msk.f32.gmra.mrb[18].mxu1 %vm8080_vm1, %v6834_v14  ;;  %5949 = vmatmul.mubr.msk.f32.gmra.mrb[2].mxu0 %vm8080_vm1, %v3021_v15  ;;  %v446_v15 = vand.u32 15, %v398_v58  ;;  %v8217_v58 = vmov 0  ;;  %vm7064_vm15 = vcmp.lt.s32.totalorder %v579_v6, 15  ;;  %v406_v6 = vadd.s32 80, %v6772_v52  ;;  %v7143_v14 = vld [vmem:[#allocation2 + $0x50] sm:$0xff] }
  0x4f   : > { %5725 = vmatprep.mubr.msk.f32.mxu1 %vm8080_vm1, %v6841_v16  ;;  %5951 = vmatprep.mubr.msk.f32.mxu0 %vm8080_vm1, %v6843_v17  ;;  %v425_v16 = vadd.s32 232, %v6772_v52  ;;  %8257 = vst [vmem:[#allocation43_spill] sm:$0xff] %v7143_v14 }
  0x50   : > { %vm7002_vm12 = vcmp.gt.s32.totalorder %v446_v15, 0  ;;  %v419_v15 = vadd.s32 184, %v6772_v52 }
  0x51   : > { %v8214_v46 = vsel %vm7002_vm12, 4294967295, %v8213_v46 }
  0x52   : > { %5726 = vmatmul.mubr.msk.f32.gmra.mrb[20].mxu1 %vm8080_vm1, %v6862_v23  ;;  %5952 = vmatmul.mubr.msk.f32.gmra.mrb[4].mxu0 %vm8080_vm1, %v3023_v24  ;;  %v565_v24 = vand.u32 15, %v415_v61  ;;  %8215 = vst [vmem:[#allocation21_spill] sm:$0xff] %v8214_v46  ;;  %v7027_v61 = vld [vmem:[#allocation2 + $0xaa] sm:$0xff]  ;;  %v408_v23 = vadd.s32 96, %v6772_v52  ;;  %v7341_v46 = vld [vmem:[#allocation2 + $0xc0] sm:$0xff] }
  0x53   : > { %5728 = vmatprep.mubr.msk.f32.mxu1 %vm8080_vm1, %v6868_v25  ;;  %5954 = vmatprep.mubr.msk.f32.mxu0 %vm8080_vm1, %v6870_v26  ;;  %8220 = vst [vmem:[#allocation24_spill] sm:$0xff] %v7027_v61  ;;  %v502_v25 = vand.u32 15, %v406_v6 }
  0x54   : > { %vm7020_vm13 = vcmp.lt.s32.totalorder %v565_v24, 15  ;;  %v7036_v24 = vld [vmem:[#allocation2 + $0x20] sm:$0xff]  ;;  %v516_v7 = vand.u32 15, %v408_v23 }
  0x55   : > { %v8218_v58 = vsel %vm7020_vm13, 4294967295, %v8217_v58  ;;  %8225 = vst [vmem:[#allocation27_spill] sm:$0xff] %v7036_v24 }
  0x56   : > { %5729 = vmatmul.mubr.msk.f32.gmra.mrb[22].mxu1 %vm8080_vm1, %v6886_v31  ;;  %5955 = vmatmul.mubr.msk.f32.gmra.mrb[6].mxu0 %vm8080_vm1, %v3025_v32  ;;  %v8211_v32 = vmov 0  ;;  %8219 = vst [vmem:[#allocation23_spill] sm:$0xff] %v8218_v58  ;;  %v7110_v31 = vld [vmem:[#allocation2 + $0x40] sm:$0xff]  ;;  %v418_v58 = vadd.s32 176, %v6772_v52 }
  0x57   : > { %5731 = vmatprep.mubr.msk.f32.mxu1 %vm8080_vm1, %v6891_v33  ;;  %5957 = vmatprep.mubr.msk.f32.mxu0 %vm8080_vm1, %v6893_v35  ;;  %v8212_v32 = vsel %vm6994_vm11, 4294967295, %v8211_v32  ;;  %v8242_v33 = vmov 0  ;;  %8244 = vst [vmem:[#allocation38_spill] sm:$0xff] %v7110_v31 }
  0x5a   : > { %5732 = vmatmul.mubr.msk.f32.gmra.mrb[24].mxu1 %vm8080_vm1, %v6909_v40  ;;  %5958 = vmatmul.mubr.msk.f32.gmra.mrb[8].mxu0 %vm8080_vm1, %v3027_v41  ;;  %v402_v41 = vadd.s32 48, %v6772_v52  ;;  %v423_v40 = vadd.s32 216, %v6772_v52 }
  0x5b   : > { %5734 = vmatprep.mubr.msk.f32.mxu1 %vm8080_vm1, %v6914_v42  ;;  %5960 = vmatprep.mubr.msk.f32.mxu0 %vm8080_vm1, %v6916_v43  ;;  %v8238_v42 = vmov 0 }
  0x5c   : > { %v474_v11 = vand.u32 15, %v402_v41  ;;  %v3037_v41 = vsel %vm7020_vm13, %v7027_v61, 0.0  ;;  %v8286_v61 = vmov 0 }
  0x5e   : > { %5735 = vmatmul.mubr.msk.f32.gmra.mrb[26].mxu1 %vm8080_vm1, %v6932_v48  ;;  %5961 = vmatmul.mubr.msk.f32.gmra.mrb[10].mxu0 %vm8080_vm1, %v3029_v49  ;;  %v460_v49 = vand.u32 15, %v400_v20  ;;  %v7030_v20 = vld [vmem:[#allocation2 + $0xa2] sm:$0xff]  ;;  %vm7073_vm13 = vcmp.gt.s32.totalorder %v474_v11, 0 }
  0x5f   : > { %5737 = vmatprep.mubr.msk.f32.mxu1 %vm8080_vm1, %v6937_v50  ;;  %5963 = vmatprep.mubr.msk.f32.mxu0 %vm8080_vm1, %v6939_v51  ;;  %8221 = vst [vmem:[#allocation25_spill] sm:$0xff] %v7030_v20  ;;  %v7089_v11 = vld [vmem:[#allocation2 + $0x28] sm:$0xff] }
  0x60   : > { %vm7032_vm14 = vcmp.gt.s32.totalorder %v460_v49, 0  ;;  %v8232_v49 = vmov 0  ;;  %8236 = vst [vmem:[#allocation34_spill] sm:$0xff] %v7089_v11 }
  0x61   : > { %v8233_v49 = vsel %vm7073_vm13, 4294967295, %v8232_v49 }
  0x62   : > { %5738 = vmatmul.mubr.msk.f32.gmra.mrb[28].mxu1 %vm8080_vm1, %v6957_v59  ;;  %5964 = vmatmul.mubr.msk.f32.gmra.mrb[12].mxu0 %vm8080_vm1, %v3031_v60  ;;  %v974_v60 = vsel %vm7002_vm12, %v7006_v47, 0.0  ;;  %8234 = vst [vmem:[#allocation32_spill] sm:$0xff] %v8233_v49  ;;  %v7077_v59 = vld [vmem:[#allocation2 + $0x30] sm:$0xff]  ;;  %v8255_v47 = vmov 0 }
  0x63   : > { %5740 = vmatprep.mubr.msk.f32.mxu1 %vm8080_vm1, %v6963_v2  ;;  %5966 = vmatprep.mubr.msk.f32.mxu0 %vm8080_vm1, %v6965_v3  ;;  %v421_v2 = vadd.s32 200, %v6772_v52  ;;  %8235 = vst [vmem:[#allocation33_spill] sm:$0xff] %v7077_v59  ;;  %v978_v48 = vsel %vm7073_vm13, %v7077_v59, 0.0  ;;  %v7362_v49 = vld [vmem:[#allocation2 + $0xd0] sm:$0xff] }
  0x66   : > { %5741 = vmatmul.mubr.msk.f32.gmra.mrb[30].mxu1 %vm8080_vm1, %v6985_v21  ;;  %5967 = vmatmul.mubr.msk.f32.gmra.mrb[14].mxu0 %vm8080_vm1, %v3033_v22  ;;  %v8222_v22 = vmov 0  ;;  %v593_v21 = vand.u32 15, %v419_v15  ;;  %v607_v15 = vand.u32 15, %v421_v2  ;;  %v621_v2 = vand.u32 15, %v423_v40 }
  0x67   : > { %5745 = vmatprep.mubr.msk.f32.mxu1 %vm8080_vm1, %v972_v29  ;;  %5969 = vmatprep.mubr.msk.f32.mxu0 %vm8080_vm1, %v6992_v30  ;;  %v8223_v22 = vsel %vm7032_vm14, 4294967295, %v8222_v22  ;;  %v404_v29 = vadd.s32 64, %v6772_v52  ;;  %v635_v40 = vand.u32 15, %v425_v16 }
  0x68   : > { %8224 = vst [vmem:[#allocation26_spill] sm:$0xff] %v8223_v22  ;;  %v4230_v22 = vld [vmem:[#allocation2 + $0x72] sm:$0xff] }
  0x69   : > { %v488_v50 = vand.u32 15, %v404_v29 }
  0x6a   : > { %5746 = vmatmul.mubr.msk.f32.vlgmr.msra.gmra.mrb[0].mxu1 %vm8080_vm1, %v877_v56  ;;  %5970 = vmatmul.mubr.msk.f32.gmra.mrb[16].mxu0 %vm8080_vm1, %v3035_v57  ;;  %v976_v56 = vsel %vm7032_vm14, %v7036_v24, 0.0  ;;  %v8228_v57 = vmov 0 }
  0x6b   : > { %5794 = vmatpush3.msk.msra.mxu1 %vm8077_vm0, %v6733_v34  ;;  %5748 = vmatprep.mubr.msk.f32.mxu1 %vm8080_vm1, %v974_v60  ;;  %v7062_v34 = vld [vmem:[#allocation2 + $0xb2] sm:$0xff]  ;;  %v8229_v57 = vsel %vm7064_vm15, 4294967295, %v8228_v57  ;;  %v7068_v60 = vld [vmem:[#allocation2 + $0xba] sm:$0xff] }
  0x6c   : > { %5972 = vmatprep.mubr.msk.f32.mxu0 %vm8080_vm1, %v7030_v20  ;;  %8227 = vst [vmem:[#allocation29_spill] sm:$0xff] %v7062_v34  ;;  %8230 = vst [vmem:[#allocation30_spill] sm:$0xff] %v8229_v57  ;;  %5843 = vmatprep.subr.msk.mxu1 %vm8077_vm0, %v7042_v55  ;;  %v3039_v29 = vsel %vm7064_vm15, %v7068_v60, 0.0  ;;  %vm7099_vm0 = vcmp.lt.s32.totalorder %v593_v21, 15  ;;  %vm8245_vm15 = vcmask 31744   ;;  %v7208_v57 = vld [vmem:[#allocation2 + $0x70] sm:$0xff] }
  0x6d   : > { %8231 = vst [vmem:[#allocation31_spill] sm:$0xff] %v7068_v60  ;;  %v8239_v42 = vsel %vm7099_vm0, 4294967295, %v8238_v42  ;;  %vm8246_vm11 = vmmov %vm8245_vm15  ;;  %v412_v60 = vadd.s32 128, %v6772_v52 }
  0x6e   : > { %5749 = vmatmul.mubr.msk.f32.gmra.mrb[2].mxu1 %vm8080_vm1, %v7049_v39  ;;  %5973 = vmatmul.mubr.msk.f32.gmra.mrb[18].mxu0 %vm8080_vm1, %v3037_v41  ;;  %v7097_v41 = vld [vmem:[#allocation2 + $0xc2] sm:$0xff]  ;;  %8240 = vst [vmem:[#allocation36_spill] sm:$0xff] %v8239_v42  ;;  %vm8247_vm9 = vmmov %vm8246_vm11  ;;  %v8251_v39 = vmov 0  ;;  %v8267_v42 = vmov 0 }
  0x6f   : > { %5751 = vmatprep.mubr.msk.f32.mxu1 %vm8080_vm1, %v976_v56  ;;  %5975 = vmatprep.mubr.msk.f32.mxu0 %vm8080_vm1, %v7062_v34  ;;  %8237 = vst [vmem:[#allocation35_spill] sm:$0xff] %v7097_v41  ;;  %v7103_v56 = vld [vmem:[#allocation2 + $0xca] sm:$0xff]  ;;  %vm7106_vm1 = vcmp.gt.s32.totalorder %v488_v50, 0  ;;  %vm8248_vm8 = vmmov %vm8247_vm9  ;;  %v7122_v50 = vld [vmem:[#allocation2 + $0x38] sm:$0xff]  ;;  %v8275_v34 = vmov 0 }
  0x70   : > { %8241 = vst [vmem:[#allocation37_spill] sm:$0xff] %v7103_v56  ;;  %v8243_v33 = vsel %vm7106_vm1, 4294967295, %v8242_v33  ;;  %8249 = vst [vmem:[#allocation39_spill] sm:$0xff] %v7122_v50  ;;  %v3041_v21 = vsel %vm7099_vm0, %v7103_v56, 0.0  ;;  %v980_v6 = vsel %vm7106_vm1, %v7110_v31, 0.0  ;;  %v410_v56 = vadd.s32 112, %v6772_v52 }
  0x71   : > { %vm8259_vm0 = vmmov %vm8247_vm9  ;;  %8281 = vst [vmem:[#allocation53_spill] sm:$0xff] %v7208_v57 }
  0x72   : > { %5752 = vmatmul.mubr.msk.f32.gmra.mrb[4].mxu1 %vm8245_vm15, %v7089_v11  ;;  %5976 = vmatmul.mubr.msk.f32.gmra.mrb[20].mxu0 %vm8246_vm11, %v3039_v29  ;;  %v7130_v29 = vld [vmem:[#allocation2 + $0xd2] sm:$0xff]  ;;  %vm7132_vm11 = vcmp.lt.s32.totalorder %v607_v15, 15  ;;  %vm8258_vm15 = vmmov %vm8247_vm9 }
  0x73   : > { %5754 = vmatprep.mubr.msk.f32.mxu1 %vm8247_vm9, %v978_v48  ;;  %5978 = vmatprep.mubr.msk.f32.mxu0 %vm8248_vm8, %v7097_v41  ;;  %8250 = vst [vmem:[#allocation40_spill] sm:$0xff] %v7130_v29  ;;  %v8252_v39 = vsel %vm7132_vm11, 4294967295, %v8251_v39  ;;  %v7136_v48 = vld [vmem:[#allocation2 + $0xda] sm:$0xff]  ;;  %vm7139_vm8 = vcmp.gt.s32.totalorder %v502_v25, 0  ;;  %vm8260_vm7 = vmmov %vm8259_vm0  ;;  %v7155_v25 = vld [vmem:[#allocation2 + $0x48] sm:$0xff]  ;;  %v8263_v41 = vmov 0 }
  0x74   : > { %8253 = vst [vmem:[#allocation41_spill] sm:$0xff] %v8252_v39  ;;  %8254 = vst [vmem:[#allocation42_spill] sm:$0xff] %v7136_v48  ;;  %v8256_v47 = vsel %vm7139_vm8, 4294967295, %v8255_v47  ;;  %v3043_v23 = vsel %vm7132_vm11, %v7136_v48, 0.0  ;;  %v982_v15 = vsel %vm7139_vm8, %v7143_v14, 0.0  ;;  %v7176_v48 = vld [vmem:[#allocation2 + $0x60] sm:$0xff] }
  0x75   : > { %8261 = vst [vmem:[#allocation44_spill] sm:$0xff] %v7155_v25  ;;  %8269 = vst [vmem:[#allocation48_spill] sm:$0xff] %v7176_v48  ;;  %v530_v39 = vand.u32 15, %v410_v56 }
  0x76   : > { %5755 = vmatmul.mubr.msk.f32.gmra.mrb[6].mxu1 %vm8247_vm9, %v7122_v50  ;;  %5979 = vmatmul.mubr.msk.f32.gmra.mrb[22].mxu0 %vm8258_vm15, %v3041_v21  ;;  %v7163_v21 = vld [vmem:[#allocation2 + $0xe2] sm:$0xff]  ;;  %vm7165_vm9 = vcmp.lt.s32.totalorder %v621_v2, 15  ;;  %vm8270_vm15 = vmmov %vm8260_vm7 }
  0x77   : > { %5757 = vmatprep.mubr.msk.f32.mxu1 %vm8259_vm0, %v980_v6  ;;  %5981 = vmatprep.mubr.msk.f32.mxu0 %vm8260_vm7, %v7130_v29  ;;  %8262 = vst [vmem:[#allocation45_spill] sm:$0xff] %v7163_v21  ;;  %v8264_v41 = vsel %vm7165_vm9, 4294967295, %v8263_v41  ;;  %v7169_v6 = vld [vmem:[#allocation2 + $0xea] sm:$0xff]  ;;  %v427_v29 = vadd.s32 248, %v6772_v52  ;;  %vm7172_vm0 = vcmp.gt.s32.totalorder %v516_v7, 0  ;;  %vm8271_vm11 = vmmov %vm8260_vm7  ;;  %v7188_v7 = vld [vmem:[#allocation2 + $0x58] sm:$0xff] }
  0x78   : > { %8265 = vst [vmem:[#allocation46_spill] sm:$0xff] %v8264_v41  ;;  %8266 = vst [vmem:[#allocation47_spill] sm:$0xff] %v7169_v6  ;;  %v8268_v42 = vsel %vm7172_vm0, 4294967295, %v8267_v42  ;;  %v3045_v56 = vsel %vm7165_vm9, %v7169_v6, 0.0  ;;  %v984_v2 = vsel %vm7172_vm0, %v7176_v48, 0.0  ;;  %v544_v6 = vand.u32 15, %v412_v60 }
  0x79   : > { %vm8272_vm6 = vmmov %vm8260_vm7  ;;  %8273 = vst [vmem:[#allocation49_spill] sm:$0xff] %v7188_v7  ;;  %v649_v16 = vand.u32 15, %v427_v29  ;;  %v414_v41 = vadd.s32 144, %v6772_v52 }
  0x7a   : > { %5758 = vmatmul.mubr.msk.f32.gmra.mrb[8].mxu1 %vm8260_vm7, %v7155_v25  ;;  %5982 = vmatmul.mubr.msk.f32.gmra.mrb[24].mxu0 %vm8270_vm15, %v3043_v23  ;;  %v7196_v23 = vld [vmem:[#allocation2 + $0xf2] sm:$0xff]  ;;  %vm7198_vm7 = vcmp.lt.s32.totalorder %v635_v40, 15  ;;  %vm8282_vm15 = vmmov %vm8271_vm11 }
  0x7b   : > { %5760 = vmatprep.mubr.msk.f32.mxu1 %vm8271_vm11, %v982_v15  ;;  %5984 = vmatprep.mubr.msk.f32.mxu0 %vm8272_vm6, %v7163_v21  ;;  %8274 = vst [vmem:[#allocation50_spill] sm:$0xff] %v7196_v23  ;;  %v8276_v34 = vsel %vm7198_vm7, 4294967295, %v8275_v34  ;;  %v7202_v15 = vld [vmem:[#allocation2 + $0xfa] sm:$0xff]  ;;  %vm7204_vm6 = vcmp.gt.s32.totalorder %v530_v39, 0  ;;  %v8279_v21 = vmov 0  ;;  %vm8283_vm9 = vmmov %vm8271_vm11  ;;  %v7220_v39 = vld [vmem:[#allocation2 + $0x68] sm:$0xff] }
  0x7c   : > { %8277 = vst [vmem:[#allocation51_spill] sm:$0xff] %v8276_v34  ;;  %8278 = vst [vmem:[#allocation52_spill] sm:$0xff] %v7202_v15  ;;  %v8280_v21 = vsel %vm7204_vm6, 4294967295, %v8279_v21  ;;  %v3047_v60 = vsel %vm7198_vm7, %v7202_v15, 0.0  ;;  %v986_v29 = vsel %vm7204_vm6, %v7208_v57, 0.0  ;;  %v558_v34 = vand.u32 15, %v414_v41 }
  0x7d   : > { %vm8284_vm5 = vmmov %vm8283_vm9  ;;  %v416_v15 = vadd.s32 160, %v6772_v52 }
  0x7e   : > { %5761 = vmatmul.mubr.msk.f32.gmra.mrb[10].mxu1 %vm8271_vm11, %v7188_v7  ;;  %5985 = vmatmul.mubr.msk.f32.gmra.mrb[26].mxu0 %vm8282_vm15, %v3045_v56  ;;  %v7228_v56 = vld [vmem:[#allocation2 + $0x102] sm:$0xff]  ;;  %vm7230_vm11 = vcmp.lt.s32.totalorder %v649_v16, 15  ;;  %vm8292_vm15 = vmmov %vm8284_vm5 }
  0x7f   : > { %5763 = vmatprep.mubr.msk.f32.mxu1 %vm8283_vm9, %v984_v2  ;;  %5987 = vmatprep.mubr.msk.f32.mxu0 %vm8284_vm5, %v7196_v23  ;;  %8285 = vst [vmem:[#allocation54_spill] sm:$0xff] %v7228_v56  ;;  %v8287_v61 = vsel %vm7230_vm11, 4294967295, %v8286_v61  ;;  %v7234_v2 = vld [vmem:[#allocation2 + $0x10a] sm:$0xff]  ;;  %vm7236_vm9 = vcmp.gt.s32.totalorder %v544_v6, 0  ;;  %v7240_v23 = vld [vmem:[#allocation2 + $0x80] sm:$0xff]  ;;  %vm8293_vm7 = vmmov %vm8284_vm5 }
  0x80   : > { %8288 = vst [vmem:[#allocation55_spill] sm:$0xff] %v7234_v2  ;;  %8291 = vst [vmem:[#allocation56_spill] sm:$0xff] %v7240_v23  ;;  %v7252_v6 = vld [vmem:[#allocation2 + $0x78] sm:$0xff]  ;;  %v3049_v41 = vsel %vm7230_vm11, %v7234_v2, 0.0  ;;  %v988_v20 = vsel %vm7236_vm9, %v7240_v23, 0.0  ;;  %v7291_v2 = vld [vmem:[#allocation2 + $0xa0] sm:$0xff] }
  0x81   : > { %vm8294_vm4 = vmmov %vm8284_vm5  ;;  %8295 = vst [vmem:[#allocation57_spill] sm:$0xff] %v7252_v6  ;;  %v4224_v16 = vld [vmem:[#allocation2 + $0x42] sm:$0xff] }
  0x82   : > { %5764 = vmatmul.mubr.msk.f32.gmra.mrb[12].mxu1 %vm8284_vm5, %v7220_v39  ;;  %5988 = vmatmul.mubr.msk.f32.gmra.mrb[28].mxu0 %vm8292_vm15, %v3047_v60  ;;  %v3440_v60 = vsel %vm6973_vm10, %v7036_v24, 0.0  ;;  %vm7263_vm5 = vcmp.gt.s32.totalorder %v558_v34, 0  ;;  %vm8299_vm15 = vmmov %vm8294_vm4  ;;  %v7278_v34 = vld [vmem:[#allocation2 + $0x88] sm:$0xff]  ;;  %v420_v24 = vadd.s32 192, %v6772_v52 }
  0x83   : > { %5766 = vmatprep.mubr.msk.f32.mxu1 %vm8293_vm7, %v986_v29  ;;  %5990 = vmatprep.mubr.msk.f32.mxu0 %vm8294_vm4, %v7228_v56  ;;  %v7267_v29 = vld [vmem:[#allocation2 + $0x90] sm:$0xff]  ;;  %v572_v56 = vand.u32 15, %v416_v15  ;;  %vm8298_vm7 = vmmov %vm8294_vm4 }
  0x84   : > { %vm8300_vm10 = vmmov %vm8294_vm4  ;;  %v990_v15 = vsel %vm7263_vm5, %v7267_v29, 0.0 }
  0x85   : > { %vm8306_vm11 = vmmov %vm8298_vm7 }
  0x86   : > { %5767 = vmatmul.mubr.msk.f32.gmra.mrb[14].mxu1 %vm8294_vm4, %v7252_v6  ;;  %5991 = vmatmul.mubr.msk.f32.gmra.mrb[30].mxu0 %vm8298_vm7, %v3049_v41  ;;  %v3442_v41 = vsel %vm7002_vm12, %v7077_v59, 0.0  ;;  %vm7287_vm4 = vcmp.gt.s32.totalorder %v572_v56, 0  ;;  %vm8305_vm12 = vmmov %vm8298_vm7  ;;  %v7305_v56 = vld [vmem:[#allocation2 + $0x98] sm:$0xff]  ;;  %v3444_v59 = vsel %vm7032_vm14, %v7110_v31, 0.0  ;;  %v7329_v31 = vld [vmem:[#allocation2 + $0xa8] sm:$0xff] }
  0x87   : > { %5769 = vmatprep.mubr.msk.f32.mxu1 %vm8299_vm15, %v988_v20  ;;  %5995 = vmatprep.mubr.msk.f32.mxu0 %vm8300_vm10, %v3440_v60  ;;  %v8302_v10 = vsel %vm7287_vm4, 4294967295, %v8301_v10  ;;  %v586_v20 = vand.u32 15, %v418_v58  ;;  %v7296_v60 = vld [vmem:[%s8066_s2 + $0x20] sm:$0xf]  ;;  %vm8303_vm10 = vmmov %vm8298_vm7  ;;  %vm8304_vm15 = vcmask 1043456   ;;  %v992_v58 = vsel %vm7287_vm4, %v7291_v2, 0.0 }
  0x88   : > { %vm8312_vm14 = vmmov %vm8306_vm11 }
  0x8a   : > { %5770 = vmatmul.mubr.msk.f32.gmra.mrb[16].mxu1 %vm8303_vm10, %v7278_v34  ;;  %5996 = vmatmul.mubr.msk.f32.vlgmr.msra.gmra.mrb[0].mxu0 %vm8298_vm7, %v7089_v11  ;;  %vm8307_vm10 = vmmov %vm8304_vm15  ;;  %vm7316_vm7 = vcmp.gt.s32.totalorder %v586_v20, 0  ;;  %v8308_v11 = vmov 0 }
  0x8b   : > { %6044 = vmatpush3.msk.msra.mxu0 %vm8304_vm15, %v6826_v13  ;;  %5772 = vmatprep.mubr.msk.f32.mxu1 %vm8305_vm12, %v990_v15  ;;  %v8309_v11 = vsel %vm7316_vm7, 4294967295, %v8308_v11  ;;  %v7320_v13 = vld [vmem:[#allocation2 + $0xb0] sm:$0xff]  ;;  %v600_v15 = vand.u32 15, %v420_v24  ;;  %vm8310_vm12 = vmmov %vm8306_vm11  ;;  %v3446_v24 = vsel %vm7073_vm13, %v7143_v14, 0.0  ;;  %v8318_v14 = vmov 0 }
  0x8c   : > { %5998 = vmatprep.mubr.msk.f32.mxu0 %vm8306_vm11, %v3442_v41  ;;  %6093 = vmatprep.subr.msk.mxu0 %vm8307_vm10, %v7296_v60  ;;  %v422_v41 = vadd.s32 208, %v6772_v52  ;;  %vm8311_vm15 = vmmov %vm8306_vm11  ;;  %v994_v20 = vsel %vm7316_vm7, %v7320_v13, 0.0 }
  0x8d   : > { %vm7337_vm10 = vcmp.gt.s32.totalorder %v600_v15, 0 }
  0x8e   : > { %5773 = vmatmul.mubr.msk.f32.gmra.mrb[18].mxu1 %vm8310_vm12, %v7305_v56  ;;  %5999 = vmatmul.mubr.msk.f32.gmra.mrb[2].mxu0 %vm8306_vm11, %v7122_v50  ;;  %v614_v50 = vand.u32 15, %v422_v41  ;;  %vm8316_vm12 = vmmov %vm8306_vm11  ;;  %v996_v15 = vsel %vm7337_vm10, %v7341_v46, 0.0  ;;  %v3448_v41 = vsel %vm7106_vm1, %v7176_v48, 0.0  ;;  %v7383_v48 = vld [vmem:[#allocation2 + $0xe0] sm:$0xff] }
  0x8f   : > { %5775 = vmatprep.mubr.msk.f32.mxu1 %vm8311_vm15, %v992_v58  ;;  %6001 = vmatprep.mubr.msk.f32.mxu0 %vm8312_vm14, %v3444_v59  ;;  %v424_v58 = vadd.s32 224, %v6772_v52  ;;  %vm8315_vm14 = vmmov %vm8306_vm11  ;;  %v7350_v59 = vld [vmem:[#allocation2 + $0xb8] sm:$0xff] }
  0x90   : > { %vm8317_vm15 = vmmov %vm8306_vm11  ;;  %vm7358_vm13 = vcmp.gt.s32.totalorder %v614_v50, 0 }
  0x91   : > { %v8319_v14 = vsel %vm7358_vm13, 4294967295, %v8318_v14  ;;  %v998_v50 = vsel %vm7358_vm13, %v7362_v49, 0.0 }
  0x92   : > { %5776 = vmatmul.mubr.msk.f32.gmra.mrb[20].mxu1 %vm8315_vm14, %v7329_v31  ;;  %6002 = vmatmul.mubr.msk.f32.gmra.mrb[4].mxu0 %vm8316_vm12, %v7155_v25  ;;  %v628_v25 = vand.u32 15, %v424_v58  ;;  %vm8320_vm14 = vmmov %vm8306_vm11  ;;  %v8323_v58 = vmov 0 }
  0x93   : > { %5778 = vmatprep.mubr.msk.f32.mxu1 %vm8306_vm11, %v994_v20  ;;  %6004 = vmatprep.mubr.msk.f32.mxu0 %vm8317_vm15, %v3446_v24  ;;  %v426_v20 = vadd.s32 240, %v6772_v52  ;;  %vm8321_vm12 = vmmov %vm8306_vm11  ;;  %v7371_v24 = vld [vmem:[#allocation2 + $0xc8] sm:$0xff]  ;;  %v3450_v52 = vsel %vm7139_vm8, %v7208_v57, 0.0  ;;  %v7403_v57 = vld [vmem:[#allocation2 + $0xf0] sm:$0xff] }
  0x94   : > { %vm8322_vm15 = vmmov %vm8306_vm11  ;;  %vm7379_vm1 = vcmp.gt.s32.totalorder %v628_v25, 0 }
  0x95   : > { %v8324_v58 = vsel %vm7379_vm1, 4294967295, %v8323_v58  ;;  %v1000_v25 = vsel %vm7379_vm1, %v7383_v48, 0.0 }
  0x96   : > { %5779 = vmatmul.mubr.msk.f32.gmra.mrb[22].mxu1 %vm8320_vm14, %v7350_v59  ;;  %6005 = vmatmul.mubr.msk.f32.gmra.mrb[6].mxu0 %vm8321_vm12, %v7188_v7  ;;  %v642_v7 = vand.u32 15, %v426_v20  ;;  %vm8325_vm14 = vmmov %vm8306_vm11  ;;  %v8328_v20 = vmov 0 }
  0x97   : > { %5781 = vmatprep.mubr.msk.f32.mxu1 %vm8306_vm11, %v996_v15  ;;  %6007 = vmatprep.mubr.msk.f32.mxu0 %vm8322_vm15, %v3448_v41  ;;  %vm8326_vm12 = vmmov %vm8306_vm11  ;;  %v7391_v15 = vld [vmem:[#allocation2 + $0xd8] sm:$0xff]  ;;  %v3452_v41 = vsel %vm7172_vm0, %v7240_v23, 0.0  ;;  %v3456_v23 = vsel %vm7236_vm9, %v7291_v2, 0.0 }
  0x98   : > { %vm8327_vm15 = vmmov %vm8306_vm11  ;;  %vm7399_vm8 = vcmp.gt.s32.totalorder %v642_v7, 0 }
  0x99   : > { %v8329_v20 = vsel %vm7399_vm8, 4294967295, %v8328_v20  ;;  %v1002_v7 = vsel %vm7399_vm8, %v7403_v57, 0.0  ;;  %vm8333_vm0 = vmmov %vm8306_vm11 }
  0x9a   : > { %5782 = vmatmul.mubr.msk.f32.gmra.mrb[24].mxu1 %vm8325_vm14, %v7371_v24  ;;  %6008 = vmatmul.mubr.msk.f32.gmra.mrb[8].mxu0 %vm8326_vm12, %v7220_v39  ;;  %vm8330_vm14 = vmmov %vm8306_vm11 }
  0x9b   : > { %5784 = vmatprep.mubr.msk.f32.mxu1 %vm8306_vm11, %v998_v50  ;;  %6010 = vmatprep.mubr.msk.f32.mxu0 %vm8327_vm15, %v3450_v52  ;;  %vm8331_vm12 = vmmov %vm8306_vm11  ;;  %v7411_v50 = vld [vmem:[#allocation2 + $0xe8] sm:$0xff]  ;;  %v3454_v52 = vsel %vm7204_vm6, %v7267_v29, 0.0 }
  0x9c   : > { %vm8332_vm15 = vmmov %vm8306_vm11 }
  0x9d   : > { %vm8338_vm6 = vmmov %vm8333_vm0 }
  0x9e   : > { %5785 = vmatmul.mubr.msk.f32.gmra.mrb[26].mxu1 %vm8330_vm14, %v7391_v15  ;;  %6011 = vmatmul.mubr.msk.f32.gmra.mrb[10].mxu0 %vm8331_vm12, %v7252_v6  ;;  %vm8334_vm14 = vmmov %vm8333_vm0  ;;  %v1689_v6 = vld [vmem:[#allocation2 + $0xa] sm:$0xff] }
  0x9f   : > { %5787 = vmatprep.mubr.msk.f32.mxu1 %vm8306_vm11, %v1000_v25  ;;  %6013 = vmatprep.mubr.msk.f32.mxu0 %vm8332_vm15, %v3452_v41  ;;  %vm8335_vm12 = vmmov %vm8333_vm0  ;;  %v7425_v25 = vld [vmem:[#allocation2 + $0xf8] sm:$0xff]  ;;  %v1688_v41 = vld [vmem:[#allocation2 + $0x2] sm:$0xff] }
  0xa0   : > { %vm8336_vm11 = vmmov %vm8333_vm0 }
  0xa1   : > { %vm8337_vm15 = vmmov %vm8333_vm0 }
  0xa2   : > { %5788 = vmatmul.mubr.msk.f32.gmra.mrb[28].mxu1 %vm8333_vm0, %v7411_v50  ;;  %6014 = vmatmul.mubr.msk.f32.gmra.mrb[12].mxu0 %vm8334_vm14, %v7278_v34  ;;  %vm8339_vm14 = vmmov %vm8333_vm0 }
  0xa3   : > { %5790 = vmatprep.mubr.msk.f32.mxu1 %vm8335_vm12, %v1002_v7  ;;  %6016 = vmatprep.mubr.msk.f32.mxu0 %vm8336_vm11, %v3454_v52  ;;  %v1785_v7 = vsel %vm6792_vm2, %v1689_v6, 0.0  ;;  %v3458_v52 = vsel %vm7263_vm5, %v7320_v13, 0.0  ;;  %vm8340_vm12 = vmmov %vm8333_vm0  ;;  %v3460_v6 = vsel %vm7287_vm4, %v7341_v46, 0.0 }
  0xa4   : > { %vm8341_vm11 = vmmov %vm8333_vm0 }
  0xa5   : > { %vm8349_vm4 = vmmov %vm8333_vm0 }
  0xa6   : > { %5791 = vmatmul.mubr.msk.f32.gmra.mrb[30].mxu1 %vm8337_vm15, %v7425_v25  ;;  %6017 = vmatmul.mubr.msk.f32.gmra.mrb[14].mxu0 %vm8333_vm0, %v7305_v56  ;;  %vm8342_vm15 = vcmask 1043456  }
  0xa7   : > { %5795 = vmatprep.mubr.msk.f32.mxu1 %vm8338_vm6, %v1688_v41  ;;  %6019 = vmatprep.mubr.msk.f32.mxu0 %vm8339_vm14, %v3456_v23  ;;  %v1787_v23 = vsel %vm6814_vm3, %v6796_v0, 0.0  ;;  %vm8343_vm6 = vmmov %vm8333_vm0  ;;  %v3462_v0 = vsel %vm7316_vm7, %v7362_v49, 0.0 }
  0xa8   : > { %vm8344_vm14 = vmmov %vm8342_vm15 }
  0xa9   : > { %vm8356_vm7 = vmmov %vm8333_vm0 }
  0xaa   : > { %5796 = vmatmul.mubr.msk.f32.vlgmr.msra.gmra.mrb[0].mxu1 %vm8340_vm12, %v1785_v7  ;;  %6020 = vmatmul.mubr.msk.f32.gmra.mrb[16].mxu0 %vm8341_vm11, %v7329_v31  ;;  %vm8345_vm12 = vmmov %vm8333_vm0  ;;  %v3830_v7 = vld [vmem:[#allocation2 + $0x21] sm:$0xff] }
  0xab   : > { %5844 = vmatpush3.msk.msra.mxu1 %vm8342_vm15, %v7042_v55  ;;  %5798 = vmatprep.mubr.msk.f32.mxu1 %vm8333_vm0, %v6790_v62  ;;  %vm8346_vm11 = vmmov %vm8333_vm0  ;;  %v3438_v55 = vld [vmem:[#allocation2 + $0x110] sm:$0xff] }
  0xac   : > { %6022 = vmatprep.mubr.msk.f32.mxu0 %vm8343_vm6, %v3458_v52  ;;  %6143 = vmatprep.subr.msk.mxu1 %vm8344_vm14, %v6633_v1  ;;  %vm8347_vm15 = vmmov %vm8333_vm0  ;;  %vm8348_vm6 = vnez %v8186_v18  ;;  %v3470_v41 = vsel %vm7399_vm8, %v3438_v55, 0.0  ;;  %v3831_v52 = vld [vmem:[#allocation2 + $0x29] sm:$0xff]  ;;  %v3838_v55 = vld [vmem:[#allocation2 + $0x61] sm:$0xff]  ;;  %v2230_v18 = vsel %vm7337_vm10, %v7362_v49, 0.0 }
  0xad   : > { %v1789_v62 = vsel %vm8348_vm6, %v6818_v9, 0.0  ;;  %vm8350_vm14 = vmmov %vm8333_vm0  ;;  %v3464_v9 = vsel %vm7337_vm10, %v7383_v48, 0.0  ;;  %v4231_v49 = vld [vmem:[#allocation2 + $0x7a] sm:$0xff] }
  0xae   : > { %5799 = vmatmul.mubr.msk.f32.gmra.mrb[2].mxu1 %vm8345_vm12, %v1787_v23  ;;  %6023 = vmatmul.mubr.msk.f32.gmra.mrb[18].mxu0 %vm8346_vm11, %v7350_v59  ;;  %vm8351_vm12 = vmmov %vm8333_vm0  ;;  %v3832_v23 = vld [vmem:[#allocation2 + $0x31] sm:$0xff] }
  0xaf   : > { %5801 = vmatprep.mubr.msk.f32.mxu1 %vm8347_vm15, %v6821_v12  ;;  %6025 = vmatprep.mubr.msk.f32.mxu0 %vm8333_vm0, %v3460_v6  ;;  %vm8352_vm11 = vmmov %vm8333_vm0  ;;  %vm8353_vm15 = vnez %v8190_v27  ;;  %v3833_v6 = vld [vmem:[#allocation2 + $0x39] sm:$0xff] }
  0xb0   : > { %v1791_v1 = vsel %vm8353_vm15, %v6849_v19, 0.0  ;;  %v7493_v19 = vld [vmem:[#allocation2 + $0x100] sm:$0xff]  ;;  %vm8373_vm8 = vmmov %vm8333_vm0 }
  0xb2   : > { %5802 = vmatmul.mubr.msk.f32.gmra.mrb[4].mxu1 %vm8349_vm4, %v1789_v62  ;;  %6026 = vmatmul.mubr.msk.f32.gmra.mrb[20].mxu0 %vm8350_vm14, %v7371_v24  ;;  %vm8354_vm4 = vmmov %vm8333_vm0  ;;  %v8383_v62 = vld [vmem:[#allocation25_spill] sm:$0xff] }
  0xb3   : > { %5804 = vmatprep.mubr.msk.f32.mxu1 %vm8351_vm12, %v6843_v17  ;;  %6028 = vmatprep.mubr.msk.f32.mxu0 %vm8352_vm11, %v3462_v0  ;;  %vm8355_vm14 = vmmov %vm8333_vm0  ;;  %vm8357_vm12 = vnez %v8194_v36  ;;  %v3466_v17 = vsel %vm7358_vm13, %v7403_v57, 0.0  ;;  %v8386_v0 = vld [vmem:[#allocation30_spill] sm:$0xff] }
  0xb4   : > { %v1793_v12 = vsel %vm8357_vm12, %v6876_v28, 0.0  ;;  %vm8358_vm11 = vmmov %vm8333_vm0  ;;  %v3468_v28 = vsel %vm7379_vm1, %v7493_v19, 0.0 }
  0xb5   : > { %vm8362_vm13 = vmmov %vm8333_vm0 }
  0xb6   : > { %5805 = vmatmul.mubr.msk.f32.gmra.mrb[6].mxu1 %vm8333_vm0, %v1791_v1  ;;  %6029 = vmatmul.mubr.msk.f32.gmra.mrb[22].mxu0 %vm8354_vm4, %v7391_v15  ;;  %vm8359_vm4 = vmmov %vm8333_vm0  ;;  %v3835_v1 = vld [vmem:[#allocation2 + $0x49] sm:$0xff] }
  0xb7   : > { %5807 = vmatprep.mubr.msk.f32.mxu1 %vm8355_vm14, %v6870_v26  ;;  %6031 = vmatprep.mubr.msk.f32.mxu0 %vm8356_vm7, %v3464_v9  ;;  %vm8360_vm14 = vmmov %vm8333_vm0  ;;  %vm8361_vm7 = vnez %v8198_v44  ;;  %v3836_v9 = vld [vmem:[#allocation2 + $0x51] sm:$0xff] }
  0xb8   : > { %v1795_v26 = vsel %vm8361_vm7, %v6899_v37, 0.0  ;;  %v7516_v37 = vld [vmem:[#allocation2 + $0x108] sm:$0xff]  ;;  %vm8366_vm1 = vmmov %vm8333_vm0 }
  0xb9   : > { %vm8371_vm7 = vmmov %vm8333_vm0 }
  0xba   : > { %5808 = vmatmul.mubr.msk.f32.gmra.mrb[8].mxu1 %vm8358_vm11, %v1793_v12  ;;  %6032 = vmatmul.mubr.msk.f32.gmra.mrb[24].mxu0 %vm8333_vm0, %v7411_v50  ;;  %vm8363_vm11 = vmmov %vm8333_vm0  ;;  %v8393_v12 = vld [vmem:[#allocation31_spill] sm:$0xff] }
  0xbb   : > { %5810 = vmatprep.mubr.msk.f32.mxu1 %vm8359_vm4, %v6893_v35  ;;  %6034 = vmatprep.mubr.msk.f32.mxu0 %vm8360_vm14, %v3466_v17  ;;  %vm8364_vm4 = vmmov %vm8333_vm0  ;;  %vm8365_vm14 = vnez %v8202_v53  ;;  %v8394_v17 = vld [vmem:[#allocation36_spill] sm:$0xff] }
  0xbc   : > { %v1797_v35 = vsel %vm8365_vm14, %v6922_v45, 0.0  ;;  %v3439_v45 = vld [vmem:[#allocation2 + $0x118] sm:$0xff]  ;;  %vm8370_vm14 = vmmov %vm8333_vm0 }
  0xbe   : > { %5811 = vmatmul.mubr.msk.f32.gmra.mrb[10].mxu1 %vm8362_vm13, %v1795_v26  ;;  %6035 = vmatmul.mubr.msk.f32.gmra.mrb[26].mxu0 %vm8363_vm11, %v7425_v25  ;;  %vm8367_vm13 = vmmov %vm8333_vm0 }
  0xbf   : > { %5813 = vmatprep.mubr.msk.f32.mxu1 %vm8333_vm0, %v6916_v43  ;;  %6037 = vmatprep.mubr.msk.f32.mxu0 %vm8364_vm4, %v3468_v28  ;;  %vm8368_vm11 = vmmov %vm8333_vm0  ;;  %vm8369_vm4 = vnez %v8206_v4  ;;  %v3837_v28 = vld [vmem:[#allocation2 + $0x59] sm:$0xff] }
  0xc0   : > { %v1799_v43 = vsel %vm8369_vm4, %v6945_v54, 0.0  ;;  %vm8376_vm4 = vcmask 1043456   ;;  %v8378_v54 = vld [vmem:[#allocation23_spill] sm:$0xff] }
  0xc2   : > { %5814 = vmatmul.mubr.msk.f32.gmra.mrb[12].mxu1 %vm8366_vm1, %v1797_v35  ;;  %6038 = vmatmul.mubr.msk.f32.gmra.mrb[28].mxu0 %vm8367_vm13, %v7516_v37  ;;  %vm8372_vm1 = vmmov %vm8333_vm0  ;;  %vm8374_vm13 = vnez %v8212_v32  ;;  %v8397_v35 = vld [vmem:[#allocation35_spill] sm:$0xff] }
  0xc3   : > { %5816 = vmatprep.mubr.msk.f32.mxu1 %vm8368_vm11, %v6939_v51  ;;  %6040 = vmatprep.mubr.msk.f32.mxu0 %vm8333_vm0, %v3470_v41  ;;  %v1801_v51 = vsel %vm8374_vm13, %v6971_v5, 0.0  ;;  %vm8375_vm11 = vmmov %vm8333_vm0  ;;  %v3834_v5 = vld [vmem:[#allocation2 + $0x41] sm:$0xff] }
  0xc4   : > { %vm8382_vm13 = vmmov %vm8333_vm0  ;;  %v8400_v41 = vld [vmem:[#allocation37_spill] sm:$0xff] }
  0xc6   : > { %5817 = vmatmul.mubr.msk.f32.gmra.mrb[14].mxu1 %vm8370_vm14, %v1799_v43  ;;  %6041 = vmatmul.mubr.msk.f32.gmra.mrb[30].mxu0 %vm8371_vm7, %v3439_v45  ;;  %vm8377_vm7 = vmmov %vm8333_vm0  ;;  %vm8379_vm14 = vnez %v8378_v54  ;;  %v8401_v43 = vld [vmem:[#allocation41_spill] sm:$0xff] }
  0xc7   : > { %5819 = vmatprep.mubr.msk.f32.mxu1 %vm8372_vm1, %v6965_v3  ;;  %6045 = vmatprep.mubr.msk.f32.mxu0 %vm8373_vm8, %v3830_v7  ;;  %v1803_v3 = vsel %vm8379_vm14, %v6998_v38, 0.0  ;;  %vm8380_vm8 = vmmov %vm8333_vm0  ;;  %v8390_v38 = vld [vmem:[#allocation29_spill] sm:$0xff]  ;;  %v3839_v7 = vld [vmem:[#allocation2 + $0x69] sm:$0xff] }
  0xc8   : > { %vm8381_vm1 = vmmov %vm8333_vm0 }
  0xc9   : > { %vm8389_vm14 = vmmov %vm8333_vm0 }
  0xca   : > { %5820 = vmatmul.mubr.msk.f32.gmra.mrb[16].mxu1 %vm8375_vm11, %v1801_v51  ;;  %6046 = vmatmul.mubr.msk.f32.vlgmr.msra.gmra.mrb[0].mxu0 %vm8333_vm0, %v3831_v52  ;;  %vm8384_vm11 = vmmov %vm8333_vm0  ;;  %v3840_v51 = vld [vmem:[#allocation2 + $0x71] sm:$0xff] }
  0xcb   : > { %6094 = vmatpush3.msk.msra.mxu0 %vm8376_vm4, %v7296_v60  ;;  %5822 = vmatprep.mubr.msk.f32.mxu1 %vm8377_vm7, %v6992_v30  ;;  %v8385_v60 = vld [vmem:[#allocation24_spill] sm:$0xff]  ;;  %vm8387_vm4 = vnez %v8386_v0  ;;  %vm8388_vm7 = vmmov %vm8333_vm0 }
  0xcc   : > { %6048 = vmatprep.mubr.msk.f32.mxu0 %vm8380_vm8, %v3832_v23  ;;  %v1805_v30 = vsel %vm8387_vm4, %v8385_v60, 0.0  ;;  %vm8391_vm8 = vmmov %vm8333_vm0  ;;  %v8405_v52 = vld [vmem:[#allocation40_spill] sm:$0xff]  ;;  %v8408_v23 = vld [vmem:[#allocation42_spill] sm:$0xff] }
  0xcd   : > { %vm8398_vm4 = vmmov %vm8333_vm0  ;;  %v8412_v60 = vld [vmem:[#allocation45_spill] sm:$0xff] }
  0xce   : > { %5823 = vmatmul.mubr.msk.f32.gmra.mrb[18].mxu1 %vm8381_vm1, %v1803_v3  ;;  %6049 = vmatmul.mubr.msk.f32.gmra.mrb[2].mxu0 %vm8382_vm13, %v3833_v6  ;;  %vm8392_vm1 = vmmov %vm8333_vm0  ;;  %vm8395_vm13 = vnez %v8394_v17  ;;  %v8409_v3 = vld [vmem:[#allocation46_spill] sm:$0xff] }
  0xcf   : > { %5825 = vmatprep.mubr.msk.f32.mxu1 %vm8384_vm11, %v8383_v62  ;;  %6051 = vmatprep.mubr.msk.f32.mxu0 %vm8333_vm0, %v3834_v5  ;;  %v1807_v26 = vsel %vm8395_vm13, %v8393_v12, 0.0  ;;  %vm8396_vm11 = vmmov %vm8333_vm0  ;;  %v3841_v5 = vld [vmem:[#allocation2 + $0x79] sm:$0xff]  ;;  %v3842_v62 = vld [vmem:[#allocation2 + $0x81] sm:$0xff] }
  0xd0   : > { %vm8406_vm13 = vmmov %vm8333_vm0  ;;  %v8420_v12 = vld [vmem:[#allocation50_spill] sm:$0xff] }
  0xd2   : > { %5826 = vmatmul.mubr.msk.f32.gmra.mrb[20].mxu1 %vm8388_vm7, %v1805_v30  ;;  %6052 = vmatmul.mubr.msk.f32.gmra.mrb[4].mxu0 %vm8389_vm14, %v3835_v1  ;;  %vm8399_vm7 = vmmov %vm8333_vm0  ;;  %vm8402_vm14 = vnez %v8401_v43  ;;  %v8415_v30 = vld [vmem:[#allocation47_spill] sm:$0xff] }
  0xd3   : > { %5828 = vmatprep.mubr.msk.f32.mxu1 %vm8391_vm8, %v8390_v38  ;;  %6054 = vmatprep.mubr.msk.f32.mxu0 %vm8392_vm1, %v3836_v9  ;;  %v1809_v45 = vsel %vm8402_vm14, %v8400_v41, 0.0  ;;  %vm8403_vm8 = vmmov %vm8333_vm0  ;;  %v8416_v1 = vld [vmem:[#allocation51_spill] sm:$0xff] }
  0xd4   : > { %vm8404_vm1 = vmmov %vm8333_vm0  ;;  %v3843_v38 = vld [vmem:[#allocation2 + $0x89] sm:$0xff] }
  0xd5   : > { %vm8413_vm14 = vmmov %vm8333_vm0  ;;  %v8428_v41 = vld [vmem:[#allocation19_spill] sm:$0xff] }
  0xd6   : > { %5829 = vmatmul.mubr.msk.f32.gmra.mrb[22].mxu1 %vm8396_vm11, %v1807_v26  ;;  %6055 = vmatmul.mubr.msk.f32.gmra.mrb[6].mxu0 %vm8333_vm0, %v3837_v28  ;;  %vm8407_vm11 = vmmov %vm8333_vm0  ;;  %v8422_v26 = vld [vmem:[#allocation6_spill] sm:$0xff]  ;;  %v8423_v28 = vld [vmem:[#allocation52_spill] sm:$0xff] }
  0xd7   : > { %5831 = vmatprep.mubr.msk.f32.mxu1 %vm8398_vm4, %v8397_v35  ;;  %6057 = vmatprep.mubr.msk.f32.mxu0 %vm8399_vm7, %v3838_v55  ;;  %vm8410_vm4 = vnez %v8409_v3  ;;  %vm8411_vm7 = vmmov %vm8333_vm0  ;;  %v8426_v35 = vld [vmem:[#allocation7_spill] sm:$0xff] }
  0xd8   : > { %v1811_v6 = vsel %vm8410_vm4, %v8408_v23, 0.0  ;;  %vm8421_vm4 = vmmov %vm8333_vm0 }
  0xda   : > { %5832 = vmatmul.mubr.msk.f32.gmra.mrb[24].mxu1 %vm8403_vm8, %v1809_v45  ;;  %6058 = vmatmul.mubr.msk.f32.gmra.mrb[8].mxu0 %vm8404_vm1, %v3839_v7  ;;  %vm8414_vm8 = vmmov %vm8333_vm0  ;;  %v8430_v45 = vld [vmem:[#allocation22_spill] sm:$0xff] }
  0xdb   : > { %5834 = vmatprep.mubr.msk.f32.mxu1 %vm8406_vm13, %v8405_v52  ;;  %6060 = vmatprep.mubr.msk.f32.mxu0 %vm8407_vm11, %v3840_v51  ;;  %vm8417_vm13 = vnez %v8416_v1  ;;  %vm8418_vm1 = vmmov %vm8333_vm0  ;;  %v8433_v51 = vld [vmem:[#allocation8_spill] sm:$0xff] }
  0xdc   : > { %v1813_v9 = vsel %vm8417_vm13, %v8415_v30, 0.0  ;;  %vm8419_vm11 = vmmov %vm8333_vm0  ;;  %vm8429_vm13 = vnez %v8428_v41  ;;  %v8435_v52 = vld [vmem:[#allocation28_spill] sm:$0xff]  ;;  %v8450_v41 = vld [vmem:[#allocation26_spill] sm:$0xff] }
  0xdd   : > { %v8431_v7 = vsel %vm8429_vm13, %v8430_v45, 0.0  ;;  %vm8443_vm13 = vmmov %vm8333_vm0  ;;  %v8452_v45 = vld [vmem:[#allocation33_spill] sm:$0xff] }
  0xde   : > { %5835 = vmatmul.mubr.msk.f32.gmra.mrb[26].mxu1 %vm8333_vm0, %v1811_v6  ;;  %6061 = vmatmul.mubr.msk.f32.gmra.mrb[10].mxu0 %vm8411_vm7, %v3841_v5  ;;  %vm8425_vm7 = vmmov %vm8333_vm0  ;;  %v8437_v6 = vld [vmem:[#allocation9_spill] sm:$0xff]  ;;  %v6458_v5 = vld [vmem:[%s8066_s2 + $0x10] sm:$0xf] }
  0xdf   : > { %5837 = vmatprep.mubr.msk.f32.mxu1 %vm8413_vm14, %v8412_v60  ;;  %6063 = vmatprep.mubr.msk.f32.mxu0 %vm8414_vm8, %v3842_v62  ;;  %vm8424_vm14 = vnez %v8287_v61  ;;  %vm8427_vm8 = vmmov %vm8333_vm0  ;;  %v8439_v62 = vld [vmem:[#allocation21_spill] sm:$0xff] }
  0xe0   : > { %v1815_v55 = vsel %vm8424_vm14, %v8423_v28, 0.0 }
  0xe2   : > { %5838 = vmatmul.mubr.msk.f32.gmra.mrb[28].mxu1 %vm8418_vm1, %v1813_v9  ;;  %6064 = vmatmul.mubr.msk.f32.gmra.mrb[12].mxu0 %vm8419_vm11, %v3843_v38  ;;  %vm8432_vm1 = vmmov %vm8333_vm0  ;;  %v8441_v9 = vld [vmem:[#allocation27_spill] sm:$0xff] }
  0xe3   : > { %5840 = vmatprep.mubr.msk.f32.mxu1 %vm8421_vm4, %v8420_v12  ;;  %6066 = vmatprep.mubr.msk.f32.mxu0 %vm8333_vm0, %v8422_v26  ;;  %vm8434_vm4 = vmmov %vm8333_vm0  ;;  %v8444_v26 = vld [vmem:[#allocation10_spill] sm:$0xff] }
  0xe4   : > { %vm8436_vm11 = vmmov %vm8333_vm0 }
  0xe6   : > { %5841 = vmatmul.mubr.msk.f32.gmra.mrb[30].mxu1 %vm8425_vm7, %v1815_v55  ;;  %6067 = vmatmul.mubr.msk.f32.gmra.mrb[14].mxu0 %vm8427_vm8, %v8426_v35  ;;  %vm8438_vm7 = vcmask 1043456   ;;  %vm8440_vm8 = vnez %v8439_v62  ;;  %v8446_v55 = vld [vmem:[#allocation34_spill] sm:$0xff]  ;;  %v8448_v35 = vld [vmem:[#allocation11_spill] sm:$0xff] }
  0xe7   : > { %5845 = vmatprep.mubr.msk.f32.mxu1 %vm8432_vm1, %v8431_v7  ;;  %6069 = vmatprep.mubr.msk.f32.mxu0 %vm8434_vm4, %v8433_v51  ;;  %v8442_v38 = vsel %vm8440_vm8, %v8441_v9, 0.0  ;;  %vm8445_vm1 = vmmov %vm8333_vm0  ;;  %v8455_v51 = vld [vmem:[#allocation12_spill] sm:$0xff]  ;;  %v8463_v62 = vld [vmem:[#allocation38_spill] sm:$0xff] }
  0xe8   : > { %vm8447_vm4 = vmmov %vm8333_vm0 }
  0xe9   : > { %vm8456_vm14 = vmmov %vm8445_vm1 }
  0xea   : > { %5846 = vmatmul.mubr.msk.f32.vlgmr.msra.gmra.mrb[0].mxu1 %vm8436_vm11, %v8435_v52  ;;  %6070 = vmatmul.mubr.msk.f32.gmra.mrb[16].mxu0 %vm8333_vm0, %v8437_v6  ;;  %vm8449_vm11 = vmmov %vm8333_vm0  ;;  %vm8451_vm0 = vnez %v8450_v41  ;;  %v8457_v52 = vld [vmem:[#allocation39_spill] sm:$0xff]  ;;  %v8459_v6 = vld [vmem:[#allocation13_spill] sm:$0xff] }
  0xeb   : > { %6144 = vmatpush3.msk.msra.mxu1 %vm8438_vm7, %v6458_v5  ;;  %5848 = vmatprep.mubr.msk.f32.mxu1 %vm8443_vm13, %v8442_v38  ;;  %v8453_v7 = vsel %vm8451_vm0, %v8452_v45, 0.0  ;;  %vm8454_vm7 = vmmov %vm8445_vm1  ;;  %v8461_v5 = vld [vmem:[#allocation32_spill] sm:$0xff]  ;;  %v8465_v38 = vld [vmem:[#allocation14_spill] sm:$0xff] }
  0xec   : > { %6072 = vmatprep.mubr.msk.f32.mxu0 %vm8445_vm1, %v8444_v26  ;;  %vm8458_vm8 = vmmov %vm8445_vm1  ;;  %v8467_v26 = vld [vmem:[#allocation44_spill] sm:$0xff] }
  0xed   : > { %vm8460_vm13 = vmmov %vm8445_vm1  ;;  %vm8462_vm1 = vnez %v8461_v5  ;;  %v8475_v45 = vld [vmem:[#allocation16_spill] sm:$0xff]  ;;  %v7665_v5 = vld [vmem:[#allocation2 + $0x101] sm:$0xff] }
  0xee   : > { %5849 = vmatmul.mubr.msk.f32.gmra.mrb[2].mxu1 %vm8447_vm4, %v8446_v55  ;;  %6073 = vmatmul.mubr.msk.f32.gmra.mrb[18].mxu0 %vm8449_vm11, %v8448_v35  ;;  %v8464_v9 = vsel %vm8462_vm1, %v8463_v62, 0.0  ;;  %vm8466_vm11 = vmmov %vm8447_vm4  ;;  %v8469_v55 = vld [vmem:[#allocation15_spill] sm:$0xff]  ;;  %v8487_v62 = vld [vmem:[#allocation20_spill] sm:$0xff] }
  0xef   : > { %5851 = vmatprep.mubr.msk.f32.mxu1 %vm8454_vm7, %v8453_v7  ;;  %6075 = vmatprep.mubr.msk.f32.mxu0 %vm8456_vm14, %v8455_v51  ;;  %vm8468_vm0 = vmmov %vm8447_vm4  ;;  %vm8471_vm7 = vnez %v8243_v33  ;;  %v8472_v35 = vld [vmem:[#allocation43_spill] sm:$0xff]  ;;  %v8477_v7 = vld [vmem:[#allocation49_spill] sm:$0xff] }
  0xf0   : > { %vm8470_vm14 = vmmov %vm8468_vm0  ;;  %v8473_v41 = vsel %vm8471_vm7, %v8472_v35, 0.0  ;;  %v8479_v51 = vld [vmem:[#allocation17_spill] sm:$0xff]  ;;  %v8484_v33 = vld [vmem:[#allocation18_spill] sm:$0xff] }
  0xf1   : > { %vm8478_vm1 = vmmov %vm8468_vm0  ;;  %v3861_v35 = vld [vmem:[#allocation2 + $0x119] sm:$0xff] }
  0xf2   : > { %5852 = vmatmul.mubr.msk.f32.gmra.mrb[4].mxu1 %vm8458_vm8, %v8457_v52  ;;  %6076 = vmatmul.mubr.msk.f32.gmra.mrb[20].mxu0 %vm8460_vm13, %v8459_v6  ;;  %vm8474_vm8 = vmmov %vm8468_vm0  ;;  %v8482_v52 = vld [vmem:[#allocation48_spill] sm:$0xff] }
  0xf3   : > { %5854 = vmatprep.mubr.msk.f32.mxu1 %vm8447_vm4, %v8464_v9  ;;  %6078 = vmatprep.mubr.msk.f32.mxu0 %vm8466_vm11, %v8465_v38  ;;  %vm8476_vm13 = vmmov %vm8468_vm0  ;;  %vm8481_vm11 = vnez %v8256_v47  ;;  %v8490_v9 = vld [vmem:[#allocation53_spill] sm:$0xff]  ;;  %v7678_v47 = vld [vmem:[#allocation2 + $0x109] sm:$0xff] }
  0xf4   : > { %vm8480_vm4 = vmmov %vm8468_vm0  ;;  %v8483_v6 = vsel %vm8481_vm11, %v8482_v52, 0.0  ;;  %v4222_v52 = vld [vmem:[#allocation2 + $0x32] sm:$0xff] }
  0xf5   : > { %vm8486_vm7 = vmmov %vm8468_vm0 }
  0xf6   : > { %5855 = vmatmul.mubr.msk.f32.gmra.mrb[6].mxu1 %vm8468_vm0, %v8467_v26  ;;  %6079 = vmatmul.mubr.msk.f32.gmra.mrb[22].mxu0 %vm8470_vm14, %v8469_v55  ;;  %vm8485_vm14 = vmmov %vm8468_vm0  ;;  %v3860_v26 = vld [vmem:[#allocation2 + $0x111] sm:$0xff]  ;;  %v8494_v55 = vld [vmem:[#allocation57_spill] sm:$0xff] }
  0xf7   : > { %5857 = vmatprep.mubr.msk.f32.mxu1 %vm8474_vm8, %v8473_v41  ;;  %6081 = vmatprep.mubr.msk.f32.mxu0 %vm8476_vm13, %v8475_v45  ;;  %vm8488_vm8 = vmmov %vm8468_vm0  ;;  %vm8489_vm13 = vnez %v8268_v42  ;;  %v4220_v41 = vld [vmem:[#allocation2 + $0x22] sm:$0xff]  ;;  %v4221_v45 = vld [vmem:[#allocation2 + $0x2a] sm:$0xff] }
  0xf8   : > { %v8491_v38 = vsel %vm8489_vm13, %v8490_v9, 0.0  ;;  %vm8495_vm11 = vmmov %vm8468_vm0  ;;  %v2616_v9 = vld [vmem:[#allocation2 + $0xb1] sm:$0xff] }
  0xf9   : > { %vm8501_vm13 = vmmov %vm8468_vm0 }
  0xfa   : > { %5858 = vmatmul.mubr.msk.f32.gmra.mrb[8].mxu1 %vm8478_vm1, %v8477_v7  ;;  %6082 = vmatmul.mubr.msk.f32.gmra.mrb[24].mxu0 %vm8480_vm4, %v8479_v51  ;;  %vm8492_vm1 = vmmov %vm8468_vm0  ;;  %v8503_v7 = vsel %vm7236_vm9, %v7267_v29, 0.0  ;;  %v2224_v51 = vsel %vm7263_vm5, %v7291_v2, 0.0  ;;  %v4225_v2 = vld [vmem:[#allocation2 + $0x4a] sm:$0xff] }
  0xfb   : > { %5860 = vmatprep.mubr.msk.f32.mxu1 %vm8468_vm0, %v8483_v6  ;;  %6084 = vmatprep.mubr.msk.f32.mxu0 %vm8485_vm14, %v8484_v33  ;;  %vm8493_vm4 = vmmov %vm8468_vm0  ;;  %vm8496_vm14 = vnez %v8280_v21  ;;  %v4253_v21 = vsel %vm6792_vm2, %v4221_v45, 0.0  ;;  %v4223_v6 = vld [vmem:[#allocation2 + $0x3a] sm:$0xff]  ;;  %vm8509_vm2 = vnez %v8302_v10  ;;  %v4257_v29 = vsel %vm8348_vm6, %v4225_v2, 0.0  ;;  %v4226_v10 = vld [vmem:[#allocation2 + $0x52] sm:$0xff] }
  0xfc   : > { %vm8508_vm9 = vmmov %vm8468_vm0  ;;  %v4255_v40 = vsel %vm6814_vm3, %v4223_v6, 0.0  ;;  %v2226_v63 = vsel %vm8509_vm2, %v7320_v13, 0.0  ;;  %vm8514_vm3 = vnez %v8309_v11  ;;  %v4228_v11 = vld [vmem:[#allocation2 + $0x62] sm:$0xff]  ;;  %v4238_v33 = vld [vmem:[#allocation2 + $0xb2] sm:$0xff] }
  0xfd   : > { %vm8510_vm5 = vmmov %vm8468_vm0  ;;  %v2228_v8 = vsel %vm8514_vm3, %v7341_v46, 0.0  ;;  %v4229_v46 = vld [vmem:[#allocation2 + $0x6a] sm:$0xff] }
  0xfe   : > { %5861 = vmatmul.mubr.msk.f32.gmra.mrb[10].mxu1 %vm8486_vm7, %v7220_v39  ;;  %6085 = vmatmul.mubr.msk.f32.gmra.mrb[26].mxu0 %vm8488_vm8, %v8487_v62  ;;  %v8497_v39 = vld [vmem:[#allocation56_spill] sm:$0xff]  ;;  %vm8499_vm7 = vmmov %vm8468_vm0 }
  0xff   : > { %5863 = vmatprep.mubr.msk.f32.mxu1 %vm8492_vm1, %v8491_v38  ;;  %6087 = vmatprep.mubr.msk.f32.mxu0 %vm8493_vm4, %v7665_v5  ;;  %v8498_v42 = vsel %vm8496_vm14, %v8497_v39, 0.0  ;;  %vm8500_vm8 = vmmov %vm8468_vm0  ;;  %v4240_v38 = vld [vmem:[#allocation2 + $0xc2] sm:$0xff] }
 0x100   : > { %vm8502_vm1 = vmmov %vm8468_vm0  ;;  %v2618_v39 = vld [vmem:[#allocation2 + $0xc1] sm:$0xff] }
 0x101   : > { %vm8504_vm4 = vmmov %vm8468_vm0 }
 0x102   : > { %5864 = vmatmul.mubr.msk.f32.gmra.mrb[12].mxu1 %vm8495_vm11, %v8494_v55  ;;  %6088 = vmatmul.mubr.msk.f32.gmra.mrb[28].mxu0 %vm8468_vm0, %v7678_v47  ;;  %vm8505_vm11 = vmmov %vm8468_vm0 }
 0x103   : > { %5866 = vmatprep.mubr.msk.f32.mxu1 %vm8499_vm7, %v8498_v42  ;;  %6090 = vmatprep.mubr.msk.f32.mxu0 %vm8500_vm8, %v3860_v26  ;;  %vm8506_vm14 = vmmov %vm8468_vm0  ;;  %v4241_v26 = vld [vmem:[#allocation2 + $0xca] sm:$0xff]  ;;  %v4242_v42 = vld [vmem:[#allocation2 + $0xd2] sm:$0xff] }
 0x104   : > { %vm8507_vm7 = vmmov %vm8468_vm0 }
 0x105   : > { %vm8511_vm8 = vmmov %vm8468_vm0 }
 0x106   : > { %5867 = vmatmul.mubr.msk.f32.gmra.mrb[14].mxu1 %vm8501_vm13, %v7278_v34  ;;  %6091 = vmatmul.mubr.msk.f32.gmra.mrb[30].mxu0 %vm8502_vm1, %v3861_v35  ;;  %vm8512_vm13 = vmmov %vm8468_vm0  ;;  %v4227_v34 = vld [vmem:[#allocation2 + $0x5a] sm:$0xff] }
 0x107   : > { %5869 = vmatprep.mubr.msk.f32.mxu1 %vm8504_vm4, %v8503_v7  ;;  %6095 = vmatprep.mubr.msk.f32.mxu0 %vm8505_vm11, %v4220_v41  ;;  %vm8513_vm1 = vmmov %vm8468_vm0  ;;  %v2620_v41 = vld [vmem:[#allocation2 + $0xd1] sm:$0xff]  ;;  %v2622_v7 = vld [vmem:[#allocation2 + $0xe1] sm:$0xff] }
 0x108   : > { %vm8515_vm4 = vmmov %vm8468_vm0 }
 0x109   : > { %vm8516_vm11 = vmmov %vm8468_vm0 }
 0x10a   : > { %5870 = vmatmul.mubr.msk.f32.gmra.mrb[16].mxu1 %vm8468_vm0, %v7305_v56  ;;  %6096 = vmatmul.mubr.msk.f32.vlgmr.msra.gmra.mrb[0].mxu0 %vm8506_vm14, %v4253_v21  ;;  %vm8517_vm14 = vmmov %vm8468_vm0  ;;  %v4261_v56 = vsel %vm8357_vm12, %v4229_v46, 0.0  ;;  %vm8528_vm12 = vnez %v8324_v58  ;;  %v8573_v21 = vld [vmem:[#allocation55_spill] sm:$0xff] }
 0x10b   : > { %5872 = vmatprep.mubr.msk.f32.mxu1 %vm8507_vm7, %v2224_v51  ;;  %6098 = vmatprep.mubr.msk.f32.mxu0 %vm8508_vm9, %v4222_v52  ;;  %vm8518_vm6 = vmmov %vm8468_vm0  ;;  %v2234_v36 = vsel %vm8528_vm12, %v7403_v57, 0.0  ;;  %v4235_v57 = vld [vmem:[#allocation2 + $0x9a] sm:$0xff]  ;;  %vm8543_vm12 = vnez %v8212_v32  ;;  %v4250_v51 = vld [vmem:[#allocation2 + $0x112] sm:$0xff] }
 0x10c   : > { %vm8519_vm7 = vmmov %vm8468_vm0  ;;  %v2617_v32 = vld [vmem:[#allocation2 + $0xb9] sm:$0xff] }
 0x10d   : > { %vm8520_vm9 = vmmov %vm8468_vm0  ;;  %v4251_v52 = vld [vmem:[#allocation2 + $0x11a] sm:$0xff] }
 0x10e   : > { %5873 = vmatmul.mubr.msk.f32.gmra.mrb[18].mxu1 %vm8510_vm5, %v7329_v31  ;;  %6099 = vmatmul.mubr.msk.f32.gmra.mrb[2].mxu0 %vm8511_vm8, %v4255_v40  ;;  %v4259_v31 = vsel %vm8353_vm15, %v4227_v34, 0.0  ;;  %vm8521_vm2 = vmmov %vm8468_vm0  ;;  %vm8522_vm15 = vnez %v8319_v14  ;;  %v4232_v14 = vld [vmem:[#allocation2 + $0x82] sm:$0xff] }
 0x10f   : > { %5875 = vmatprep.mubr.msk.f32.mxu1 %vm8512_vm13, %v2226_v63  ;;  %6101 = vmatprep.mubr.msk.f32.mxu0 %vm8513_vm1, %v4224_v16  ;;  %v2232_v27 = vsel %vm8522_vm15, %v7383_v48, 0.0  ;;  %vm8523_vm10 = vmmov %vm8468_vm0  ;;  %vm8527_vm1 = vnez %v8198_v44  ;;  %v4233_v48 = vld [vmem:[#allocation2 + $0x8a] sm:$0xff] }
 0x110   : > { %vm8524_vm5 = vmmov %vm8468_vm0  ;;  %v4263_v13 = vsel %vm8527_vm1, %v4231_v49, 0.0 }
 0x111   : > { %vm8525_vm8 = vmmov %vm8468_vm0 }
 0x112   : > { %5876 = vmatmul.mubr.msk.f32.gmra.mrb[20].mxu1 %vm8515_vm4, %v7350_v59  ;;  %6102 = vmatmul.mubr.msk.f32.gmra.mrb[4].mxu0 %vm8516_vm11, %v4257_v29  ;;  %vm8526_vm13 = vmmov %vm8468_vm0 }
 0x113   : > { %5878 = vmatprep.mubr.msk.f32.mxu1 %vm8468_vm0, %v2228_v8  ;;  %6104 = vmatprep.mubr.msk.f32.mxu0 %vm8517_vm14, %v4226_v10  ;;  %vm8529_vm3 = vmmov %vm8468_vm0  ;;  %vm8532_vm14 = vnez %v8202_v53  ;;  %v2612_v53 = vld [vmem:[#allocation2 + $0x91] sm:$0xff] }
 0x114   : > { %vm8530_vm4 = vmmov %vm8468_vm0  ;;  %v4265_v59 = vsel %vm8532_vm14, %v4233_v48, 0.0  ;;  %vm8547_vm14 = vnez %v8378_v54  ;;  %v2619_v54 = vld [vmem:[#allocation2 + $0xc9] sm:$0xff] }
 0x115   : > { %vm8531_vm11 = vmmov %vm8468_vm0 }
 0x116   : > { %5879 = vmatmul.mubr.msk.f32.gmra.mrb[22].mxu1 %vm8518_vm6, %v7371_v24  ;;  %6105 = vmatmul.mubr.msk.f32.gmra.mrb[6].mxu0 %vm8519_vm7, %v4259_v31  ;;  %vm8533_vm6 = vnez %v8329_v20  ;;  %v4234_v24 = vld [vmem:[#allocation2 + $0x92] sm:$0xff]  ;;  %vm8534_vm7 = vmmov %vm8468_vm0 }
 0x117   : > { %5881 = vmatprep.mubr.msk.f32.mxu1 %vm8520_vm9, %v2230_v18  ;;  %6107 = vmatprep.mubr.msk.f32.mxu0 %vm8521_vm2, %v4228_v11  ;;  %v2236_v44 = vsel %vm8533_vm6, %v7493_v19, 0.0  ;;  %vm8535_vm9 = vmmov %vm8468_vm0  ;;  %v2613_v20 = vld [vmem:[#allocation2 + $0x99] sm:$0xff]  ;;  %v2614_v19 = vld [vmem:[#allocation2 + $0xa1] sm:$0xff] }
 0x118   : > { %vm8536_vm2 = vmmov %vm8468_vm0 }
 0x119   : > { %vm8537_vm15 = vmmov %vm8468_vm0 }
 0x11a   : > { %5882 = vmatmul.mubr.msk.f32.gmra.mrb[24].mxu1 %vm8523_vm10, %v7391_v15  ;;  %6108 = vmatmul.mubr.msk.f32.gmra.mrb[8].mxu0 %vm8524_vm5, %v4261_v56  ;;  %vm8538_vm10 = vnez %v8206_v4  ;;  %v4236_v15 = vld [vmem:[#allocation2 + $0xa2] sm:$0xff]  ;;  %vm8539_vm5 = vmmov %vm8468_vm0  ;;  %v4239_v4 = vld [vmem:[#allocation2 + $0xba] sm:$0xff] }
 0x11b   : > { %5884 = vmatprep.mubr.msk.f32.mxu1 %vm8525_vm8, %v2232_v27  ;;  %6110 = vmatprep.mubr.msk.f32.mxu0 %vm8526_vm13, %v4230_v22  ;;  %v4267_v58 = vsel %vm8538_vm10, %v4235_v57, 0.0  ;;  %vm8540_vm8 = vmmov %vm8468_vm0  ;;  %v4271_v62 = vsel %vm8547_vm14, %v4239_v4, 0.0 }
 0x11c   : > { %vm8541_vm13 = vmmov %vm8468_vm0 }
 0x11d   : > { %vm8542_vm1 = vmmov %vm8468_vm0 }
 0x11e   : > { %5885 = vmatmul.mubr.msk.f32.gmra.mrb[26].mxu1 %vm8529_vm3, %v7411_v50  ;;  %6111 = vmatmul.mubr.msk.f32.gmra.mrb[10].mxu0 %vm8530_vm4, %v4263_v13  ;;  %v4237_v50 = vld [vmem:[#allocation2 + $0xaa] sm:$0xff]  ;;  %vm8544_vm3 = vmmov %vm8468_vm0 }
 0x11f   : > { %5887 = vmatprep.mubr.msk.f32.mxu1 %vm8531_vm11, %v2234_v36  ;;  %6113 = vmatprep.mubr.msk.f32.mxu0 %vm8468_vm0, %v4232_v14  ;;  %vm8545_vm4 = vmmov %vm8468_vm0 }
 0x120   : > { %vm8546_vm11 = vmmov %vm8468_vm0 }
 0x121   : > { %vm8548_vm6 = vmmov %vm8468_vm0 }
 0x122   : > { %5888 = vmatmul.mubr.msk.f32.gmra.mrb[28].mxu1 %vm8534_vm7, %v7425_v25  ;;  %6114 = vmatmul.mubr.msk.f32.gmra.mrb[12].mxu0 %vm8535_vm9, %v4265_v59  ;;  %v4269_v25 = vsel %vm8543_vm12, %v4237_v50, 0.0  ;;  %vm8549_vm7 = vmmov %vm8468_vm0 }
 0x123   : > { %5890 = vmatprep.mubr.msk.f32.mxu1 %vm8536_vm2, %v2236_v44  ;;  %6116 = vmatprep.mubr.msk.f32.mxu0 %vm8537_vm15, %v4234_v24  ;;  %vm8550_vm9 = vmmov %vm8468_vm0  ;;  %vm8552_vm15 = vnez %v8386_v0  ;;  %v2621_v0 = vld [vmem:[#allocation2 + $0xd9] sm:$0xff] }
 0x124   : > { %vm8551_vm2 = vmmov %vm8468_vm0  ;;  %v4273_v55 = vsel %vm8552_vm15, %v4241_v26, 0.0 }
 0x125   : > { %vm8553_vm10 = vmmov %vm8468_vm0 }
 0x126   : > { %5891 = vmatmul.mubr.msk.f32.gmra.mrb[30].mxu1 %vm8539_vm5, %v7516_v37  ;;  %6117 = vmatmul.mubr.msk.f32.gmra.mrb[14].mxu0 %vm8540_vm8, %v4267_v58  ;;  %v2615_v37 = vld [vmem:[#allocation2 + $0xa9] sm:$0xff]  ;;  %vm8554_vm5 = vmmov %vm8468_vm0 }
 0x127   : > { %5919 = vmatprep.mubr.msk.f32.mxu1 %vm8541_vm13, %v2612_v53  ;;  %6119 = vmatprep.mubr.msk.f32.mxu0 %vm8542_vm1, %v4236_v15  ;;  %vm8555_vm8 = vmmov %vm8468_vm0  ;;  %vm8557_vm1 = vnez %v8394_v17  ;;  %v2623_v17 = vld [vmem:[#allocation2 + $0xe9] sm:$0xff] }
 0x128   : > { %vm8556_vm13 = vmmov %vm8468_vm0  ;;  %v4275_v35 = vsel %vm8557_vm1, %v8408_v23, 0.0 }
 0x129   : > { %vm8558_vm12 = vmmov %vm8468_vm0 }
 0x12a   : > { %5920 = vmatmul.mubr.msk.f32.vlgmr.msra.gmra.mrb[16].mxu1 %vm8544_vm3, %v2613_v20  ;;  %6120 = vmatmul.mubr.msk.f32.gmra.mrb[16].mxu0 %vm8545_vm4, %v4269_v25  ;;  %vm8559_vm3 = vmmov %vm8468_vm0 }
 0x12b   : > { %5922 = vmatprep.mubr.msk.f32.mxu1 %vm8546_vm11, %v2614_v19  ;;  %6122 = vmatprep.mubr.msk.f32.mxu0 %vm8468_vm0, %v4238_v33  ;;  %vm8560_vm4 = vmmov %vm8468_vm0 }
 0x12c   : > { %vm8561_vm11 = vmmov %vm8468_vm0  ;;  %vm8562_vm0 = vnez %v8401_v43  ;;  %v8571_v43 = vld [vmem:[#allocation54_spill] sm:$0xff] }
 0x12d   : > { %v4277_v45 = vsel %vm8562_vm0, %v8415_v30, 0.0  ;;  %vm8563_vm14 = vmmov %vm8551_vm2  ;;  %v2625_v30 = vld [vmem:[#allocation2 + $0xf9] sm:$0xff] }
 0x12e   : > { %5923 = vmatmul.mubr.msk.f32.gmra.mrb[18].mxu1 %vm8548_vm6, %v2615_v37  ;;  %6123 = vmatmul.mubr.msk.f32.gmra.mrb[18].mxu0 %vm8549_vm7, %v4271_v62  ;;  %vm8564_vm6 = vmmov %vm8551_vm2 }
 0x12f   : > { %5925 = vmatprep.mubr.msk.f32.mxu1 %vm8550_vm9, %v2616_v9  ;;  %6125 = vmatprep.mubr.msk.f32.mxu0 %vm8551_vm2, %v4240_v38  ;;  %vm8565_vm7 = vmmov %vm8551_vm2 }
 0x130   : > { %vm8566_vm9 = vmmov %vm8551_vm2  ;;  %vm8567_vm2 = vnez %v8409_v3 }
 0x131   : > { %v4279_v23 = vsel %vm8567_vm2, %v8423_v28, 0.0  ;;  %vm8568_vm15 = vmmov %vm8559_vm3 }
 0x132   : > { %5926 = vmatmul.mubr.msk.f32.gmra.mrb[20].mxu1 %vm8553_vm10, %v2617_v32  ;;  %6126 = vmatmul.mubr.msk.f32.gmra.mrb[20].mxu0 %vm8554_vm5, %v4273_v55  ;;  %vm8569_vm10 = vmmov %vm8559_vm3 }
 0x133   : > { %5928 = vmatprep.mubr.msk.f32.mxu1 %vm8555_vm8, %v2618_v39  ;;  %6128 = vmatprep.mubr.msk.f32.mxu0 %vm8556_vm13, %v4242_v42  ;;  %vm8570_vm5 = vmmov %vm8559_vm3  ;;  %vm8574_vm13 = vnez %v8416_v1 }
 0x134   : > { %vm8572_vm8 = vmmov %vm8559_vm3 }
 0x135   : > { %vm8575_vm1 = vmmov %vm8559_vm3 }
 0x136   : > { %5929 = vmatmul.mubr.msk.f32.gmra.mrb[22].mxu1 %vm8558_vm12, %v2619_v54  ;;  %6129 = vmatmul.mubr.msk.f32.gmra.mrb[22].mxu0 %vm8559_vm3, %v4275_v35  ;;  %vm8576_vm12 = vmmov %vm8575_vm1 }
 0x137   : > { %5931 = vmatprep.mubr.msk.f32.mxu1 %vm8560_vm4, %v2620_v41  ;;  %6131 = vmatprep.mubr.msk.f32.mxu0 %vm8561_vm11, %v8412_v60  ;;  %v2624_v60 = vld [vmem:[#allocation2 + $0xf1] sm:$0xff]  ;;  %vm8577_vm3 = vmmov %vm8575_vm1  ;;  %vm8579_vm11 = vnez %v8287_v61 }
 0x138   : > { %vm8578_vm4 = vmmov %vm8575_vm1  ;;  %v4283_v3 = vsel %vm8579_vm11, %v4251_v52, 0.0 }
 0x139   : > { %vm8580_vm0 = vmmov %vm8575_vm1 }
 0x13a   : > { %5932 = vmatmul.mubr.msk.f32.gmra.mrb[24].mxu1 %vm8563_vm14, %v2621_v0  ;;  %6132 = vmatmul.mubr.msk.f32.gmra.mrb[24].mxu0 %vm8564_vm6, %v4277_v45  ;;  %vm8581_vm14 = vmmov %vm8580_vm0  ;;  %vm4642_vm6 = vcmask 64512  }
 0x13b   : > { %5934 = vmatprep.mubr.msk.f32.mxu1 %vm8565_vm7, %v2622_v7  ;;  %6134 = vmatprep.mubr.msk.f32.mxu0 %vm8566_vm9, %v8420_v12  ;;  %v4281_v12 = vsel %vm8574_vm13, %v8573_v21, 0.0 }
 0x13e   : > { %5935 = vmatmul.mubr.msk.f32.gmra.mrb[26].mxu1 %vm8568_vm15, %v2623_v17  ;;  %6135 = vmatmul.mubr.msk.f32.gmra.mrb[26].mxu0 %vm8569_vm10, %v4279_v23 }
 0x13f   : > { %5937 = vmatprep.mubr.msk.f32.mxu1 %vm8570_vm5, %v2624_v60  ;;  %6137 = vmatprep.mubr.msk.f32.mxu0 %vm8572_vm8, %v8571_v43 }
 0x142   : > { %5938 = vmatmul.mubr.msk.f32.gmra.mrb[28].mxu1 %vm8575_vm1, %v2625_v30  ;;  %6138 = vmatmul.mubr.msk.f32.gmra.mrb[28].mxu0 %vm8576_vm12, %v4281_v12 }
 0x143   : > { %5940 = vmatprep.mubr.msk.f32.mxu1 %vm8577_vm3, %v7665_v5  ;;  %6140 = vmatprep.mubr.msk.f32.mxu0 %vm8578_vm4, %v4250_v51 }
 0x146   : > { %5941 = vmatmul.mubr.msk.f32.gmra.mrb[30].mxu1 %vm8580_vm0, %v7678_v47  ;;  %6141 = vmatmul.mubr.msk.f32.gmra.mrb[30].mxu0 %vm8581_vm14, %v4283_v3 }
 0x1bd   : > { %v5847_v1 = vpop.f32.mrb[0].mxu1 }
 0x1be   : > { %v2405_v28 = vpop.f32.mrb[1].mxu1 }
 0x1c1   : > { %v5850_v6 = vpop.f32.mrb[2].mxu1 }
 0x1c2   : > { %v2415_v40 = vpop.f32.mrb[3].mxu1 }
 0x1c5   : > { %v5853_v63 = vpop.f32.mrb[4].mxu1 }
 0x1c6   : > { %v2425_v16 = vpop.f32.mrb[5].mxu1 }
 0x1c9   : > { %v5856_v5 = vpop.f32.mrb[6].mxu1 }
 0x1ca   : > { %v2435_v2 = vpop.f32.mrb[7].mxu1 }
 0x1cd   : > { %v7831_v29 = vpop.f32.mrb[8].mxu1 }
 0x1ce   : > { %v7833_v61 = vpop.f32.mrb[9].mxu1 }
 0x1d1   : > { %v7835_v8 = vpop.f32.mrb[10].mxu1 }
 0x1d2   : > { %v7837_v47 = vpop.f32.mrb[11].mxu1 }
 0x1d5   : > { %v7839_v10 = vpop.f32.mrb[12].mxu1 }
 0x1d6   : > { %v7841_v34 = vpop.f32.mrb[13].mxu1 }
 0x1d9   : > { %v7844_v31 = vpop.f32.mrb[14].mxu1 }
 0x1da   : > { %v7846_v18 = vpop.f32.mrb[15].mxu1 }
 0x1dd   : > { %v6097_v11 = vpop.f32.mrb[0].mxu0 }
 0x1de   : > { %v6145_v46 = vadd.f32 %v6097_v11, %v5847_v1  ;;  %v4451_v56 = vpop.f32.mrb[1].mxu0 }
 0x1df   : > { %v6146_v27 = vadd.f32 %v4451_v56, %v2405_v28 }
 0x1e0   : > { %4644 = vst.msk [vmem:[%s7855_s12 + $0x8] sm:$0xff] %vm4642_vm6, %v6145_v46  ;;  %4676 = vst.msk [vmem:[%s7859_s13 + $0x8] sm:$0xff] %vm4642_vm6, %v6145_v46  ;;  %v4681_v22 = vsel %vm4642_vm6, %v6145_v46, 0.0  ;;  %v4750_v49 = vmul.f32 %v6145_v46, %v6145_v46 }
 0x1e1   : > { %4643 = vst.msk [vmem:[%s7855_s12] sm:$0xff] %vm4642_vm6, %v6146_v27  ;;  %4675 = vst.msk [vmem:[%s7859_s13] sm:$0xff] %vm4642_vm6, %v6146_v27  ;;  %v4680_v13 = vsel %vm4642_vm6, %v6146_v27, 0.0  ;;  %v4749_v36 = vmul.f32 %v6146_v27, %v6146_v27  ;;  %v6100_v14 = vpop.f32.mrb[2].mxu0 }
 0x1e2   : > { %v4782_v48 = vsel %vm4642_vm6, %v4750_v49, 0.0  ;;  %v6147_v59 = vadd.f32 %v6100_v14, %v5850_v6  ;;  %v4461_v44 = vpop.f32.mrb[3].mxu0  ;;  %v4682_v24 = vadd.f32 %v4681_v22, %v4680_v13 }
 0x1e3   : > { %v4781_v57 = vsel %vm4642_vm6, %v4749_v36, 0.0  ;;  %v6148_v58 = vadd.f32 %v4461_v44, %v2415_v40 }
 0x1e4   : > { %4646 = vst.msk [vmem:[%s7855_s12 + $0x18] sm:$0xff] %vm4642_vm6, %v6147_v59  ;;  %v4783_v53 = vadd.f32 %v4782_v48, %v4781_v57  ;;  %v4752_v15 = vmul.f32 %v6147_v59, %v6147_v59  ;;  %v4685_v37 = vsel %vm4642_vm6, %v6147_v59, 0.0 }
 0x1e5   : > { %4645 = vst.msk [vmem:[%s7855_s12 + $0x10] sm:$0xff] %vm4642_vm6, %v6148_v58  ;;  %v4683_v50 = vsel %vm4642_vm6, %v6148_v58, 0.0  ;;  %v4751_v20 = vmul.f32 %v6148_v58, %v6148_v58  ;;  %v6103_v25 = vpop.f32.mrb[4].mxu0 }
 0x1e6   : > { %v4684_v19 = vadd.f32 %v4683_v50, %v4682_v24  ;;  %v6149_v33 = vadd.f32 %v6103_v25, %v5853_v63  ;;  %v4471_v4 = vpop.f32.mrb[5].mxu0  ;;  %v4786_v32 = vsel %vm4642_vm6, %v4752_v15, 0.0 }
 0x1e7   : > { %v4784_v62 = vsel %vm4642_vm6, %v4751_v20, 0.0  ;;  %v6150_v9 = vadd.f32 %v4471_v4, %v2425_v16 }
 0x1e8   : > { %v4785_v38 = vadd.f32 %v4784_v62, %v4783_v53  ;;  %4648 = vst.msk [vmem:[%s7855_s12 + $0x28] sm:$0xff] %vm4642_vm6, %v6149_v33  ;;  %v4686_v26 = vadd.f32 %v4685_v37, %v4684_v19  ;;  %v4754_v55 = vmul.f32 %v6149_v33, %v6149_v33  ;;  %v4689_v7 = vsel %vm4642_vm6, %v6149_v33, 0.0 }
 0x1e9   : > { %4647 = vst.msk [vmem:[%s7855_s12 + $0x20] sm:$0xff] %vm4642_vm6, %v6150_v9  ;;  %v4687_v39 = vsel %vm4642_vm6, %v6150_v9, 0.0  ;;  %v4753_v42 = vmul.f32 %v6150_v9, %v6150_v9  ;;  %v6106_v54 = vpop.f32.mrb[6].mxu0 }
 0x1ea   : > { %v4688_v35 = vadd.f32 %v4687_v39, %v4686_v26  ;;  %v4787_v41 = vadd.f32 %v4786_v32, %v4785_v38  ;;  %v6151_v0 = vadd.f32 %v6106_v54, %v5856_v5  ;;  %v4481_v45 = vpop.f32.mrb[7].mxu0  ;;  %v4790_v30 = vsel %vm4642_vm6, %v4754_v55, 0.0 }
 0x1eb   : > { %v4788_v17 = vsel %vm4642_vm6, %v4753_v42, 0.0  ;;  %v6152_v23 = vadd.f32 %v4481_v45, %v2435_v2 }
 0x1ec   : > { %v4789_v60 = vadd.f32 %v4788_v17, %v4787_v41  ;;  %4650 = vst.msk [vmem:[%s7855_s12 + $0x38] sm:$0xff] %vm4642_vm6, %v6151_v0  ;;  %v4690_v43 = vadd.f32 %v4689_v7, %v4688_v35  ;;  %v4756_v21 = vmul.f32 %v6151_v0, %v6151_v0  ;;  %v4693_v40 = vsel %vm4642_vm6, %v6151_v0, 0.0 }
 0x1ed   : > { %4649 = vst.msk [vmem:[%s7855_s12 + $0x30] sm:$0xff] %vm4642_vm6, %v6152_v23  ;;  %v4691_v12 = vsel %vm4642_vm6, %v6152_v23, 0.0  ;;  %v4755_v51 = vmul.f32 %v6152_v23, %v6152_v23  ;;  %v6109_v52 = vpop.f32.mrb[8].mxu0 }
 0x1ee   : > { %v4692_v3 = vadd.f32 %v4691_v12, %v4690_v43  ;;  %v4791_v1 = vadd.f32 %v4790_v30, %v4789_v60  ;;  %v6153_v28 = vadd.f32 %v6109_v52, %v7831_v29  ;;  %v4491_v6 = vpop.f32.mrb[9].mxu0  ;;  %v4794_v11 = vsel %vm4642_vm6, %v4756_v21, 0.0 }
 0x1ef   : > { %v4792_v63 = vsel %vm4642_vm6, %v4755_v51, 0.0  ;;  %v6154_v16 = vadd.f32 %v4491_v6, %v7833_v61 }
 0x1f0   : > { %v4793_v5 = vadd.f32 %v4792_v63, %v4791_v1  ;;  %4652 = vst.msk [vmem:[%s7855_s12 + $0x48] sm:$0xff] %vm4642_vm6, %v6153_v28  ;;  %v4694_v2 = vadd.f32 %v4693_v40, %v4692_v3  ;;  %v4758_v46 = vmul.f32 %v6153_v28, %v6153_v28  ;;  %v4697_v36 = vsel %vm4642_vm6, %v6153_v28, 0.0 }
 0x1f1   : > { %4651 = vst.msk [vmem:[%s7855_s12 + $0x40] sm:$0xff] %vm4642_vm6, %v6154_v16  ;;  %v4695_v29 = vsel %vm4642_vm6, %v6154_v16, 0.0  ;;  %v4757_v56 = vmul.f32 %v6154_v16, %v6154_v16  ;;  %v6112_v27 = vpop.f32.mrb[10].mxu0 }
 0x1f2   : > { %v4696_v22 = vadd.f32 %v4695_v29, %v4694_v2  ;;  %v4795_v49 = vadd.f32 %v4794_v11, %v4793_v5  ;;  %v6155_v13 = vadd.f32 %v6112_v27, %v7835_v8  ;;  %v4501_v61 = vpop.f32.mrb[11].mxu0  ;;  %v4798_v24 = vsel %vm4642_vm6, %v4758_v46, 0.0 }
 0x1f3   : > { %v4796_v14 = vsel %vm4642_vm6, %v4757_v56, 0.0  ;;  %v6156_v48 = vadd.f32 %v4501_v61, %v7837_v47 }
 0x1f4   : > { %v4797_v59 = vadd.f32 %v4796_v14, %v4795_v49  ;;  %4654 = vst.msk [vmem:[%s7855_s12 + $0x58] sm:$0xff] %vm4642_vm6, %v6155_v13  ;;  %v4698_v44 = vadd.f32 %v4697_v36, %v4696_v22  ;;  %v4760_v57 = vmul.f32 %v6155_v13, %v6155_v13  ;;  %v4701_v25 = vsel %vm4642_vm6, %v6155_v13, 0.0 }
 0x1f5   : > { %4653 = vst.msk [vmem:[%s7855_s12 + $0x50] sm:$0xff] %vm4642_vm6, %v6156_v48  ;;  %v4699_v8 = vsel %vm4642_vm6, %v6156_v48, 0.0  ;;  %v4759_v58 = vmul.f32 %v6156_v48, %v6156_v48  ;;  %v6115_v53 = vpop.f32.mrb[12].mxu0 }
 0x1f6   : > { %v4700_v15 = vadd.f32 %v4699_v8, %v4698_v44  ;;  %v4799_v50 = vadd.f32 %v4798_v24, %v4797_v59  ;;  %v6157_v20 = vadd.f32 %v6115_v53, %v7839_v10  ;;  %v4511_v47 = vpop.f32.mrb[13].mxu0  ;;  %v4802_v62 = vsel %vm4642_vm6, %v4760_v57, 0.0 }
 0x1f7   : > { %v4800_v19 = vsel %vm4642_vm6, %v4759_v58, 0.0  ;;  %v6158_v33 = vadd.f32 %v4511_v47, %v7841_v34 }
 0x1f8   : > { %v4801_v4 = vadd.f32 %v4800_v19, %v4799_v50  ;;  %4656 = vst.msk [vmem:[%s7855_s12 + $0x68] sm:$0xff] %vm4642_vm6, %v6157_v20  ;;  %v4702_v37 = vadd.f32 %v4701_v25, %v4700_v15  ;;  %v4762_v9 = vmul.f32 %v6157_v20, %v6157_v20  ;;  %v4705_v42 = vsel %vm4642_vm6, %v6157_v20, 0.0 }
 0x1f9   : > { %4655 = vst.msk [vmem:[%s7855_s12 + $0x60] sm:$0xff] %vm4642_vm6, %v6158_v33  ;;  %v4703_v10 = vsel %vm4642_vm6, %v6158_v33, 0.0  ;;  %v4761_v38 = vmul.f32 %v6158_v33, %v6158_v33  ;;  %v6118_v26 = vpop.f32.mrb[14].mxu0 }
 0x1fa   : > { %v4704_v32 = vadd.f32 %v4703_v10, %v4702_v37  ;;  %v4803_v55 = vadd.f32 %v4802_v62, %v4801_v4  ;;  %v6159_v39 = vadd.f32 %v6118_v26, %v7844_v31  ;;  %v4521_v34 = vpop.f32.mrb[15].mxu0  ;;  %v4806_v45 = vsel %vm4642_vm6, %v4762_v9, 0.0 }
 0x1fb   : > { %v4804_v54 = vsel %vm4642_vm6, %v4761_v38, 0.0  ;;  %v6160_v35 = vadd.f32 %v4521_v34, %v7846_v18 }
 0x1fc   : > { %v4805_v41 = vadd.f32 %v4804_v54, %v4803_v55  ;;  %4658 = vst.msk [vmem:[%s7855_s12 + $0x78] sm:$0xff] %vm4642_vm6, %v6159_v39  ;;  %v4706_v0 = vadd.f32 %v4705_v42, %v4704_v32  ;;  %v4764_v7 = vmul.f32 %v6159_v39, %v6159_v39  ;;  %v4709_v51 = vsel %vm4642_vm6, %v6159_v39, 0.0 }
 0x1fd   : > { %4657 = vst.msk [vmem:[%s7855_s12 + $0x70] sm:$0xff] %vm4642_vm6, %v6160_v35  ;;  %v4707_v17 = vsel %vm4642_vm6, %v6160_v35, 0.0  ;;  %v4763_v31 = vmul.f32 %v6160_v35, %v6160_v35  ;;  %v5921_v23 = vpop.f32.mrb[16].mxu1  ;;  %v6121_v60 = vpop.f32.mrb[16].mxu0 }
 0x1fe   : > { %v4708_v43 = vadd.f32 %v4707_v17, %v4706_v0  ;;  %v4807_v30 = vadd.f32 %v4806_v45, %v4805_v41  ;;  %v6161_v21 = vadd.f32 %v6121_v60, %v5921_v23  ;;  %v2875_v18 = vpop.f32.mrb[17].mxu1  ;;  %v4531_v12 = vpop.f32.mrb[17].mxu0  ;;  %v4810_v6 = vsel %vm4642_vm6, %v4764_v7, 0.0 }
 0x1ff   : > { %v4808_v52 = vsel %vm4642_vm6, %v4763_v31, 0.0  ;;  %v6162_v3 = vadd.f32 %v4531_v12, %v2875_v18 }
 0x200   : > { %v4809_v1 = vadd.f32 %v4808_v52, %v4807_v30  ;;  %4660 = vst.msk [vmem:[%s7855_s12 + $0x88] sm:$0xff] %vm4642_vm6, %v6161_v21  ;;  %v4710_v28 = vadd.f32 %v4709_v51, %v4708_v43  ;;  %v4766_v40 = vmul.f32 %v6161_v21, %v6161_v21  ;;  %v4713_v22 = vsel %vm4642_vm6, %v6161_v21, 0.0 }
 0x201   : > { %4659 = vst.msk [vmem:[%s7855_s12 + $0x80] sm:$0xff] %vm4642_vm6, %v6162_v3  ;;  %v4711_v63 = vsel %vm4642_vm6, %v6162_v3, 0.0  ;;  %v4765_v16 = vmul.f32 %v6162_v3, %v6162_v3  ;;  %v5924_v5 = vpop.f32.mrb[18].mxu1  ;;  %v6124_v2 = vpop.f32.mrb[18].mxu0 }
 0x202   : > { %v4712_v11 = vadd.f32 %v4711_v63, %v4710_v28  ;;  %v4811_v46 = vadd.f32 %v4810_v6, %v4809_v1  ;;  %v6163_v29 = vadd.f32 %v6124_v2, %v5924_v5  ;;  %v2885_v56 = vpop.f32.mrb[19].mxu1  ;;  %v4541_v27 = vpop.f32.mrb[19].mxu0  ;;  %v4814_v14 = vsel %vm4642_vm6, %v4766_v40, 0.0 }
 0x203   : > { %v4812_v49 = vsel %vm4642_vm6, %v4765_v16, 0.0  ;;  %v6164_v13 = vadd.f32 %v4541_v27, %v2885_v56 }
 0x204   : > { %v4813_v61 = vadd.f32 %v4812_v49, %v4811_v46  ;;  %4662 = vst.msk [vmem:[%s7855_s12 + $0x98] sm:$0xff] %vm4642_vm6, %v6163_v29  ;;  %v4714_v36 = vadd.f32 %v4713_v22, %v4712_v11  ;;  %v4768_v48 = vmul.f32 %v6163_v29, %v6163_v29  ;;  %v4717_v20 = vsel %vm4642_vm6, %v6163_v29, 0.0 }
 0x205   : > { %4661 = vst.msk [vmem:[%s7855_s12 + $0x90] sm:$0xff] %vm4642_vm6, %v6164_v13  ;;  %v4715_v59 = vsel %vm4642_vm6, %v6164_v13, 0.0  ;;  %v4767_v44 = vmul.f32 %v6164_v13, %v6164_v13  ;;  %v5927_v24 = vpop.f32.mrb[20].mxu1  ;;  %v6127_v57 = vpop.f32.mrb[20].mxu0 }
 0x206   : > { %v4716_v8 = vadd.f32 %v4715_v59, %v4714_v36  ;;  %v4815_v58 = vadd.f32 %v4814_v14, %v4813_v61  ;;  %v6165_v53 = vadd.f32 %v6127_v57, %v5927_v24  ;;  %v2895_v15 = vpop.f32.mrb[21].mxu1  ;;  %v4551_v50 = vpop.f32.mrb[21].mxu0  ;;  %v4818_v4 = vsel %vm4642_vm6, %v4768_v48, 0.0 }
 0x207   : > { %v4816_v47 = vsel %vm4642_vm6, %v4767_v44, 0.0  ;;  %v6166_v25 = vadd.f32 %v4551_v50, %v2895_v15 }
 0x208   : > { %v4817_v19 = vadd.f32 %v4816_v47, %v4815_v58  ;;  %4664 = vst.msk [vmem:[%s7855_s12 + $0xa8] sm:$0xff] %vm4642_vm6, %v6165_v53  ;;  %v4718_v33 = vadd.f32 %v4717_v20, %v4716_v8  ;;  %v4770_v37 = vmul.f32 %v6165_v53, %v6165_v53  ;;  %v4721_v42 = vsel %vm4642_vm6, %v6165_v53, 0.0 }
 0x209   : > { %4663 = vst.msk [vmem:[%s7855_s12 + $0xa0] sm:$0xff] %vm4642_vm6, %v6166_v25  ;;  %v4719_v62 = vsel %vm4642_vm6, %v6166_v25, 0.0  ;;  %v4769_v9 = vmul.f32 %v6166_v25, %v6166_v25  ;;  %v5930_v10 = vpop.f32.mrb[22].mxu1  ;;  %v6130_v38 = vpop.f32.mrb[22].mxu0 }
 0x20a   : > { %v4720_v26 = vadd.f32 %v4719_v62, %v4718_v33  ;;  %v4819_v32 = vadd.f32 %v4818_v4, %v4817_v19  ;;  %v6167_v55 = vadd.f32 %v6130_v38, %v5930_v10  ;;  %v2905_v39 = vpop.f32.mrb[23].mxu1  ;;  %v4561_v34 = vpop.f32.mrb[23].mxu0  ;;  %v4822_v45 = vsel %vm4642_vm6, %v4770_v37, 0.0 }
 0x20b   : > { %v4820_v54 = vsel %vm4642_vm6, %v4769_v9, 0.0  ;;  %v6168_v35 = vadd.f32 %v4561_v34, %v2905_v39 }
 0x20c   : > { %v4821_v41 = vadd.f32 %v4820_v54, %v4819_v32  ;;  %4666 = vst.msk [vmem:[%s7855_s12 + $0xb8] sm:$0xff] %vm4642_vm6, %v6167_v55  ;;  %v4722_v0 = vadd.f32 %v4721_v42, %v4720_v26  ;;  %v4772_v7 = vmul.f32 %v6167_v55, %v6167_v55  ;;  %v4725_v51 = vsel %vm4642_vm6, %v6167_v55, 0.0 }
 0x20d   : > { %4665 = vst.msk [vmem:[%s7855_s12 + $0xb0] sm:$0xff] %vm4642_vm6, %v6168_v35  ;;  %v4723_v17 = vsel %vm4642_vm6, %v6168_v35, 0.0  ;;  %v4771_v31 = vmul.f32 %v6168_v35, %v6168_v35  ;;  %v5933_v23 = vpop.f32.mrb[24].mxu1  ;;  %v6133_v60 = vpop.f32.mrb[24].mxu0 }
 0x20e   : > { %v4724_v43 = vadd.f32 %v4723_v17, %v4722_v0  ;;  %v4823_v30 = vadd.f32 %v4822_v45, %v4821_v41  ;;  %v6169_v21 = vadd.f32 %v6133_v60, %v5933_v23  ;;  %v2915_v18 = vpop.f32.mrb[25].mxu1  ;;  %v4571_v12 = vpop.f32.mrb[25].mxu0  ;;  %v4826_v6 = vsel %vm4642_vm6, %v4772_v7, 0.0 }
 0x20f   : > { %v4824_v52 = vsel %vm4642_vm6, %v4771_v31, 0.0  ;;  %v6170_v3 = vadd.f32 %v4571_v12, %v2915_v18 }
 0x210   : > { %v4825_v1 = vadd.f32 %v4824_v52, %v4823_v30  ;;  %4668 = vst.msk [vmem:[%s7855_s12 + $0xc8] sm:$0xff] %vm4642_vm6, %v6169_v21  ;;  %v4726_v28 = vadd.f32 %v4725_v51, %v4724_v43  ;;  %v4774_v40 = vmul.f32 %v6169_v21, %v6169_v21  ;;  %v4729_v22 = vsel %vm4642_vm6, %v6169_v21, 0.0 }
 0x211   : > { %4667 = vst.msk [vmem:[%s7855_s12 + $0xc0] sm:$0xff] %vm4642_vm6, %v6170_v3  ;;  %v4727_v63 = vsel %vm4642_vm6, %v6170_v3, 0.0  ;;  %v4773_v16 = vmul.f32 %v6170_v3, %v6170_v3  ;;  %v5936_v5 = vpop.f32.mrb[26].mxu1  ;;  %v6136_v2 = vpop.f32.mrb[26].mxu0 }
 0x212   : > { %v4728_v11 = vadd.f32 %v4727_v63, %v4726_v28  ;;  %v4827_v46 = vadd.f32 %v4826_v6, %v4825_v1  ;;  %v6171_v29 = vadd.f32 %v6136_v2, %v5936_v5  ;;  %v2925_v56 = vpop.f32.mrb[27].mxu1  ;;  %v4581_v27 = vpop.f32.mrb[27].mxu0  ;;  %v4830_v14 = vsel %vm4642_vm6, %v4774_v40, 0.0 }
 0x213   : > { %v4828_v49 = vsel %vm4642_vm6, %v4773_v16, 0.0  ;;  %v6172_v13 = vadd.f32 %v4581_v27, %v2925_v56 }
 0x214   : > { %v4829_v61 = vadd.f32 %v4828_v49, %v4827_v46  ;;  %4670 = vst.msk [vmem:[%s7855_s12 + $0xd8] sm:$0xff] %vm4642_vm6, %v6171_v29  ;;  %v4730_v36 = vadd.f32 %v4729_v22, %v4728_v11  ;;  %v4776_v48 = vmul.f32 %v6171_v29, %v6171_v29  ;;  %v4733_v20 = vsel %vm4642_vm6, %v6171_v29, 0.0 }
 0x215   : > { %4669 = vst.msk [vmem:[%s7855_s12 + $0xd0] sm:$0xff] %vm4642_vm6, %v6172_v13  ;;  %v4731_v59 = vsel %vm4642_vm6, %v6172_v13, 0.0  ;;  %v4775_v44 = vmul.f32 %v6172_v13, %v6172_v13  ;;  %v5939_v24 = vpop.f32.mrb[28].mxu1  ;;  %v6139_v57 = vpop.f32.mrb[28].mxu0 }
 0x216   : > { %v4732_v8 = vadd.f32 %v4731_v59, %v4730_v36  ;;  %v4831_v58 = vadd.f32 %v4830_v14, %v4829_v61  ;;  %v6173_v53 = vadd.f32 %v6139_v57, %v5939_v24  ;;  %v2935_v15 = vpop.f32.mrb[29].mxu1  ;;  %v4591_v50 = vpop.f32.mrb[29].mxu0  ;;  %v4834_v4 = vsel %vm4642_vm6, %v4776_v48, 0.0 }
 0x217   : > { %v4832_v47 = vsel %vm4642_vm6, %v4775_v44, 0.0  ;;  %v6174_v25 = vadd.f32 %v4591_v50, %v2935_v15 }
 0x218   : > { %v4833_v19 = vadd.f32 %v4832_v47, %v4831_v58  ;;  %4672 = vst.msk [vmem:[%s7855_s12 + $0xe8] sm:$0xff] %vm4642_vm6, %v6173_v53  ;;  %v4734_v33 = vadd.f32 %v4733_v20, %v4732_v8  ;;  %v4778_v37 = vmul.f32 %v6173_v53, %v6173_v53  ;;  %v4737_v42 = vsel %vm4642_vm6, %v6173_v53, 0.0 }
 0x219   : > { %4671 = vst.msk [vmem:[%s7855_s12 + $0xe0] sm:$0xff] %vm4642_vm6, %v6174_v25  ;;  %v4735_v62 = vsel %vm4642_vm6, %v6174_v25, 0.0  ;;  %v4777_v9 = vmul.f32 %v6174_v25, %v6174_v25  ;;  %v5942_v10 = vpop.f32.mrb[30].mxu1  ;;  %v6142_v38 = vpop.f32.mrb[30].mxu0 }
 0x21a   : > { %v4736_v26 = vadd.f32 %v4735_v62, %v4734_v33  ;;  %v4835_v32 = vadd.f32 %v4834_v4, %v4833_v19  ;;  %v6175_v55 = vadd.f32 %v6142_v38, %v5942_v10  ;;  %v2945_v39 = vpop.f32.mrb[31].mxu1  ;;  %v4601_v34 = vpop.f32.mrb[31].mxu0  ;;  %v4838_v7 = vsel %vm4642_vm6, %v4778_v37, 0.0 }
 0x21b   : > { %v4836_v54 = vsel %vm4642_vm6, %v4777_v9, 0.0  ;;  %v6176_v35 = vadd.f32 %v4601_v34, %v2945_v39 }
 0x21c   : > { %v4738_v41 = vadd.f32 %v4737_v42, %v4736_v26  ;;  %v4837_v0 = vadd.f32 %v4836_v54, %v4835_v32  ;;  %4674 = vst.msk [vmem:[%s7855_s12 + $0xf8] sm:$0xff] %vm4642_vm6, %v6175_v55  ;;  %5386 = vst.msk [vmem:[%s7859_s13 + $0x18] sm:$0xff] %vm4642_vm6, %v6175_v55  ;;  %v4780_v45 = vmul.f32 %v6175_v55, %v6175_v55 }
 0x21d   : > { %4673 = vst.msk [vmem:[%s7855_s12 + $0xf0] sm:$0xff] %vm4642_vm6, %v6176_v35  ;;  %5385 = vst.msk [vmem:[%s7859_s13 + $0x10] sm:$0xff] %vm4642_vm6, %v6176_v35  ;;  %v4739_v17 = vsel %vm4642_vm6, %v6176_v35, 0.0  ;;  %v4779_v31 = vmul.f32 %v6176_v35, %v6176_v35 }
 0x21e   : > { %v4839_v23 = vadd.f32 %v4838_v7, %v4837_v0  ;;  %v4842_v60 = vsel %vm4642_vm6, %v4780_v45, 0.0  ;;  %v4740_v43 = vadd.f32 %v4739_v17, %v4738_v41 }
 0x21f   : > { %6472 = shalt.err (!%p6469_p5)
}
 0x220   : > { %s6473_s8 = scalar_lea.hbm %s7993_s24, 512  ;;  %s6477_s12 = scalar_lea.hbm %s8069_s5, 1024 }
 0x221   : > { %p6474_p6 = scmp.ne.s32.totalorder %s7993_s24, %s6473_s8  ;;  %p6478_p10 = scmp.lt.u32.totalorder %s7993_s24, %s8069_s5 }
 0x222   : > { %p6479_p11 = scmp.lt.u32.totalorder %s6477_s12, %s6473_s8  ;;  %p6481_p13 = scmp.lt.u32.totalorder %s6473_s8, %s7993_s24 }
 0x223   : > { %p6475_p7 = pnand %p6474_p6, %p6612_p4 }
 0x224   : > { %p6480_p12 = por %p6479_p11, %p6478_p10 }
 0x225   : > { %p6476_p9 = pneg %p6475_p7 }
 0x226   : > { %p6482_p0 = por %p6481_p13, %p6480_p12 }
 0x228   : > { %p6483_p1 = pnand %p6482_p0, %p6476_p9 }
 0x22a   : > { %6486 = shalt.err (!%p6483_p1)
}
 0x22b   : > { %s6540_s21 = smov 128   ;;  %s6541_s17 = smov 8   ;;  %v4741_v30 = vsel %vm4642_vm6, %v6175_v55, 0.0  ;;  %v4840_v21 = vsel %vm4642_vm6, %v4779_v31, 0.0  ;;  %vm4854_vm7 = vcmask 57344  }
 0x22c   : > { %6401 = dma.vmem_to_hbm [thread:$0]  (%p6612_p4), %s7995_s14, 512, %s7993_s24, %s8012_s25, %s6540_s21, %s6540_s21, %s6541_s17   ;;  %v4742_v18 = vadd.f32 %v4741_v30, %v4740_v43  ;;  %v4841_v12 = vadd.f32 %v4840_v21, %v4839_v23 }
 0x22d   : > { %s5077_s27 = sshll.u32 %s6653_s15, 1 }
 0x22e   : > { %v4743_v51 = vrot.slane %v4742_v18, 4  ;;  %v4843_v52 = vadd.f32 %v4842_v60, %v4841_v12  ;;  %s320_s14 = scalar_lea.vmem %s8068_s4, %s5077_s27 }
 0x230   : > { %v4744_v3 = vadd.f32 %v4743_v51, %v4742_v18  ;;  %v4844_v1 = vrot.slane %v4843_v52, 4 }
 0x232   : > { %v4745_v28 = vrot.slane %v4744_v3, 2  ;;  %v4845_v6 = vadd.f32 %v4844_v1, %v4843_v52 }
 0x234   : > { %v4746_v40 = vadd.f32 %v4745_v28, %v4744_v3  ;;  %v4846_v63 = vrot.slane %v4845_v6, 2 }
 0x236   : > { %v4747_v16 = vrot.slane %v4746_v40, 1  ;;  %v4847_v5 = vadd.f32 %v4846_v63, %v4845_v6 }
 0x238   : > { %v4748_v2 = vadd.f32 %v4747_v16, %v4746_v40  ;;  %v4848_v11 = vrot.slane %v4847_v5, 1 }
 0x23a   : > { %v4849_v46 = vadd.f32 %v4848_v11, %v4847_v5  ;;  %4855 = vst.msk [vmem:[%s320_s14] sm:$0x1] %vm4854_vm7, %v4748_v2 }
 0x23c   : > { %4856 = vst.msk [vmem:[%s320_s14 + $0x1] sm:$0x1] %vm4854_vm7, %v4849_v46 }
 0x23d PF: > { %p6407_p4 = scmp.ge.s32.totalorder %s6537_s23, 2  ;;  %s4938_s15 = sand.u32 1, %s6517_s18  }
 0x23e   : > { %s4939_s24 = scalar_lea.sflag [#allocation4], %s4938_s15 }
 0x23f   : > { %p6404_p2 = pnand %p6407_p4, %p6619_p8 }
 0x241   : > { %6512 = dma.done.wait (!%p6404_p2), %s4939_s24, 512  }
 0x242   : > { %6514 = vsyncadd (!%p6404_p2), %s4939_s24, 4294966784  ;;  %s19_s23 = sadd.s32 1, %s6537_s23   ;;  %s8582_s18 = smov %s6521_s19 }
 0x243   : > { %p16_p3 = scmp.ge.s32.totalorder %s19_s23, 4   ;;  %s8583_s19 = smov %s6525_s20 }
 0x244   : > { %s8584_s20 = smov %s6625_s6  ;;  %s8585_s21 = smov %s6533_s22 }
 0x245   : > { %s8586_s22 = smov %s8588_s26  ;;  %18 = sbr.rel (!%p16_p3) target bundleno = 4 (0x4), region = 112 }
 0x24c   :  { %4944 = vsyncpa [#allocation4], 1 }
 0x24d   :  { %4946 = vsyncpa [#allocation4 + $0x1], 1 }

// kernel: unet_down_forward.3
= control target key start
LH: loop header
LB: loop body
LE: loop exit
PB: predicated region body
PF: predicated region fallthrough
CT: control target
= control target key end

     0   :  { %13 = vsyncpa [#allocation4], 0  ;;  %s8266_s0 = inlined_call_operand.vmem [shape: f32[2,256,8], index: 0, kind: input, shape index: {}]   ;;  %s8267_s1 = inlined_call_operand.vmem [shape: f32[2,1,2,16,8], index: 1, kind: input, shape index: {}]   ;;  %s8268_s2 = inlined_call_operand.vmem [shape: f32[1,8], index: 2, kind: input, shape index: {}]   ;;  %s8269_s3 = inlined_call_operand.vmem [shape: f32[1,8], index: 3, kind: input, shape index: {}]   ;;  %s8270_s4 = inlined_call_operand.vmem [shape: f32[9,8,8], index: 4, kind: input, shape index: {}]   ;;  %s8271_s5 = inlined_call_operand.vmem [shape: f32[2,256,8], index: 5, kind: output, shape index: {0}]   ;;  %s8272_s6 = inlined_call_operand.vmem [shape: f32[2,2,8], index: 6, kind: output, shape index: {1}]   ;;  %s8273_s7 = inlined_call_operand.hbm [shape: f32[2,1,2,16,8], index: 7, kind: output, shape index: {2}]  }
   0x1   :  { %15 = vsyncpa [#allocation4 + $0x1], 0  ;;  %s6710_s24 = smov 0   ;;  %s6712_s25 = smov 0  }
   0x2   :  { %s6714_s26 = smov 0   ;;  %s6716_s27 = smov 0  }
   0x3   :  { %s6718_s28 = smov 0   ;;  %s6720_s29 = smov 0  }
   0x4 LB: > { %s5200_s30 = sadd.s32 4294967295, %s6665_s29   ;;  %s5201_s8 = sadd.s32 4294967294, %s6665_s29   ;;  %s6665_s29 = sphi %s6720_s29, %s21_s29   ;;  %s6661_s28 = sphi %s6718_s28, %s8859_s28   ;;  %s6657_s27 = sphi %s6716_s27, %s8858_s27   ;;  %s6653_s26 = sphi %s6714_s26, %s8857_s26   ;;  %s6649_s25 = sphi %s6712_s25, %s8856_s25   ;;  %s6645_s24 = sphi %s6710_s24, %s8855_s24  }
   0x5   : > { %s33_s9 = sadd.s32 1, %s6661_s28  ;;  %s215_s10 = sadd.s32 1, %s6653_s26 }
   0x6   : > { %p35_p0 = scmp.ge.s32.totalorder %s33_s9, 2  ;;  %p225_p1 = scmp.ne.s32.totalorder %s6653_s26, %s6649_s25 }
   0x7   : > { %p226_p2 = scmp.eq.s32.totalorder %s5200_s30, 1  ;;  %p231_p3 = scmp.ne.s32.totalorder %s6649_s25, %s6645_s24 }
   0x8   : > { %s8861_s9 = smov (%p35_p0, %s33_s9), 0  ;;  %p232_p5 = scmp.eq.s32.totalorder %s5201_s8, 1 }
   0x9   : > { %p6750_p4 = por %p226_p2, %p225_p1  ;;  %s210_s12 = ssub.s32 %s6661_s28, %s8861_s9 }
   0xa   : > { %p5204_p6 = scmp.ge.s32.totalorder %s6665_s29, 1  ;;  %p213_p7 = scmp.eq.s32.totalorder %s210_s12, 0 }
   0xb   : > { %p6757_p8 = por %p232_p5, %p231_p3  ;;  %p284_p9 = scmp.lt.s32.totalorder %s6665_s29, 3 }
   0xc   : > { %s6763_s14 = scalar_select %p213_p7, %s6653_s26, %s215_s10  }
   0xd   : > { %p285_p10 = pnand %p5204_p6, %p284_p9 }
   0xf   : > { %288 = sbr.rel (%p285_p10) target bundleno = 591 (0x24f), region = 40 }
  0x16   : > { %v5217_v0 = vld [vmem:[%s8270_s4 + $0x8] sm:$0xff]  ;;  %p343_p11 = scmp.lt.s32.totalorder %s6657_s27, 1  ;;  %v5348_v1 = vld [vmem:[%s8270_s4 + $0x20] sm:$0xff]  ;;  %vm8274_vm0 = vcmask 64512   ;;  %v6866_v58 = vld [vmem:[%s8270_s4 + $0x10] sm:$0xff]  ;;  %s339_s10 = sand.u32 1, %s6649_s25  }
  0x17   : > { %5821 = vmatprep.subr.mxu1 %v5217_v0  ;;  %6021 = vmatprep.subr.mxu0 %v5348_v1  ;;  %v6775_v2 = vld [vmem:[%s8270_s4] sm:$0xff]  ;;  %v6780_v3 = vld [vmem:[%s8270_s4 + $0x28] sm:$0xff]  ;;  %s5205_s12 = sshll.u32 %s339_s10, 5  ;;  %s8213_s22 = scalar_lea.sflag [#allocation4], %s339_s10 }
  0x18   : > { %5822 = vmatpush3.msra.mxu1 %v5217_v0  ;;  %s6783_s23 = scalar_select %p343_p11, %s6657_s27, 1  ;;  %6022 = vmatpush3.msra.mxu0 %v5348_v1  ;;  %v6792_v4 = vld [vmem:[%s8268_s2] ss:$0 sm:$0xff] }
  0x19   : > { %5871 = vmatprep.subr.mxu1 %v6775_v2  ;;  %6071 = vmatprep.subr.mxu0 %v6780_v3  ;;  %v6809_v5 = vld [vmem:[%s8269_s3] ss:$0 sm:$0xff]  ;;  %s8061_s18 = scalar_lea.vmem [#allocation3], %s5205_s12  ;;  %s6667_s12 = smov [#allocation3]  }
  0x1a   : > { %s5520_s30 = sshll.u32 %s6783_s23, 8  ;;  %s5521_s8 = sshll.u32 %s6783_s23, 5 }
  0x1b   : > { %s6799_s17 = scalar_lea.vmem %s8266_s0, %s5520_s30  ;;  %s6804_s20 = scalar_lea.vmem %s8267_s1, %s5521_s8 }
  0x1c   : > { %v517_v6 = vld [vmem:[%s6804_s20] sm:$0xff]  ;;  %v518_v7 = vld [vmem:[%s6804_s20 + $0x8] sm:$0xff]  ;;  %v377_v11 = vld [vmem:[%s6799_s17 + $0x10] sm:$0xff]  ;;  %s5039_s19 = sshll.u32 %s8061_s18, 4  ;;  %s6591_s15 = sshll.u32 %s6667_s12, 4  ;;  %s8197_s19 = int_to_ptr.vmem [resolvable:$true] %s5039_s19  ;;  %s6592_s15 = int_to_ptr.vmem [resolvable:$false] %s6591_s15 }
  0x1d   : > { %v375_v8 = vld [vmem:[%s6799_s17] sm:$0xff]  ;;  %520 = vst.msk [vmem:[#allocation2 + $0x1] sm:$0xff] %vm8274_vm0, %v517_v6  ;;  %521 = vst.msk [vmem:[#allocation2 + $0x9] sm:$0xff] %vm8274_vm0, %v518_v7  ;;  %v376_v10 = vld [vmem:[%s6799_s17 + $0x8] sm:$0xff]  ;;  %v416_v14 = vmul.f32 %v6792_v4, %v377_v11  ;;  %s6587_s8 = scalar_lea.vmem %s8197_s19, 512  ;;  %s6593_s16 = scalar_lea.vmem %s6592_s15, 1024 }
  0x1e   : > { %v414_v9 = vmul.f32 %v6792_v4, %v375_v8  ;;  %v378_v12 = vld [vmem:[%s6799_s17 + $0x18] sm:$0xff]  ;;  %v415_v13 = vmul.f32 %v6792_v4, %v376_v10  ;;  %v379_v16 = vld [vmem:[%s6799_s17 + $0x20] sm:$0xff]  ;;  %v380_v17 = vld [vmem:[%s6799_s17 + $0x28] sm:$0xff]  ;;  %p6588_p12 = scmp.ne.s32.totalorder %s8197_s19, %s6587_s8  ;;  %p6594_p1 = scmp.lt.s32.totalorder %s8197_s19, %s6592_s15 }
  0x1f   : > { %v417_v15 = vmul.f32 %v6792_v4, %v378_v12  ;;  %v381_v18 = vld [vmem:[%s6799_s17 + $0x30] sm:$0xff]  ;;  %v418_v20 = vmul.f32 %v6792_v4, %v379_v16  ;;  %v419_v21 = vmul.f32 %v6792_v4, %v380_v17  ;;  %v382_v23 = vld [vmem:[%s6799_s17 + $0x38] sm:$0xff]  ;;  %v455_v25 = vadd.f32 %v6809_v5, %v416_v14  ;;  %v383_v28 = vld [vmem:[%s6799_s17 + $0x40] sm:$0xff]  ;;  %p6595_p2 = scmp.lt.s32.totalorder %s6593_s16, %s6587_s8 }
  0x20   : > { %v453_v19 = vadd.f32 %v6809_v5, %v414_v9  ;;  %v420_v22 = vmul.f32 %v6792_v4, %v381_v18  ;;  %v454_v24 = vadd.f32 %v6809_v5, %v415_v13  ;;  %v421_v27 = vmul.f32 %v6792_v4, %v382_v23  ;;  %v384_v33 = vld [vmem:[%s6799_s17 + $0x48] sm:$0xff]  ;;  %v385_v34 = vld [vmem:[%s6799_s17 + $0x50] sm:$0xff]  ;;  %v386_v35 = vld [vmem:[%s6799_s17 + $0x58] sm:$0xff]  ;;  %p6589_p13 = pnand %p6588_p12, %p6750_p4 }
  0x21   : > { %v456_v26 = vadd.f32 %v6809_v5, %v417_v15  ;;  %v457_v30 = vadd.f32 %v6809_v5, %v418_v20  ;;  %v458_v31 = vadd.f32 %v6809_v5, %v419_v21  ;;  %v487_v37 = vmax.f32 %v455_v25, 0.0  ;;  %v387_v40 = vld [vmem:[%s6799_s17 + $0x60] sm:$0xff]  ;;  %v388_v41 = vld [vmem:[%s6799_s17 + $0x68] sm:$0xff]  ;;  %v389_v42 = vld [vmem:[%s6799_s17 + $0x70] sm:$0xff]  ;;  %p6596_p3 = por %p6595_p2, %p6594_p1 }
  0x22   : > { %v485_v29 = vmax.f32 %v453_v19, 0.0  ;;  %v459_v32 = vadd.f32 %v6809_v5, %v420_v22  ;;  %v486_v36 = vmax.f32 %v454_v24, 0.0  ;;  %v460_v39 = vadd.f32 %v6809_v5, %v421_v27  ;;  %v390_v47 = vld [vmem:[%s6799_s17 + $0x78] sm:$0xff]  ;;  %v391_v63 = vld [vmem:[%s6799_s17 + $0x80] sm:$0xff]  ;;  %v392_v8 = vld [vmem:[%s6799_s17 + $0x88] sm:$0xff]  ;;  %p6590_p0 = pneg %p6589_p13 }
  0x23   : > { %v488_v38 = vmax.f32 %v456_v26, 0.0  ;;  %v489_v43 = vmax.f32 %v457_v30, 0.0  ;;  %v490_v44 = vmax.f32 %v458_v31, 0.0  ;;  %v422_v46 = vmul.f32 %v6792_v4, %v383_v28  ;;  %524 = vst.msk [vmem:[#allocation2 + $0x21] sm:$0xff] %vm8274_vm0, %v487_v37  ;;  %v393_v9 = vld [vmem:[%s6799_s17 + $0x90] sm:$0xff]  ;;  %v394_v10 = vld [vmem:[%s6799_s17 + $0x98] sm:$0xff] }
  0x24   : > { %522 = vst.msk [vmem:[#allocation2 + $0x11] sm:$0xff] %vm8274_vm0, %v485_v29  ;;  %v491_v45 = vmax.f32 %v459_v32, 0.0  ;;  %v1169_v48 = vld [vmem:[#allocation2 + $0x1] sm:$0xff]  ;;  %v1170_v49 = vld [vmem:[#allocation2 + $0x9] sm:$0xff]  ;;  %523 = vst.msk [vmem:[#allocation2 + $0x19] sm:$0xff] %vm8274_vm0, %v486_v36  ;;  %v492_v50 = vmax.f32 %v460_v39, 0.0  ;;  %v423_v51 = vmul.f32 %v6792_v4, %v384_v33  ;;  %v424_v52 = vmul.f32 %v6792_v4, %v385_v34  ;;  %p6597_p5 = pnand %p6596_p3, %p6590_p0 }
  0x25   : > { %525 = vst.msk [vmem:[#allocation2 + $0x29] sm:$0xff] %vm8274_vm0, %v488_v38  ;;  %v425_v53 = vmul.f32 %v6792_v4, %v386_v35  ;;  %5823 = vmatprep.mubr.msk.f32.mxu1 %vm8274_vm0, %v1169_v48  ;;  %526 = vst.msk [vmem:[#allocation2 + $0x31] sm:$0xff] %vm8274_vm0, %v489_v43  ;;  %v461_v54 = vadd.f32 %v6809_v5, %v422_v46  ;;  %v426_v55 = vmul.f32 %v6792_v4, %v387_v40  ;;  %v395_v15 = vld [vmem:[%s6799_s17 + $0xa0] sm:$0xff]  ;;  %v396_v16 = vld [vmem:[%s6799_s17 + $0xa8] sm:$0xff] }
  0x26   : > { %527 = vst.msk [vmem:[#allocation2 + $0x39] sm:$0xff] %vm8274_vm0, %v490_v44  ;;  %528 = vst.msk [vmem:[#allocation2 + $0x41] sm:$0xff] %vm8274_vm0, %v491_v45  ;;  %v427_v56 = vmul.f32 %v6792_v4, %v388_v41  ;;  %v428_v57 = vmul.f32 %v6792_v4, %v389_v42  ;;  %5824 = vmatmul.mubr.msk.f32.vlgmr.msra.gmra.mrb[0].mxu1 %vm8274_vm0, %v1170_v49  ;;  %v462_v59 = vadd.f32 %v6809_v5, %v423_v51  ;;  %v397_v26 = vld [vmem:[%s6799_s17 + $0xb0] sm:$0xff]  ;;  %v398_v41 = vld [vmem:[%s6799_s17 + $0xb8] sm:$0xff] }
  0x27   : > { %529 = vst.msk [vmem:[#allocation2 + $0x49] sm:$0xff] %vm8274_vm0, %v492_v50  ;;  %v463_v60 = vadd.f32 %v6809_v5, %v424_v52  ;;  %v464_v61 = vadd.f32 %v6809_v5, %v425_v53  ;;  %v429_v62 = vmul.f32 %v6792_v4, %v390_v47  ;;  %5872 = vmatpush3.msra.mxu1 %v6775_v2  ;;  %v493_v0 = vmax.f32 %v461_v54, 0.0  ;;  %v5215_v2 = vld [vmem:[%s6804_s20 + $0x10] sm:$0xff]  ;;  %v399_v42 = vld [vmem:[%s6799_s17 + $0xc0] sm:$0xff]  ;;  %v400_v46 = vld [vmem:[%s6799_s17 + $0xc8] sm:$0xff] }
  0x28   : > { %v465_v1 = vadd.f32 %v6809_v5, %v426_v55  ;;  %v466_v6 = vadd.f32 %v6809_v5, %v427_v56  ;;  %v467_v7 = vadd.f32 %v6809_v5, %v428_v57  ;;  %v494_v11 = vmax.f32 %v462_v59, 0.0  ;;  %5921 = vmatprep.subr.mxu1 %v6866_v58  ;;  %557 = vst.msk [vmem:[#allocation2 + $0x111] sm:$0xff] %vm8274_vm0, %v5215_v2  ;;  %v6906_v30 = vld [vmem:[%s8270_s4 + $0x30] sm:$0xff]  ;;  %v402_v51 = vld [vmem:[%s6799_s17 + $0xd8] sm:$0xff]  ;;  %v403_v54 = vld [vmem:[%s6799_s17 + $0xe0] sm:$0xff] }
  0x29   : > { %v495_v12 = vmax.f32 %v463_v60, 0.0  ;;  %v496_v13 = vmax.f32 %v464_v61, 0.0  ;;  %v468_v14 = vadd.f32 %v6809_v5, %v429_v62  ;;  %530 = vst.msk [vmem:[#allocation2 + $0x51] sm:$0xff] %vm8274_vm0, %v493_v0  ;;  %v430_v20 = vmul.f32 %v6792_v4, %v391_v63  ;;  %v401_v50 = vld [vmem:[%s6799_s17 + $0xd0] sm:$0xff]  ;;  %v404_v55 = vld [vmem:[%s6799_s17 + $0xe8] sm:$0xff] }
  0x2a   : > { %v497_v17 = vmax.f32 %v465_v1, 0.0  ;;  %v498_v18 = vmax.f32 %v466_v6, 0.0  ;;  %v499_v19 = vmax.f32 %v467_v7, 0.0  ;;  %531 = vst.msk [vmem:[#allocation2 + $0x59] sm:$0xff] %vm8274_vm0, %v494_v11  ;;  %v431_v23 = vmul.f32 %v6792_v4, %v392_v8  ;;  %v1173_v28 = vld [vmem:[#allocation2 + $0x21] sm:$0xff] }
  0x2b   : > { %v1171_v21 = vld [vmem:[#allocation2 + $0x11] sm:$0xff]  ;;  %532 = vst.msk [vmem:[#allocation2 + $0x61] sm:$0xff] %vm8274_vm0, %v495_v12  ;;  %533 = vst.msk [vmem:[#allocation2 + $0x69] sm:$0xff] %vm8274_vm0, %v496_v13  ;;  %v500_v22 = vmax.f32 %v468_v14, 0.0  ;;  %v432_v24 = vmul.f32 %v6792_v4, %v393_v9  ;;  %v433_v25 = vmul.f32 %v6792_v4, %v394_v10  ;;  %v1172_v27 = vld [vmem:[#allocation2 + $0x19] sm:$0xff]  ;;  %v469_v29 = vadd.f32 %v6809_v5, %v430_v20 }
  0x2c   : > { %5826 = vmatprep.mubr.msk.f32.mxu1 %vm8274_vm0, %v1171_v21  ;;  %6023 = vmatprep.mubr.msk.f32.mxu0 %vm8274_vm0, %v1171_v21  ;;  %534 = vst.msk [vmem:[#allocation2 + $0x71] sm:$0xff] %vm8274_vm0, %v497_v17  ;;  %535 = vst.msk [vmem:[#allocation2 + $0x79] sm:$0xff] %vm8274_vm0, %v498_v18  ;;  %v434_v31 = vmul.f32 %v6792_v4, %v395_v15  ;;  %v435_v32 = vmul.f32 %v6792_v4, %v396_v16  ;;  %v1174_v36 = vld [vmem:[#allocation2 + $0x29] sm:$0xff]  ;;  %v1175_v43 = vld [vmem:[#allocation2 + $0x31] sm:$0xff]  ;;  %v559_v16 = vlaneseq }
  0x2d   : > { %536 = vst.msk [vmem:[#allocation2 + $0x81] sm:$0xff] %vm8274_vm0, %v499_v19  ;;  %5827 = vmatmul.mubr.msk.f32.gmra.mrb[2].mxu1 %vm8274_vm0, %v1172_v27  ;;  %6024 = vmatmul.mubr.msk.f32.vlgmr.msra.gmra.mrb[0].mxu0 %vm8274_vm0, %v1172_v27  ;;  %537 = vst.msk [vmem:[#allocation2 + $0x89] sm:$0xff] %vm8274_vm0, %v500_v22  ;;  %v470_v33 = vadd.f32 %v6809_v5, %v431_v23  ;;  %v471_v34 = vadd.f32 %v6809_v5, %v432_v24  ;;  %v501_v37 = vmax.f32 %v469_v29, 0.0  ;;  %v1176_v56 = vld [vmem:[#allocation2 + $0x39] sm:$0xff]  ;;  %v1177_v60 = vld [vmem:[#allocation2 + $0x41] sm:$0xff] }
  0x2e   : > { %v472_v35 = vadd.f32 %v6809_v5, %v433_v25  ;;  %6072 = vmatpush3.msra.mxu0 %v6780_v3  ;;  %5829 = vmatprep.mubr.msk.f32.mxu1 %vm8274_vm0, %v1173_v28  ;;  %v473_v38 = vadd.f32 %v6809_v5, %v434_v31  ;;  %v474_v39 = vadd.f32 %v6809_v5, %v435_v32  ;;  %v1178_v11 = vld [vmem:[#allocation2 + $0x49] sm:$0xff]  ;;  %v6970_v23 = vshrl.u32 %v559_v16, 7  ;;  %v406_v25 = vld [vmem:[%s6799_s17 + $0xf8] sm:$0xff] }
  0x2f   : > { %v436_v40 = vmul.f32 %v6792_v4, %v397_v26  ;;  %6026 = vmatprep.mubr.msk.f32.mxu0 %vm8274_vm0, %v1173_v28  ;;  %6121 = vmatprep.subr.mxu0 %v6906_v30  ;;  %v502_v3 = vmax.f32 %v470_v33, 0.0  ;;  %v503_v44 = vmax.f32 %v471_v34, 0.0  ;;  %538 = vst.msk [vmem:[#allocation2 + $0x91] sm:$0xff] %vm8274_vm0, %v501_v37  ;;  %v437_v52 = vmul.f32 %v6792_v4, %v398_v41  ;;  %v405_v24 = vld [vmem:[%s6799_s17 + $0xf0] sm:$0xff]  ;;  %s8057_s17 = scalar_lea.vmem %s8271_s5, %s5520_s30  ;;  %s5523_s30 = sshll.u32 %s6657_s27, 9 }
  0x30   : > { %v504_v45 = vmax.f32 %v472_v35, 0.0  ;;  %v505_v47 = vmax.f32 %v473_v38, 0.0  ;;  %v506_v48 = vmax.f32 %v474_v39, 0.0  ;;  %v438_v53 = vmul.f32 %v6792_v4, %v399_v42  ;;  %v1179_v15 = vld [vmem:[#allocation2 + $0x51] sm:$0xff]  ;;  %v7000_v42 = vld [vmem:[#allocation2 + $0x1a] sm:$0xff]  ;;  %s8195_s21 = scalar_lea.hbm %s8273_s7, %s5523_s30 }
  0x31   : > { %v475_v49 = vadd.f32 %v6809_v5, %v436_v40  ;;  %5830 = vmatmul.mubr.msk.f32.gmra.mrb[4].mxu1 %vm8274_vm0, %v1174_v36  ;;  %6027 = vmatmul.mubr.msk.f32.gmra.mrb[2].mxu0 %vm8274_vm0, %v1174_v36  ;;  %539 = vst.msk [vmem:[#allocation2 + $0x99] sm:$0xff] %vm8274_vm0, %v502_v3  ;;  %540 = vst.msk [vmem:[#allocation2 + $0xa1] sm:$0xff] %vm8274_vm0, %v503_v44  ;;  %v439_v59 = vmul.f32 %v6792_v4, %v400_v46  ;;  %v1180_v21 = vld [vmem:[#allocation2 + $0x59] sm:$0xff]  ;;  %v561_v28 = vadd.s32 8, %v6970_v23  ;;  %v8370_v41 = vmov 0 }
  0x32   : > { %541 = vst.msk [vmem:[#allocation2 + $0xa9] sm:$0xff] %vm8274_vm0, %v504_v45  ;;  %5832 = vmatprep.mubr.msk.f32.mxu1 %vm8274_vm0, %v1175_v43  ;;  %6029 = vmatprep.mubr.msk.f32.mxu0 %vm8274_vm0, %v1175_v43  ;;  %542 = vst.msk [vmem:[#allocation2 + $0xb1] sm:$0xff] %vm8274_vm0, %v505_v47  ;;  %v476_v61 = vadd.f32 %v6809_v5, %v437_v52  ;;  %v477_v62 = vadd.f32 %v6809_v5, %v438_v53  ;;  %v1181_v22 = vld [vmem:[#allocation2 + $0x61] sm:$0xff]  ;;  %v1182_v26 = vld [vmem:[#allocation2 + $0x69] sm:$0xff]  ;;  %v563_v35 = vadd.s32 24, %v6970_v23  ;;  %v8372_v47 = vmov 0 }
  0x33   : > { %543 = vst.msk [vmem:[#allocation2 + $0xb9] sm:$0xff] %vm8274_vm0, %v506_v48  ;;  %v507_v57 = vmax.f32 %v475_v49, 0.0  ;;  %v440_v63 = vmul.f32 %v6792_v4, %v401_v50  ;;  %v441_v0 = vmul.f32 %v6792_v4, %v402_v51  ;;  %v478_v1 = vadd.f32 %v6809_v5, %v439_v59  ;;  %v1183_v27 = vld [vmem:[#allocation2 + $0x71] sm:$0xff]  ;;  %v1184_v32 = vld [vmem:[#allocation2 + $0x79] sm:$0xff]  ;;  %v7019_v51 = vld [vmem:[#allocation2 + $0x22] sm:$0xff] }
  0x34   : > { %v442_v6 = vmul.f32 %v6792_v4, %v403_v54  ;;  %v443_v7 = vmul.f32 %v6792_v4, %v404_v55  ;;  %v508_v8 = vmax.f32 %v476_v61, 0.0  ;;  %v509_v9 = vmax.f32 %v477_v62, 0.0  ;;  %v1185_v33 = vld [vmem:[#allocation2 + $0x81] sm:$0xff]  ;;  %v6994_v40 = vld [vmem:[#allocation2 + $0x12] sm:$0xff]  ;;  %v7016_v48 = vld [vmem:[#allocation2 + $0x2a] sm:$0xff] }
  0x35   : > { %544 = vst.msk [vmem:[#allocation2 + $0xc1] sm:$0xff] %vm8274_vm0, %v507_v57  ;;  %5833 = vmatmul.mubr.msk.f32.gmra.mrb[6].mxu1 %vm8274_vm0, %v1176_v56  ;;  %6030 = vmatmul.mubr.msk.f32.gmra.mrb[4].mxu0 %vm8274_vm0, %v1176_v56  ;;  %v479_v10 = vadd.f32 %v6809_v5, %v440_v63  ;;  %v510_v12 = vmax.f32 %v478_v1, 0.0  ;;  %v480_v13 = vadd.f32 %v6809_v5, %v441_v0  ;;  %v603_v34 = vand.u32 15, %v561_v28  ;;  %v7024_v52 = vld [vmem:[%s8270_s4 + $0x38] sm:$0xff]  ;;  %v7055_v1 = vld [vmem:[#allocation2 + $0x42] sm:$0xff] }
  0x36   : > { %5835 = vmatprep.mubr.msk.f32.mxu1 %vm8274_vm0, %v1177_v60  ;;  %6032 = vmatprep.mubr.msk.f32.mxu0 %vm8274_vm0, %v1177_v60  ;;  %v481_v14 = vadd.f32 %v6809_v5, %v442_v6  ;;  %545 = vst.msk [vmem:[#allocation2 + $0xc9] sm:$0xff] %vm8274_vm0, %v508_v8  ;;  %546 = vst.msk [vmem:[#allocation2 + $0xd1] sm:$0xff] %vm8274_vm0, %v509_v9  ;;  %v482_v17 = vadd.f32 %v6809_v5, %v443_v7  ;;  %v565_v38 = vadd.s32 40, %v6970_v23  ;;  %v1187_v39 = vld [vmem:[#allocation2 + $0x91] sm:$0xff]  ;;  %v8374_v57 = vmov 0  ;;  %v7041_v59 = vld [vmem:[#allocation2 + $0x3a] sm:$0xff] }
  0x37   : > { %v511_v2 = vmax.f32 %v479_v10, 0.0  ;;  %547 = vst.msk [vmem:[#allocation2 + $0xd9] sm:$0xff] %vm8274_vm0, %v510_v12  ;;  %v512_v18 = vmax.f32 %v480_v13, 0.0  ;;  %v444_v29 = vmul.f32 %v6792_v4, %v405_v24  ;;  %v445_v31 = vmul.f32 %v6792_v4, %v406_v25  ;;  %v1186_v4 = vld [vmem:[#allocation2 + $0x89] sm:$0xff]  ;;  %v7033_v55 = vld [vmem:[#allocation2 + $0x32] sm:$0xff] }
  0x38   : > { %v513_v19 = vmax.f32 %v481_v14, 0.0  ;;  %v514_v20 = vmax.f32 %v482_v17, 0.0  ;;  %vm6996_vm1 = vcmp.lt.s32.totalorder %v603_v34, 15  ;;  %v1188_v44 = vld [vmem:[#allocation2 + $0x99] sm:$0xff]  ;;  %v1189_v46 = vld [vmem:[#allocation2 + $0xa1] sm:$0xff]  ;;  %v631_v49 = vand.u32 15, %v565_v38 }
  0x39   : > { %5836 = vmatmul.mubr.msk.f32.gmra.mrb[8].mxu1 %vm8274_vm0, %v1178_v11  ;;  %6033 = vmatmul.mubr.msk.f32.gmra.mrb[6].mxu0 %vm8274_vm0, %v1178_v11  ;;  %548 = vst.msk [vmem:[#allocation2 + $0xe1] sm:$0xff] %vm8274_vm0, %v511_v2  ;;  %549 = vst.msk [vmem:[#allocation2 + $0xe9] sm:$0xff] %vm8274_vm0, %v512_v18  ;;  %v483_v36 = vadd.f32 %v6809_v5, %v444_v29  ;;  %v484_v37 = vadd.f32 %v6809_v5, %v445_v31  ;;  %v8371_v41 = vsel %vm6996_vm1, 4294967295, %v8370_v41  ;;  %v1190_v53 = vld [vmem:[#allocation2 + $0xa9] sm:$0xff]  ;;  %v1191_v56 = vld [vmem:[#allocation2 + $0xb1] sm:$0xff]  ;;  %v8376_v6 = vmov 0 }
  0x3a   : > { %5838 = vmatprep.mubr.msk.f32.mxu1 %vm8274_vm0, %v1179_v15  ;;  %6035 = vmatprep.mubr.msk.f32.mxu0 %vm8274_vm0, %v1179_v15  ;;  %550 = vst.msk [vmem:[#allocation2 + $0xf1] sm:$0xff] %vm8274_vm0, %v513_v19  ;;  %551 = vst.msk [vmem:[#allocation2 + $0xf9] sm:$0xff] %vm8274_vm0, %v514_v20  ;;  %v617_v5 = vand.u32 15, %v563_v35  ;;  %v3167_v45 = vsel %vm6996_vm1, %v7000_v42, 0.0  ;;  %v567_v50 = vadd.s32 56, %v6970_v23  ;;  %vm7037_vm3 = vcmp.lt.s32.totalorder %v631_v49, 15 }
  0x3b   : > { %v515_v43 = vmax.f32 %v483_v36, 0.0  ;;  %v516_v3 = vmax.f32 %v484_v37, 0.0  ;;  %v8375_v57 = vsel %vm7037_vm3, 4294967295, %v8374_v57  ;;  %v569_v60 = vadd.s32 72, %v6970_v23  ;;  %v5216_v61 = vld [vmem:[%s6804_s20 + $0x18] sm:$0xff]  ;;  %v7061_v7 = vld [vmem:[#allocation2 + $0x4a] sm:$0xff] }
  0x3c   : > { %vm7012_vm2 = vcmp.lt.s32.totalorder %v617_v5, 15  ;;  %558 = vst.msk [vmem:[#allocation2 + $0x119] sm:$0xff] %vm8274_vm0, %v5216_v61  ;;  %v1192_v62 = vld [vmem:[#allocation2 + $0xb9] sm:$0xff]  ;;  %v3171_v63 = vsel %vm7037_vm3, %v7041_v59, 0.0  ;;  %v1193_v0 = vld [vmem:[#allocation2 + $0xc1] sm:$0xff]  ;;  %v571_v9 = vadd.s32 88, %v6970_v23 }
  0x3d   : > { %5839 = vmatmul.mubr.msk.f32.gmra.mrb[10].mxu1 %vm8274_vm0, %v1180_v21  ;;  %6036 = vmatmul.mubr.msk.f32.gmra.mrb[8].mxu0 %vm8274_vm0, %v1180_v21  ;;  %552 = vst.msk [vmem:[#allocation2 + $0x101] sm:$0xff] %vm8274_vm0, %v515_v43  ;;  %553 = vst.msk [vmem:[#allocation2 + $0x109] sm:$0xff] %vm8274_vm0, %v516_v3  ;;  %v8373_v47 = vsel %vm7012_vm2, 4294967295, %v8372_v47  ;;  %v3169_v54 = vsel %vm7012_vm2, %v7016_v48, 0.0  ;;  %v659_v8 = vand.u32 15, %v569_v60  ;;  %v1194_v10 = vld [vmem:[#allocation2 + $0xc9] sm:$0xff] }
  0x3e   : > { %5841 = vmatprep.mubr.msk.f32.mxu1 %vm8274_vm0, %v1181_v22  ;;  %6038 = vmatprep.mubr.msk.f32.mxu0 %vm8274_vm0, %v1181_v22  ;;  %v1195_v12 = vld [vmem:[#allocation2 + $0xd1] sm:$0xff]  ;;  %v8378_v14 = vmov 0  ;;  %v7078_v15 = vld [vmem:[#allocation2 + $0x5a] sm:$0xff]  ;;  %v673_v16 = vand.u32 15, %v571_v9  ;;  %v573_v2 = vadd.s32 104, %v6970_v23  ;;  %v7093_v20 = vld [vmem:[#allocation2 + $0x62] sm:$0xff] }
  0x3f   : > { %v7072_v13 = vld [vmem:[#allocation2 + $0x52] sm:$0xff]  ;;  %vm7074_vm5 = vcmp.lt.s32.totalorder %v659_v8, 15  ;;  %v8382_v21 = vmov 0  ;;  %v7099_v22 = vld [vmem:[#allocation2 + $0x6a] sm:$0xff]  ;;  %v575_v25 = vadd.s32 120, %v6970_v23  ;;  %v7124_v34 = vld [vmem:[#allocation2 + $0x7a] sm:$0xff] }
  0x40   : > { %v8379_v14 = vsel %vm7074_vm5, 4294967295, %v8378_v14  ;;  %v7086_v17 = vld [vmem:[#allocation2 + $0xd9] sm:$0xff]  ;;  %v3175_v18 = vsel %vm7074_vm5, %v7078_v15, 0.0  ;;  %v7091_v19 = vld [vmem:[#allocation2 + $0xe1] sm:$0xff]  ;;  %vm7095_vm6 = vcmp.lt.s32.totalorder %v673_v16, 15  ;;  %v687_v24 = vand.u32 15, %v573_v2 }
  0x41   : > { %5842 = vmatmul.mubr.msk.f32.gmra.mrb[12].mxu1 %vm8274_vm0, %v1182_v26  ;;  %6039 = vmatmul.mubr.msk.f32.gmra.mrb[10].mxu0 %vm8274_vm0, %v1182_v26  ;;  %8380 = vst [vmem:[#allocation6_spill] sm:$0xff] %v7086_v17  ;;  %8381 = vst [vmem:[#allocation7_spill] sm:$0xff] %v7091_v19  ;;  %v8383_v21 = vsel %vm7095_vm6, 4294967295, %v8382_v21  ;;  %v596_v26 = vand.u32 15, %v6970_v23  ;;  %v7111_v28 = vld [vmem:[#allocation2 + $0xe9] sm:$0xff]  ;;  %v3177_v29 = vsel %vm7095_vm6, %v7099_v22, 0.0 }
  0x42   : > { %5844 = vmatprep.mubr.msk.f32.mxu1 %vm8274_vm0, %v1183_v27  ;;  %6041 = vmatprep.mubr.msk.f32.mxu0 %vm8274_vm0, %v1183_v27  ;;  %v562_v27 = vadd.s32 16, %v6970_v23  ;;  %8384 = vst [vmem:[#allocation8_spill] sm:$0xff] %v7111_v28  ;;  %v7116_v31 = vld [vmem:[#allocation2 + $0xf1] sm:$0xff]  ;;  %vm7120_vm7 = vcmp.lt.s32.totalorder %v687_v24, 15  ;;  %v701_v35 = vand.u32 15, %v575_v25  ;;  %v577_v36 = vadd.s32 136, %v6970_v23 }
  0x43   : > { %8385 = vst [vmem:[#allocation9_spill] sm:$0xff] %v7116_v31  ;;  %vm7127_vm8 = vcmp.gt.s32.totalorder %v596_v26, 0  ;;  %v8388_v37 = vmov 0  ;;  %v7139_v5 = vld [vmem:[#allocation2 + $0xf9] sm:$0xff]  ;;  %v3179_v43 = vsel %vm7120_vm7, %v7124_v34, 0.0  ;;  %v1041_v61 = vld [vmem:[#allocation2 + $0x8] sm:$0xff] }
  0x44   : > { %v8389_v37 = vsel %vm7127_vm8, 4294967295, %v8388_v37  ;;  %v610_v38 = vand.u32 15, %v562_v27  ;;  %8391 = vst [vmem:[#allocation11_spill] sm:$0xff] %v7139_v5  ;;  %vm7148_vm9 = vcmp.lt.s32.totalorder %v701_v35, 15  ;;  %v715_v49 = vand.u32 15, %v577_v36  ;;  %v7183_v9 = vld [vmem:[#allocation2 + $0x9a] sm:$0xff] }
  0x45   : > { %5845 = vmatmul.mubr.msk.f32.gmra.mrb[14].mxu1 %vm8274_vm0, %v1184_v32  ;;  %6042 = vmatmul.mubr.msk.f32.gmra.mrb[12].mxu0 %vm8274_vm0, %v1184_v32  ;;  %v7118_v32 = vld [vmem:[#allocation2 + $0x72] sm:$0xff]  ;;  %8390 = vst [vmem:[#allocation10_spill] sm:$0xff] %v8389_v37  ;;  %v8399_v8 = vmov 0  ;;  %8401 = vst [vmem:[#allocation15_spill] sm:$0xff] %v7183_v9  ;;  %v7190_v16 = vld [vmem:[#allocation2 + $0x20] sm:$0xff]  ;;  %v8408_v36 = vmov 0 }
  0x46   : > { %5847 = vmatprep.mubr.msk.f32.mxu1 %vm8274_vm0, %v1185_v33  ;;  %6044 = vmatprep.mubr.msk.f32.mxu0 %vm8274_vm0, %v1185_v33  ;;  %v8386_v33 = vmov 0  ;;  %vm7155_vm10 = vcmp.gt.s32.totalorder %v610_v38, 0  ;;  %vm7179_vm11 = vcmp.lt.s32.totalorder %v715_v49, 15  ;;  %8405 = vst [vmem:[#allocation17_spill] sm:$0xff] %v7190_v16  ;;  %v7198_v24 = vld [vmem:[%s8270_s4 + $0x18] sm:$0xff]  ;;  %v7215_v35 = vld [vmem:[#allocation2 + $0xa2] sm:$0xff] }
  0x47   : > { %v8387_v33 = vsel %vm7120_vm7, 4294967295, %v8386_v33  ;;  %v8400_v8 = vsel %vm7179_vm11, 4294967295, %v8399_v8  ;;  %v7206_v26 = vld [vmem:[#allocation2 + $0x18] sm:$0xff]  ;;  %v3183_v27 = vsel %vm7179_vm11, %v7183_v9, 0.0  ;;  %8407 = vst [vmem:[#allocation19_spill] sm:$0xff] %v7215_v35  ;;  %v570_v49 = vadd.s32 80, %v6970_v23 }
  0x48   : > { %8406 = vst [vmem:[#allocation18_spill] sm:$0xff] %v7206_v26  ;;  %v8430_v25 = vmov 0  ;;  %v587_v60 = vadd.s32 216, %v6970_v23  ;;  %v7475_v37 = vld [vmem:[#allocation2 + $0xb0] sm:$0xff] }
  0x49   : > { %5848 = vmatmul.mubr.msk.f32.gmra.mrb[16].mxu1 %vm8274_vm0, %v1186_v4  ;;  %6045 = vmatmul.mubr.msk.f32.gmra.mrb[14].mxu0 %vm8274_vm0, %v1186_v4  ;;  %v1040_v4 = vld [vmem:[#allocation2] sm:$0xff] }
  0x4a   : > { %5850 = vmatprep.mubr.msk.f32.mxu1 %vm8274_vm0, %v1187_v39  ;;  %6073 = vmatprep.mubr.msk.f32.mxu0 %vm8274_vm0, %v6994_v40  ;;  %v564_v39 = vadd.s32 32, %v6970_v23  ;;  %v1136_v3 = vsel %vm7127_vm8, %v1040_v4, 0.0  ;;  %v7221_v4 = vld [vmem:[#allocation2 + $0xaa] sm:$0xff] }
  0x4b   : > { %8411 = vst [vmem:[#allocation21_spill] sm:$0xff] %v7221_v4 }
  0x4d   : > { %5851 = vmatmul.mubr.msk.f32.gmra.mrb[18].mxu1 %vm8274_vm0, %v1188_v44  ;;  %6074 = vmatmul.mubr.msk.f32.vlgmr.msra.gmra.mrb[0].mxu0 %vm8274_vm0, %v3167_v45  ;;  %v7146_v44 = vld [vmem:[#allocation2 + $0x82] sm:$0xff]  ;;  %v8392_v45 = vmov 0 }
  0x4e   : > { %6122 = vmatpush3.msra.mxu0 %v6906_v30  ;;  %5853 = vmatprep.mubr.msk.f32.mxu1 %vm8274_vm0, %v1189_v46  ;;  %v645_v30 = vand.u32 15, %v567_v50  ;;  %v8393_v45 = vsel %vm7148_vm9, 4294967295, %v8392_v45  ;;  %v7152_v46 = vld [vmem:[#allocation2 + $0x8a] sm:$0xff]  ;;  %v579_v50 = vadd.s32 152, %v6970_v23 }
  0x4f   : > { %6076 = vmatprep.mubr.msk.f32.mxu0 %vm8274_vm0, %v7019_v51  ;;  %6171 = vmatprep.subr.mxu0 %v7024_v52 }
  0x50   : > { %vm7057_vm4 = vcmp.lt.s32.totalorder %v645_v30, 15  ;;  %v566_v30 = vadd.s32 48, %v6970_v23 }
  0x51   : > { %5854 = vmatmul.mubr.msk.f32.gmra.mrb[20].mxu1 %vm8274_vm0, %v1190_v53  ;;  %6077 = vmatmul.mubr.msk.f32.gmra.mrb[2].mxu0 %vm8274_vm0, %v3169_v54  ;;  %v8377_v6 = vsel %vm7057_vm4, 4294967295, %v8376_v6  ;;  %v3173_v11 = vsel %vm7057_vm4, %v7061_v7, 0.0  ;;  %v8394_v53 = vmov 0  ;;  %v7159_v54 = vld [vmem:[#allocation2 + $0x10] sm:$0xff] }
  0x52   : > { %5856 = vmatprep.mubr.msk.f32.mxu1 %vm8274_vm0, %v1191_v56  ;;  %6079 = vmatprep.mubr.msk.f32.mxu0 %vm8274_vm0, %v7033_v55  ;;  %v8395_v53 = vsel %vm7155_vm10, 4294967295, %v8394_v53  ;;  %8397 = vst [vmem:[#allocation13_spill] sm:$0xff] %v7159_v54  ;;  %v624_v56 = vand.u32 15, %v564_v39  ;;  %v638_v2 = vand.u32 15, %v566_v30  ;;  %v583_v39 = vadd.s32 184, %v6970_v23 }
  0x53   : > { %8396 = vst [vmem:[#allocation12_spill] sm:$0xff] %v8395_v53  ;;  %v588_v53 = vadd.s32 224, %v6970_v23 }
  0x54   : > { %vm7186_vm12 = vcmp.gt.s32.totalorder %v624_v56, 0  ;;  %vm7224_vm14 = vcmp.gt.s32.totalorder %v638_v2, 0  ;;  %v7241_v56 = vld [vmem:[#allocation2 + $0x28] sm:$0xff]  ;;  %v585_v2 = vadd.s32 200, %v6970_v23 }
  0x55   : > { %5857 = vmatmul.mubr.msk.f32.gmra.mrb[22].mxu1 %vm8274_vm0, %v1192_v62  ;;  %6080 = vmatmul.mubr.msk.f32.gmra.mrb[4].mxu0 %vm8274_vm0, %v3171_v63  ;;  %v3181_v62 = vsel %vm7148_vm9, %v7152_v46, 0.0  ;;  %v1138_v63 = vsel %vm7155_vm10, %v7159_v54, 0.0  ;;  %8415 = vst [vmem:[#allocation23_spill] sm:$0xff] %v7241_v56  ;;  %v8446_v54 = vmov 0 }
  0x56   : > { %5859 = vmatprep.mubr.msk.f32.mxu1 %vm8274_vm0, %v1193_v0  ;;  %6082 = vmatprep.mubr.msk.f32.mxu0 %vm8274_vm0, %v7055_v1  ;;  %v7177_v0 = vld [vmem:[#allocation2 + $0x92] sm:$0xff] }
  0x57   : > { %8398 = vst [vmem:[#allocation14_spill] sm:$0xff] %v7177_v0 }
  0x59   : > { %5860 = vmatmul.mubr.msk.f32.gmra.mrb[24].mxu1 %vm8274_vm0, %v1194_v10  ;;  %6083 = vmatmul.mubr.msk.f32.gmra.mrb[6].mxu0 %vm8274_vm0, %v3173_v11  ;;  %v729_v10 = vand.u32 15, %v579_v50  ;;  %v581_v11 = vadd.s32 168, %v6970_v23  ;;  %v572_v50 = vadd.s32 96, %v6970_v23 }
  0x5a   : > { %5862 = vmatprep.mubr.msk.f32.mxu1 %vm8274_vm0, %v1195_v12  ;;  %6085 = vmatprep.mubr.msk.f32.mxu0 %vm8274_vm0, %v7072_v13  ;;  %v8402_v12 = vmov 0 }
  0x5b   : > { %v8403_v12 = vsel %vm7186_vm12, 4294967295, %v8402_v12  ;;  %vm7217_vm13 = vcmp.lt.s32.totalorder %v729_v10, 15  ;;  %v743_v38 = vand.u32 15, %v581_v11  ;;  %v7255_v10 = vld [vmem:[#allocation2 + $0xba] sm:$0xff]  ;;  %v757_v11 = vand.u32 15, %v583_v39 }
  0x5c   : > { %8404 = vst [vmem:[#allocation16_spill] sm:$0xff] %v8403_v12  ;;  %v8409_v36 = vsel %vm7217_vm13, 4294967295, %v8408_v36  ;;  %v3185_v30 = vsel %vm7217_vm13, %v7221_v4, 0.0  ;;  %8420 = vst [vmem:[#allocation26_spill] sm:$0xff] %v7255_v10  ;;  %vm8424_vm13 = vcmask 64512   ;;  %v7274_v39 = vld [vmem:[#allocation2 + $0x38] sm:$0xff] }
  0x5d   : > { %5863 = vmatmul.mubr.msk.f32.gmra.mrb[26].mxu1 %vm8274_vm0, %v7086_v17  ;;  %6086 = vmatmul.mubr.msk.f32.gmra.mrb[8].mxu0 %vm8274_vm0, %v3175_v18  ;;  %v568_v18 = vadd.s32 64, %v6970_v23  ;;  %8410 = vst [vmem:[#allocation20_spill] sm:$0xff] %v8409_v36  ;;  %vm7251_vm15 = vcmp.lt.s32.totalorder %v743_v38, 15  ;;  %vm8425_vm11 = vmmov %vm8424_vm13  ;;  %v771_v38 = vand.u32 15, %v585_v2  ;;  %v7307_v2 = vld [vmem:[#allocation2 + $0x48] sm:$0xff]  ;;  %v8442_v17 = vmov 0 }
  0x5e   : > { %5865 = vmatprep.mubr.msk.f32.mxu1 %vm8274_vm0, %v7091_v19  ;;  %6088 = vmatprep.mubr.msk.f32.mxu0 %vm8274_vm0, %v7093_v20  ;;  %vm8426_vm9 = vmmov %vm8425_vm11  ;;  %8428 = vst [vmem:[#allocation28_spill] sm:$0xff] %v7274_v39  ;;  %v574_v19 = vadd.s32 112, %v6970_v23  ;;  %v8465_v4 = vmov 0  ;;  %v8475_v36 = vmov 0  ;;  %v7530_v12 = vld [vmem:[#allocation2 + $0xd0] sm:$0xff] }
  0x5f   : > { %vm8427_vm7 = vmmov %vm8426_vm9  ;;  %8440 = vst [vmem:[#allocation33_spill] sm:$0xff] %v7307_v2 }
  0x60   : > { %vm8439_vm6 = vmmov %vm8426_vm9 }
  0x61   : > { %5866 = vmatmul.mubr.msk.f32.gmra.mrb[28].mxu1 %vm8274_vm0, %v7111_v28  ;;  %6089 = vmatmul.mubr.msk.f32.gmra.mrb[10].mxu0 %vm8274_vm0, %v3177_v29  ;;  %v1140_v29 = vsel %vm7186_vm12, %v7190_v16, 0.0  ;;  %v680_v28 = vand.u32 15, %v572_v50 }
  0x62   : > { %5868 = vmatprep.mubr.msk.f32.mxu1 %vm8274_vm0, %v7116_v31  ;;  %6091 = vmatprep.mubr.msk.f32.mxu0 %vm8274_vm0, %v7118_v32  ;;  %v7295_v31 = vld [vmem:[#allocation2 + $0x50] sm:$0xff] }
  0x63   : > { %8436 = vst [vmem:[#allocation32_spill] sm:$0xff] %v7295_v31 }
  0x65   : > { %5869 = vmatmul.mubr.msk.f32.gmra.mrb[30].mxu1 %vm8274_vm0, %v7139_v5  ;;  %6092 = vmatmul.mubr.msk.f32.gmra.mrb[12].mxu0 %vm8274_vm0, %v3179_v43  ;;  %v8412_v43 = vmov 0  ;;  %v8434_v5 = vmov 0 }
  0x66   : > { %5873 = vmatprep.mubr.msk.f32.mxu1 %vm8274_vm0, %v1136_v3  ;;  %6094 = vmatprep.mubr.msk.f32.mxu0 %vm8274_vm0, %v7146_v44  ;;  %v8413_v43 = vsel %vm7224_vm14, 4294967295, %v8412_v43  ;;  %v652_v3 = vand.u32 15, %v568_v18  ;;  %v8421_v18 = vmov 0 }
  0x69   : > { %5874 = vmatmul.mubr.msk.f32.vlgmr.msra.gmra.mrb[0].mxu1 %vm8274_vm0, %v1041_v61  ;;  %6095 = vmatmul.mubr.msk.f32.gmra.mrb[14].mxu0 %vm8274_vm0, %v3181_v62  ;;  %v7249_v62 = vld [vmem:[#allocation2 + $0xb2] sm:$0xff] }
  0x6a   : > { %5876 = vmatprep.mubr.msk.f32.mxu1 %vm8274_vm0, %v1138_v63  ;;  %6097 = vmatprep.mubr.msk.f32.mxu0 %vm8274_vm0, %v7177_v0  ;;  %8416 = vst [vmem:[#allocation24_spill] sm:$0xff] %v7249_v62  ;;  %v8417_v63 = vmov 0  ;;  %v584_v0 = vadd.s32 192, %v6970_v23 }
  0x6b   : > { %5922 = vmatpush3.msra.mxu1 %v6866_v58  ;;  %v7228_v58 = vld [vmem:[#allocation2 + $0x30] sm:$0xff]  ;;  %v8418_v63 = vsel %vm7251_vm15, 4294967295, %v8417_v63 }
  0x6c   : > { %8414 = vst [vmem:[#allocation22_spill] sm:$0xff] %v7228_v58  ;;  %5971 = vmatprep.subr.mxu1 %v7198_v24  ;;  %v1142_v61 = vsel %vm7224_vm14, %v7228_v58, 0.0  ;;  %8419 = vst [vmem:[#allocation25_spill] sm:$0xff] %v8418_v63  ;;  %v578_v63 = vadd.s32 144, %v6970_v23 }
  0x6d   : > { %5877 = vmatmul.mubr.msk.f32.gmra.mrb[2].mxu1 %vm8274_vm0, %v7206_v26  ;;  %6098 = vmatmul.mubr.msk.f32.gmra.mrb[16].mxu0 %vm8274_vm0, %v3183_v27  ;;  %v7262_v27 = vld [vmem:[#allocation2 + $0x40] sm:$0xff]  ;;  %v589_v26 = vadd.s32 232, %v6970_v23 }
  0x6e   : > { %5879 = vmatprep.mubr.msk.f32.mxu1 %vm8274_vm0, %v1140_v29  ;;  %6100 = vmatprep.mubr.msk.f32.mxu0 %vm8274_vm0, %v7215_v35  ;;  %vm7258_vm0 = vcmp.gt.s32.totalorder %v652_v3, 0  ;;  %8423 = vst [vmem:[#allocation27_spill] sm:$0xff] %v7262_v27  ;;  %v666_v29 = vand.u32 15, %v570_v49  ;;  %v3187_v3 = vsel %vm7251_vm15, %v7255_v10, 0.0  ;;  %vm8438_vm15 = vmmov %vm8426_vm9  ;;  %v8453_v10 = vmov 0  ;;  %v7393_v35 = vld [vmem:[#allocation2 + $0x80] sm:$0xff] }
  0x6f   : > { %v8422_v18 = vsel %vm7258_vm0, 4294967295, %v8421_v18  ;;  %v1144_v49 = vsel %vm7258_vm0, %v7262_v27, 0.0 }
  0x71   : > { %5880 = vmatmul.mubr.msk.f32.gmra.mrb[4].mxu1 %vm8424_vm13, %v7241_v56  ;;  %6101 = vmatmul.mubr.msk.f32.gmra.mrb[18].mxu0 %vm8425_vm11, %v3185_v30  ;;  %v7282_v30 = vld [vmem:[#allocation2 + $0xc2] sm:$0xff]  ;;  %vm7284_vm11 = vcmp.lt.s32.totalorder %v757_v11, 15  ;;  %vm8437_vm13 = vmmov %vm8426_vm9  ;;  %v785_v11 = vand.u32 15, %v587_v60  ;;  %v799_v60 = vand.u32 15, %v589_v26 }
  0x72   : > { %5882 = vmatprep.mubr.msk.f32.mxu1 %vm8426_vm9, %v1142_v61  ;;  %6103 = vmatprep.mubr.msk.f32.mxu0 %vm8427_vm7, %v7249_v62  ;;  %8429 = vst [vmem:[#allocation29_spill] sm:$0xff] %v7282_v30  ;;  %v8431_v25 = vsel %vm7284_vm11, 4294967295, %v8430_v25  ;;  %v7288_v61 = vld [vmem:[#allocation2 + $0xca] sm:$0xff]  ;;  %vm7291_vm7 = vcmp.gt.s32.totalorder %v666_v29, 0 }
  0x73   : > { %8432 = vst [vmem:[#allocation30_spill] sm:$0xff] %v8431_v25  ;;  %8433 = vst [vmem:[#allocation31_spill] sm:$0xff] %v7288_v61  ;;  %v8435_v5 = vsel %vm7291_vm7, 4294967295, %v8434_v5  ;;  %v3189_v50 = vsel %vm7284_vm11, %v7288_v61, 0.0  ;;  %v1146_v29 = vsel %vm7291_vm7, %v7295_v31, 0.0  ;;  %v7328_v61 = vld [vmem:[#allocation2 + $0x60] sm:$0xff] }
  0x74   : > { %8448 = vst [vmem:[#allocation37_spill] sm:$0xff] %v7328_v61  ;;  %v576_v25 = vadd.s32 128, %v6970_v23  ;;  %vm8450_vm11 = vmmov %vm8437_vm13 }
  0x75   : > { %5883 = vmatmul.mubr.msk.f32.gmra.mrb[6].mxu1 %vm8426_vm9, %v7274_v39  ;;  %6104 = vmatmul.mubr.msk.f32.gmra.mrb[20].mxu0 %vm8437_vm13, %v3187_v3  ;;  %v7315_v3 = vld [vmem:[#allocation2 + $0xd2] sm:$0xff]  ;;  %vm7317_vm9 = vcmp.lt.s32.totalorder %v771_v38, 15  ;;  %vm8451_vm5 = vmmov %vm8450_vm11 }
  0x76   : > { %5885 = vmatprep.mubr.msk.f32.mxu1 %vm8438_vm15, %v1144_v49  ;;  %6106 = vmatprep.mubr.msk.f32.mxu0 %vm8439_vm6, %v7282_v30  ;;  %8441 = vst [vmem:[#allocation34_spill] sm:$0xff] %v7315_v3  ;;  %v8443_v17 = vsel %vm7317_vm9, 4294967295, %v8442_v17  ;;  %v7321_v49 = vld [vmem:[#allocation2 + $0xda] sm:$0xff]  ;;  %vm7324_vm6 = vcmp.gt.s32.totalorder %v680_v28, 0  ;;  %v694_v30 = vand.u32 15, %v574_v19  ;;  %vm8449_vm15 = vmmov %vm8437_vm13 }
  0x77   : > { %8444 = vst [vmem:[#allocation35_spill] sm:$0xff] %v8443_v17  ;;  %8445 = vst [vmem:[#allocation36_spill] sm:$0xff] %v7321_v49  ;;  %v8447_v54 = vsel %vm7324_vm6, 4294967295, %v8446_v54  ;;  %v7340_v28 = vld [vmem:[#allocation2 + $0x58] sm:$0xff]  ;;  %v3191_v19 = vsel %vm7317_vm9, %v7321_v49, 0.0  ;;  %v1148_v38 = vsel %vm7324_vm6, %v7328_v61, 0.0 }
  0x78   : > { %v7361_v49 = vld [vmem:[#allocation2 + $0x70] sm:$0xff]  ;;  %v708_v17 = vand.u32 15, %v576_v25  ;;  %vm8461_vm9 = vmmov %vm8450_vm11 }
  0x79   : > { %5886 = vmatmul.mubr.msk.f32.gmra.mrb[8].mxu1 %vm8449_vm15, %v7307_v2  ;;  %6107 = vmatmul.mubr.msk.f32.gmra.mrb[22].mxu0 %vm8437_vm13, %v3189_v50  ;;  %v7348_v50 = vld [vmem:[#allocation2 + $0xe2] sm:$0xff]  ;;  %vm7350_vm15 = vcmp.lt.s32.totalorder %v785_v11, 15  ;;  %8459 = vst [vmem:[#allocation41_spill] sm:$0xff] %v7361_v49  ;;  %vm8460_vm13 = vmmov %vm8450_vm11 }
  0x7a   : > { %5888 = vmatprep.mubr.msk.f32.mxu1 %vm8450_vm11, %v1146_v29  ;;  %6109 = vmatprep.mubr.msk.f32.mxu0 %vm8451_vm5, %v7315_v3  ;;  %8452 = vst [vmem:[#allocation38_spill] sm:$0xff] %v7348_v50  ;;  %v8454_v10 = vsel %vm7350_vm15, 4294967295, %v8453_v10  ;;  %v7354_v29 = vld [vmem:[#allocation2 + $0xea] sm:$0xff]  ;;  %v591_v3 = vadd.s32 248, %v6970_v23  ;;  %vm7357_vm5 = vcmp.gt.s32.totalorder %v694_v30, 0  ;;  %vm8462_vm4 = vmmov %vm8461_vm9 }
  0x7b   : > { %8455 = vst [vmem:[#allocation39_spill] sm:$0xff] %v8454_v10  ;;  %8456 = vst [vmem:[#allocation40_spill] sm:$0xff] %v7354_v29  ;;  %v7373_v30 = vld [vmem:[#allocation2 + $0x68] sm:$0xff]  ;;  %v3193_v25 = vsel %vm7350_vm15, %v7354_v29, 0.0  ;;  %v1150_v11 = vsel %vm7357_vm5, %v7361_v49, 0.0  ;;  %v722_v29 = vand.u32 15, %v578_v63 }
  0x7c   : > { %8463 = vst [vmem:[#allocation42_spill] sm:$0xff] %v7373_v30  ;;  %v813_v26 = vand.u32 15, %v591_v3  ;;  %v580_v10 = vadd.s32 160, %v6970_v23  ;;  %vm8472_vm15 = vmmov %vm8461_vm9 }
  0x7d   : > { %5889 = vmatmul.mubr.msk.f32.gmra.mrb[10].mxu1 %vm8450_vm11, %v7340_v28  ;;  %6110 = vmatmul.mubr.msk.f32.gmra.mrb[24].mxu0 %vm8460_vm13, %v3191_v19  ;;  %v7381_v19 = vld [vmem:[#allocation2 + $0xf2] sm:$0xff]  ;;  %vm7383_vm11 = vcmp.lt.s32.totalorder %v799_v60, 15  ;;  %vm8471_vm13 = vmmov %vm8461_vm9 }
  0x7e   : > { %5891 = vmatprep.mubr.msk.f32.mxu1 %vm8461_vm9, %v1148_v38  ;;  %6112 = vmatprep.mubr.msk.f32.mxu0 %vm8462_vm4, %v7348_v50  ;;  %8464 = vst [vmem:[#allocation43_spill] sm:$0xff] %v7381_v19  ;;  %v8466_v4 = vsel %vm7383_vm11, 4294967295, %v8465_v4  ;;  %v7387_v38 = vld [vmem:[#allocation2 + $0xfa] sm:$0xff]  ;;  %vm7389_vm4 = vcmp.gt.s32.totalorder %v708_v17, 0  ;;  %vm8473_vm3 = vmmov %vm8461_vm9 }
  0x7f   : > { %8467 = vst [vmem:[#allocation44_spill] sm:$0xff] %v8466_v4  ;;  %8468 = vst [vmem:[#allocation45_spill] sm:$0xff] %v7387_v38  ;;  %v7405_v17 = vld [vmem:[#allocation2 + $0x78] sm:$0xff]  ;;  %v3195_v63 = vsel %vm7383_vm11, %v7387_v38, 0.0  ;;  %v1152_v3 = vsel %vm7389_vm4, %v7393_v35, 0.0  ;;  %v736_v4 = vand.u32 15, %v580_v10 }
  0x80   : > { %v582_v38 = vadd.s32 176, %v6970_v23  ;;  %vm8482_vm11 = vmmov %vm8473_vm3 }
  0x81   : > { %5892 = vmatmul.mubr.msk.f32.gmra.mrb[12].mxu1 %vm8461_vm9, %v7373_v30  ;;  %6113 = vmatmul.mubr.msk.f32.gmra.mrb[26].mxu0 %vm8471_vm13, %v3193_v25  ;;  %v7413_v25 = vld [vmem:[#allocation2 + $0x102] sm:$0xff]  ;;  %vm7415_vm9 = vcmp.lt.s32.totalorder %v813_v26, 15  ;;  %vm8481_vm13 = vmmov %vm8473_vm3 }
  0x82   : > { %5894 = vmatprep.mubr.msk.f32.mxu1 %vm8472_vm15, %v1150_v11  ;;  %6115 = vmatprep.mubr.msk.f32.mxu0 %vm8473_vm3, %v7381_v19  ;;  %8474 = vst [vmem:[#allocation46_spill] sm:$0xff] %v7413_v25  ;;  %v8476_v36 = vsel %vm7415_vm9, 4294967295, %v8475_v36  ;;  %v7419_v11 = vld [vmem:[#allocation2 + $0x10a] sm:$0xff]  ;;  %vm7421_vm15 = vcmp.gt.s32.totalorder %v722_v29, 0  ;;  %vm8483_vm2 = vmmov %vm8473_vm3 }
  0x83   : > { %8477 = vst [vmem:[#allocation47_spill] sm:$0xff] %v8476_v36  ;;  %8478 = vst [vmem:[#allocation48_spill] sm:$0xff] %v7419_v11  ;;  %v7425_v19 = vld [vmem:[#allocation2 + $0x90] sm:$0xff]  ;;  %v7437_v29 = vld [vmem:[#allocation2 + $0x88] sm:$0xff]  ;;  %v3197_v10 = vsel %vm7415_vm9, %v7419_v11, 0.0  ;;  %v764_v11 = vand.u32 15, %v584_v0 }
  0x84   : > { %v1154_v9 = vsel %vm7421_vm15, %v7425_v19, 0.0  ;;  %v7492_v0 = vld [vmem:[#allocation2 + $0xa8] sm:$0xff]  ;;  %v8673_v62 = vsel %vm7389_vm4, %v7425_v19, 0.0 }
  0x85   : > { %5895 = vmatmul.mubr.msk.f32.gmra.mrb[14].mxu1 %vm8473_vm3, %v7405_v17  ;;  %6116 = vmatmul.mubr.msk.f32.gmra.mrb[28].mxu0 %vm8481_vm13, %v3195_v63  ;;  %v3585_v63 = vsel %vm7127_vm8, %v7190_v16, 0.0  ;;  %vm7448_vm3 = vcmp.gt.s32.totalorder %v736_v4, 0  ;;  %vm8487_vm13 = vmmov %vm8483_vm2  ;;  %v7463_v4 = vld [vmem:[#allocation2 + $0x98] sm:$0xff]  ;;  %v3587_v16 = vsel %vm7155_vm10, %v7228_v58, 0.0 }
  0x86   : > { %5897 = vmatprep.mubr.msk.f32.mxu1 %vm8482_vm11, %v1152_v3  ;;  %6118 = vmatprep.mubr.msk.f32.mxu0 %vm8483_vm2, %v7413_v25  ;;  %v7452_v3 = vld [vmem:[#allocation2 + $0xa0] sm:$0xff]  ;;  %v750_v25 = vand.u32 15, %v582_v38  ;;  %vm8486_vm11 = vmmov %vm8483_vm2  ;;  %v8683_v60 = vsel %vm7448_vm3, %v7475_v37, 0.0 }
  0x87   : > { %vm8488_vm8 = vmmov %vm8483_vm2  ;;  %v1156_v38 = vsel %vm7448_vm3, %v7452_v3, 0.0 }
  0x88   : > { %vm8493_vm10 = vmmov %vm8488_vm8 }
  0x89   : > { %5898 = vmatmul.mubr.msk.f32.gmra.mrb[16].mxu1 %vm8483_vm2, %v7437_v29  ;;  %6119 = vmatmul.mubr.msk.f32.gmra.mrb[30].mxu0 %vm8486_vm11, %v3197_v10  ;;  %vm7471_vm2 = vcmp.gt.s32.totalorder %v750_v25, 0  ;;  %vm8491_vm11 = vmmov %vm8488_vm8  ;;  %v4367_v25 = vld [vmem:[#allocation2 + $0x62] sm:$0xff] }
  0x8a   : > { %5900 = vmatprep.mubr.msk.f32.mxu1 %vm8487_vm13, %v1154_v9  ;;  %6123 = vmatprep.mubr.msk.f32.mxu0 %vm8488_vm8, %v3585_v63  ;;  %v586_v9 = vadd.s32 208, %v6970_v23  ;;  %v7481_v63 = vld [vmem:[%s8270_s4 + $0x40] sm:$0xff]  ;;  %vm8492_vm13 = vmmov %vm8488_vm8  ;;  %v1158_v58 = vsel %vm7471_vm2, %v7475_v37, 0.0 }
  0x8d   : > { %5901 = vmatmul.mubr.msk.f32.gmra.mrb[18].mxu1 %vm8488_vm8, %v7463_v4  ;;  %6124 = vmatmul.mubr.msk.f32.vlgmr.msra.gmra.mrb[0].mxu0 %vm8491_vm11, %v7241_v56  ;;  %v3589_v56 = vsel %vm7186_vm12, %v7262_v27, 0.0  ;;  %vm7502_vm8 = vcmp.gt.s32.totalorder %v764_v11, 0  ;;  %vm8496_vm11 = vmmov %vm8493_vm10  ;;  %v7518_v11 = vld [vmem:[#allocation2 + $0xb8] sm:$0xff]  ;;  %v3591_v27 = vsel %vm7224_vm14, %v7295_v31, 0.0  ;;  %v7551_v31 = vld [vmem:[#allocation2 + $0xe0] sm:$0xff] }
  0x8e   : > { %6172 = vmatpush3.msra.mxu0 %v7024_v52  ;;  %5903 = vmatprep.mubr.msk.f32.mxu1 %vm8492_vm13, %v1156_v38  ;;  %v7506_v52 = vld [vmem:[#allocation2 + $0xc0] sm:$0xff]  ;;  %v778_v38 = vand.u32 15, %v586_v9  ;;  %vm8497_vm13 = vmmov %vm8493_vm10 }
  0x8f   : > { %6126 = vmatprep.mubr.msk.f32.mxu0 %vm8493_vm10, %v3587_v16  ;;  %6221 = vmatprep.subr.mxu0 %v7481_v63  ;;  %vm8498_vm12 = vmmov %vm8493_vm10  ;;  %v1160_v9 = vsel %vm7502_vm8, %v7506_v52, 0.0  ;;  %v792_v16 = vand.u32 15, %v588_v53  ;;  %v8504_v53 = vmov 0  ;;  %v8689_v26 = vsel %vm7471_vm2, %v7506_v52, 0.0 }
  0x90   : > { %vm8503_vm9 = vmmov %vm8496_vm11 }
  0x91   : > { %5904 = vmatmul.mubr.msk.f32.gmra.mrb[20].mxu1 %vm8493_vm10, %v7492_v0  ;;  %6127 = vmatmul.mubr.msk.f32.gmra.mrb[2].mxu0 %vm8496_vm11, %v7274_v39  ;;  %vm7526_vm10 = vcmp.gt.s32.totalorder %v778_v38, 0  ;;  %vm7547_vm14 = vcmp.gt.s32.totalorder %v792_v16, 0  ;;  %v4369_v39 = vld [vmem:[#allocation2 + $0x72] sm:$0xff] }
  0x92   : > { %5906 = vmatprep.mubr.msk.f32.mxu1 %vm8497_vm13, %v1158_v58  ;;  %6129 = vmatprep.mubr.msk.f32.mxu0 %vm8498_vm12, %v3589_v56  ;;  %v590_v58 = vadd.s32 240, %v6970_v23  ;;  %vm8501_vm12 = vmmov %vm8496_vm11  ;;  %v7539_v56 = vld [vmem:[#allocation2 + $0xc8] sm:$0xff]  ;;  %v1162_v38 = vsel %vm7526_vm10, %v7530_v12, 0.0  ;;  %v3593_v23 = vsel %vm7258_vm0, %v7328_v61, 0.0  ;;  %v8505_v53 = vsel %vm7547_vm14, 4294967295, %v8504_v53  ;;  %v7571_v61 = vld [vmem:[#allocation2 + $0xf0] sm:$0xff] }
  0x93   : > { %vm8502_vm13 = vmmov %vm8496_vm11  ;;  %v1164_v16 = vsel %vm7547_vm14, %v7551_v31, 0.0 }
  0x95   : > { %5907 = vmatmul.mubr.msk.f32.gmra.mrb[22].mxu1 %vm8501_vm12, %v7518_v11  ;;  %6130 = vmatmul.mubr.msk.f32.gmra.mrb[4].mxu0 %vm8496_vm11, %v7307_v2  ;;  %v806_v2 = vand.u32 15, %v590_v58  ;;  %vm8506_vm12 = vmmov %vm8503_vm9  ;;  %v8509_v58 = vmov 0 }
  0x96   : > { %5909 = vmatprep.mubr.msk.f32.mxu1 %vm8502_vm13, %v1160_v9  ;;  %6132 = vmatprep.mubr.msk.f32.mxu0 %vm8503_vm9, %v3591_v27  ;;  %vm8507_vm11 = vmmov %vm8503_vm9  ;;  %v7559_v27 = vld [vmem:[#allocation2 + $0xd8] sm:$0xff]  ;;  %v3595_v9 = vsel %vm7291_vm7, %v7361_v49, 0.0  ;;  %v3599_v49 = vsel %vm7357_vm5, %v7425_v19, 0.0 }
  0x97   : > { %vm8508_vm13 = vmmov %vm8503_vm9  ;;  %vm7567_vm0 = vcmp.gt.s32.totalorder %v806_v2, 0  ;;  %v4361_v19 = vld [vmem:[#allocation2 + $0x32] sm:$0xff] }
  0x98   : > { %v8510_v58 = vsel %vm7567_vm0, 4294967295, %v8509_v58  ;;  %v1166_v2 = vsel %vm7567_vm0, %v7571_v61, 0.0  ;;  %vm8514_vm7 = vmmov %vm8503_vm9 }
  0x99   : > { %5910 = vmatmul.mubr.msk.f32.gmra.mrb[24].mxu1 %vm8506_vm12, %v7539_v56  ;;  %6133 = vmatmul.mubr.msk.f32.gmra.mrb[6].mxu0 %vm8503_vm9, %v7340_v28  ;;  %vm8511_vm12 = vmmov %vm8503_vm9 }
  0x9a   : > { %5912 = vmatprep.mubr.msk.f32.mxu1 %vm8507_vm11, %v1162_v38  ;;  %6135 = vmatprep.mubr.msk.f32.mxu0 %vm8508_vm13, %v3593_v23  ;;  %vm8512_vm11 = vmmov %vm8503_vm9  ;;  %v7579_v38 = vld [vmem:[#allocation2 + $0xe8] sm:$0xff]  ;;  %v3597_v23 = vsel %vm7324_vm6, %v7393_v35, 0.0 }
  0x9b   : > { %vm8513_vm13 = vmmov %vm8503_vm9 }
  0x9c   : > { %vm8519_vm6 = vmmov %vm8514_vm7 }
  0x9d   : > { %5913 = vmatmul.mubr.msk.f32.gmra.mrb[26].mxu1 %vm8511_vm12, %v7559_v27  ;;  %6136 = vmatmul.mubr.msk.f32.gmra.mrb[8].mxu0 %vm8503_vm9, %v7373_v30  ;;  %vm8515_vm12 = vmmov %vm8514_vm7  ;;  %v1846_v30 = vld [vmem:[#allocation2 + $0xa] sm:$0xff] }
  0x9e   : > { %5915 = vmatprep.mubr.msk.f32.mxu1 %vm8512_vm11, %v1164_v16  ;;  %6138 = vmatprep.mubr.msk.f32.mxu0 %vm8513_vm13, %v3595_v9  ;;  %vm8516_vm9 = vmmov %vm8514_vm7  ;;  %v7593_v16 = vld [vmem:[#allocation2 + $0xf8] sm:$0xff]  ;;  %v1845_v9 = vld [vmem:[#allocation2 + $0x2] sm:$0xff] }
  0x9f   : > { %vm8517_vm11 = vmmov %vm8514_vm7 }
  0xa0   : > { %vm8518_vm13 = vmmov %vm8514_vm7 }
  0xa1   : > { %5916 = vmatmul.mubr.msk.f32.gmra.mrb[28].mxu1 %vm8514_vm7, %v7579_v38  ;;  %6139 = vmatmul.mubr.msk.f32.gmra.mrb[10].mxu0 %vm8515_vm12, %v7405_v17  ;;  %vm8520_vm12 = vmmov %vm8519_vm6 }
  0xa2   : > { %5918 = vmatprep.mubr.msk.f32.mxu1 %vm8516_vm9, %v1166_v2  ;;  %6141 = vmatprep.mubr.msk.f32.mxu0 %vm8517_vm11, %v3597_v23  ;;  %v1942_v2 = vsel %vm6996_vm1, %v1846_v30, 0.0  ;;  %v3601_v23 = vsel %vm7389_vm4, %v7452_v3, 0.0  ;;  %vm8521_vm9 = vmmov %vm8519_vm6  ;;  %v3603_v30 = vsel %vm7421_vm15, %v7475_v37, 0.0  ;;  %vm8681_vm4 = vnez %v8371_v41  ;;  %v4363_v41 = vld [vmem:[#allocation2 + $0x42] sm:$0xff] }
  0xa3   : > { %vm8522_vm11 = vmmov %vm8519_vm6 }
  0xa5   : > { %5919 = vmatmul.mubr.msk.f32.gmra.mrb[30].mxu1 %vm8518_vm13, %v7593_v16  ;;  %6142 = vmatmul.mubr.msk.f32.gmra.mrb[12].mxu0 %vm8514_vm7, %v7437_v29  ;;  %vm8523_vm13 = vmmov %vm8519_vm6 }
  0xa6   : > { %5923 = vmatprep.mubr.msk.f32.mxu1 %vm8519_vm6, %v1845_v9  ;;  %6144 = vmatprep.mubr.msk.f32.mxu0 %vm8520_vm12, %v3599_v49  ;;  %vm8524_vm7 = vmmov %vm8519_vm6  ;;  %vm8525_vm6 = vnez %v8373_v47  ;;  %v7625_v9 = vld [vmem:[%s8270_s4 + $0x20] sm:$0xff] }
  0xa7   : > { %v1944_v49 = vsel %vm8525_vm6, %v7000_v42, 0.0  ;;  %vm8526_vm12 = vmmov %vm8524_vm7  ;;  %v3605_v42 = vsel %vm7448_vm3, %v7506_v52, 0.0 }
  0xa9   : > { %5924 = vmatmul.mubr.msk.f32.vlgmr.msra.gmra.mrb[0].mxu1 %vm8521_vm9, %v1942_v2  ;;  %6145 = vmatmul.mubr.msk.f32.gmra.mrb[14].mxu0 %vm8522_vm11, %v7463_v4  ;;  %vm8527_vm9 = vmmov %vm8524_vm7  ;;  %v3583_v2 = vld [vmem:[#allocation2 + $0x110] sm:$0xff] }
  0xaa   : > { %5926 = vmatprep.mubr.msk.f32.mxu1 %vm8523_vm13, %v6994_v40  ;;  %6147 = vmatprep.mubr.msk.f32.mxu0 %vm8524_vm7, %v3601_v23  ;;  %vm8528_vm11 = vmmov %vm8524_vm7  ;;  %v3615_v23 = vsel %vm7567_vm0, %v3583_v2, 0.0  ;;  %v8579_v2 = vld [vmem:[#allocation30_spill] sm:$0xff] }
  0xab   : > { %5972 = vmatpush3.msra.mxu1 %v7198_v24  ;;  %vm8529_vm13 = vmmov %vm8524_vm7  ;;  %vm8530_vm7 = vnez %v8375_v57  ;;  %v7676_v24 = vld [vmem:[#allocation2 + $0x100] sm:$0xff] }
  0xac   : > { %6271 = vmatprep.subr.mxu1 %v7625_v9  ;;  %v1946_v40 = vsel %vm8530_vm7, %v7016_v48, 0.0  ;;  %vm8531_vm6 = vmmov %vm8527_vm9  ;;  %v3607_v48 = vsel %vm7471_vm2, %v7530_v12, 0.0 }
  0xad   : > { %5927 = vmatmul.mubr.msk.f32.gmra.mrb[2].mxu1 %vm8526_vm12, %v1944_v49  ;;  %6148 = vmatmul.mubr.msk.f32.gmra.mrb[16].mxu0 %vm8527_vm9, %v7492_v0  ;;  %vm8532_vm12 = vmmov %vm8531_vm6  ;;  %v3972_v49 = vld [vmem:[#allocation2 + $0x21] sm:$0xff] }
  0xae   : > { %5929 = vmatprep.mubr.msk.f32.mxu1 %vm8528_vm11, %v7019_v51  ;;  %6150 = vmatprep.mubr.msk.f32.mxu0 %vm8529_vm13, %v3603_v30  ;;  %vm8533_vm9 = vmmov %vm8531_vm6  ;;  %vm8535_vm11 = vnez %v8377_v6  ;;  %v8560_v30 = vld [vmem:[#allocation14_spill] sm:$0xff] }
  0xaf   : > { %vm8534_vm1 = vmmov %vm8531_vm6  ;;  %v1948_v51 = vsel %vm8535_vm11, %v7041_v59, 0.0  ;;  %v3609_v59 = vsel %vm7502_vm8, %v7551_v31, 0.0 }
  0xb0   : > { %vm8536_vm13 = vmmov %vm8534_vm1 }
  0xb1   : > { %5930 = vmatmul.mubr.msk.f32.gmra.mrb[4].mxu1 %vm8531_vm6, %v1946_v40  ;;  %6151 = vmatmul.mubr.msk.f32.gmra.mrb[18].mxu0 %vm8532_vm12, %v7518_v11  ;;  %vm8537_vm6 = vmmov %vm8534_vm1  ;;  %v8563_v40 = vld [vmem:[#allocation15_spill] sm:$0xff] }
  0xb2   : > { %5932 = vmatprep.mubr.msk.f32.mxu1 %vm8533_vm9, %v7033_v55  ;;  %6153 = vmatprep.mubr.msk.f32.mxu0 %vm8534_vm1, %v3605_v42  ;;  %vm8538_vm12 = vmmov %vm8534_vm1  ;;  %v8564_v42 = vld [vmem:[#allocation20_spill] sm:$0xff] }
  0xb3   : > { %vm8539_vm7 = vmmov %vm8534_vm1  ;;  %vm8540_vm1 = vnez %v8379_v14 }
  0xb4   : > { %v1950_v55 = vsel %vm8540_vm1, %v7061_v7, 0.0  ;;  %vm8541_vm9 = vmmov %vm8537_vm6  ;;  %v3611_v7 = vsel %vm7526_vm10, %v7571_v61, 0.0 }
  0xb5   : > { %5933 = vmatmul.mubr.msk.f32.gmra.mrb[6].mxu1 %vm8536_vm13, %v1948_v51  ;;  %6154 = vmatmul.mubr.msk.f32.gmra.mrb[20].mxu0 %vm8537_vm6, %v7539_v56  ;;  %vm8542_vm13 = vmmov %vm8537_vm6  ;;  %v3973_v51 = vld [vmem:[#allocation2 + $0x29] sm:$0xff] }
  0xb6   : > { %5935 = vmatprep.mubr.msk.f32.mxu1 %vm8538_vm12, %v7055_v1  ;;  %6156 = vmatprep.mubr.msk.f32.mxu0 %vm8539_vm7, %v3607_v48  ;;  %vm8543_vm11 = vmmov %vm8537_vm6  ;;  %vm8544_vm7 = vnez %v8383_v21  ;;  %v3974_v48 = vld [vmem:[#allocation2 + $0x31] sm:$0xff] }
  0xb7   : > { %v1952_v1 = vsel %vm8544_vm7, %v7078_v15, 0.0  ;;  %vm8545_vm12 = vmmov %vm8537_vm6  ;;  %v3613_v15 = vsel %vm7547_vm14, %v7676_v24, 0.0 }
  0xb8   : > { %vm8549_vm7 = vmmov %vm8537_vm6 }
  0xb9   : > { %5936 = vmatmul.mubr.msk.f32.gmra.mrb[8].mxu1 %vm8541_vm9, %v1950_v55  ;;  %6157 = vmatmul.mubr.msk.f32.gmra.mrb[22].mxu0 %vm8542_vm13, %v7559_v27  ;;  %vm8546_vm9 = vmmov %vm8537_vm6  ;;  %v8570_v55 = vld [vmem:[#allocation21_spill] sm:$0xff] }
  0xba   : > { %5938 = vmatprep.mubr.msk.f32.mxu1 %vm8537_vm6, %v7072_v13  ;;  %6159 = vmatprep.mubr.msk.f32.mxu0 %vm8543_vm11, %v3609_v59  ;;  %vm8547_vm13 = vmmov %vm8537_vm6  ;;  %vm8548_vm11 = vnez %v8387_v33  ;;  %v8571_v59 = vld [vmem:[#allocation25_spill] sm:$0xff] }
  0xbb   : > { %v1954_v13 = vsel %vm8548_vm11, %v7099_v22, 0.0  ;;  %v7699_v22 = vld [vmem:[#allocation2 + $0x108] sm:$0xff]  ;;  %vm8554_vm11 = vmmov %vm8549_vm7 }
  0xbd   : > { %5939 = vmatmul.mubr.msk.f32.gmra.mrb[10].mxu1 %vm8545_vm12, %v1952_v1  ;;  %6160 = vmatmul.mubr.msk.f32.gmra.mrb[24].mxu0 %vm8546_vm9, %v7579_v38  ;;  %vm8550_vm12 = vmmov %vm8537_vm6 }
  0xbe   : > { %5941 = vmatprep.mubr.msk.f32.mxu1 %vm8547_vm13, %v7093_v20  ;;  %6162 = vmatprep.mubr.msk.f32.mxu0 %vm8537_vm6, %v3611_v7  ;;  %vm8551_vm9 = vmmov %vm8537_vm6  ;;  %v3975_v7 = vld [vmem:[#allocation2 + $0x39] sm:$0xff] }
  0xbf   : > { %vm8552_vm13 = vmmov %vm8537_vm6  ;;  %vm8553_vm6 = vnez %v8393_v45 }
  0xc0   : > { %v1956_v20 = vsel %vm8553_vm6, %v7124_v34, 0.0  ;;  %v3584_v34 = vld [vmem:[#allocation2 + $0x118] sm:$0xff]  ;;  %vm8558_vm6 = vmmov %vm8549_vm7 }
  0xc1   : > { %5942 = vmatmul.mubr.msk.f32.gmra.mrb[12].mxu1 %vm8549_vm7, %v1954_v13  ;;  %6163 = vmatmul.mubr.msk.f32.gmra.mrb[26].mxu0 %vm8550_vm12, %v7593_v16  ;;  %vm8555_vm12 = vmmov %vm8549_vm7  ;;  %v3976_v13 = vld [vmem:[#allocation2 + $0x41] sm:$0xff] }
  0xc2   : > { %5944 = vmatprep.mubr.msk.f32.mxu1 %vm8551_vm9, %v7118_v32  ;;  %6165 = vmatprep.mubr.msk.f32.mxu0 %vm8552_vm13, %v3613_v15  ;;  %vm8556_vm9 = vmmov %vm8549_vm7  ;;  %vm8557_vm13 = vnez %v8400_v8  ;;  %v8575_v15 = vld [vmem:[#allocation24_spill] sm:$0xff] }
  0xc3   : > { %v1958_v32 = vsel %vm8557_vm13, %v7152_v46, 0.0  ;;  %vm8559_vm14 = vmmov %vm8558_vm6  ;;  %v8568_v46 = vld [vmem:[#allocation19_spill] sm:$0xff] }
  0xc4   : > { %vm8562_vm0 = vmmov %vm8558_vm6 }
  0xc5   : > { %5945 = vmatmul.mubr.msk.f32.gmra.mrb[14].mxu1 %vm8554_vm11, %v1956_v20  ;;  %6166 = vmatmul.mubr.msk.f32.gmra.mrb[28].mxu0 %vm8549_vm7, %v7699_v22  ;;  %vm8561_vm11 = vmmov %vm8558_vm6  ;;  %vm8565_vm7 = vnez %v8564_v42 }
  0xc6   : > { %5947 = vmatprep.mubr.msk.f32.mxu1 %vm8555_vm12, %v7146_v44  ;;  %6168 = vmatprep.mubr.msk.f32.mxu0 %vm8556_vm9, %v3615_v23  ;;  %v1960_v44 = vsel %vm8565_vm7, %v8563_v40, 0.0  ;;  %vm8566_vm12 = vmmov %vm8562_vm0  ;;  %v3977_v23 = vld [vmem:[#allocation2 + $0x49] sm:$0xff] }
  0xc7   : > { %vm8567_vm9 = vmmov %vm8562_vm0 }
  0xc8   : > { %vm8574_vm7 = vmmov %vm8562_vm0 }
  0xc9   : > { %5948 = vmatmul.mubr.msk.f32.gmra.mrb[16].mxu1 %vm8558_vm6, %v1958_v32  ;;  %6169 = vmatmul.mubr.msk.f32.gmra.mrb[30].mxu0 %vm8559_vm14, %v3584_v34  ;;  %vm8569_vm6 = vmmov %vm8562_vm0  ;;  %vm8572_vm14 = vnez %v8571_v59  ;;  %v3978_v32 = vld [vmem:[#allocation2 + $0x51] sm:$0xff]  ;;  %v8583_v34 = vld [vmem:[#allocation29_spill] sm:$0xff] }
  0xca   : > { %5950 = vmatprep.mubr.msk.f32.mxu1 %vm8561_vm11, %v8560_v30  ;;  %6173 = vmatprep.mubr.msk.f32.mxu0 %vm8562_vm0, %v3972_v49  ;;  %v1962_v1 = vsel %vm8572_vm14, %v8570_v55, 0.0  ;;  %vm8573_vm11 = vmmov %vm8562_vm0  ;;  %v8585_v49 = vld [vmem:[#allocation31_spill] sm:$0xff] }
  0xcb   : > { %vm8581_vm14 = vmmov %vm8562_vm0  ;;  %v8586_v30 = vld [vmem:[#allocation35_spill] sm:$0xff] }
  0xcc   : > { %vm8582_vm13 = vmmov %vm8562_vm0  ;;  %v8594_v55 = vld [vmem:[#allocation39_spill] sm:$0xff] }
  0xcd   : > { %5951 = vmatmul.mubr.msk.f32.gmra.mrb[18].mxu1 %vm8566_vm12, %v1960_v44  ;;  %6174 = vmatmul.mubr.msk.f32.vlgmr.msra.gmra.mrb[0].mxu0 %vm8567_vm9, %v3973_v51  ;;  %vm8576_vm12 = vmmov %vm8562_vm0  ;;  %v3979_v44 = vld [vmem:[#allocation2 + $0x59] sm:$0xff]  ;;  %v3980_v51 = vld [vmem:[#allocation2 + $0x61] sm:$0xff] }
  0xce   : > { %6222 = vmatpush3.msra.mxu0 %v7481_v63  ;;  %5953 = vmatprep.mubr.msk.f32.mxu1 %vm8569_vm6, %v8568_v46  ;;  %vm8577_vm9 = vmmov %vm8562_vm0  ;;  %v8578_v63 = vld [vmem:[#allocation26_spill] sm:$0xff]  ;;  %vm8580_vm6 = vnez %v8579_v2  ;;  %v8593_v46 = vld [vmem:[#allocation36_spill] sm:$0xff] }
  0xcf   : > { %6176 = vmatprep.mubr.msk.f32.mxu0 %vm8562_vm0, %v3974_v48  ;;  %v1964_v20 = vsel %vm8580_vm6, %v8578_v63, 0.0  ;;  %v8590_v48 = vld [vmem:[#allocation34_spill] sm:$0xff]  ;;  %vm8591_vm6 = vmmov %vm8562_vm0  ;;  %v8600_v63 = vld [vmem:[#allocation40_spill] sm:$0xff] }
  0xd1   : > { %5954 = vmatmul.mubr.msk.f32.gmra.mrb[20].mxu1 %vm8573_vm11, %v1962_v1  ;;  %6177 = vmatmul.mubr.msk.f32.gmra.mrb[2].mxu0 %vm8574_vm7, %v3975_v7  ;;  %vm8584_vm11 = vmmov %vm8562_vm0  ;;  %vm8587_vm7 = vnez %v8586_v30  ;;  %v3981_v7 = vld [vmem:[#allocation2 + $0x69] sm:$0xff] }
  0xd2   : > { %5956 = vmatprep.mubr.msk.f32.mxu1 %vm8576_vm12, %v8575_v15  ;;  %6179 = vmatprep.mubr.msk.f32.mxu0 %vm8577_vm9, %v3976_v13  ;;  %v1966_v40 = vsel %vm8587_vm7, %v8585_v49, 0.0  ;;  %vm8588_vm12 = vmmov %vm8562_vm0  ;;  %v3982_v13 = vld [vmem:[#allocation2 + $0x71] sm:$0xff]  ;;  %v8597_v15 = vld [vmem:[#allocation38_spill] sm:$0xff] }
  0xd3   : > { %vm8589_vm9 = vmmov %vm8562_vm0  ;;  %v8605_v49 = vld [vmem:[#allocation43_spill] sm:$0xff] }
  0xd4   : > { %vm8598_vm7 = vmmov %vm8562_vm0 }
  0xd5   : > { %5957 = vmatmul.mubr.msk.f32.gmra.mrb[22].mxu1 %vm8581_vm14, %v1964_v20  ;;  %6180 = vmatmul.mubr.msk.f32.gmra.mrb[4].mxu0 %vm8582_vm13, %v3977_v23  ;;  %vm8592_vm14 = vmmov %vm8562_vm0  ;;  %vm8595_vm13 = vnez %v8594_v55  ;;  %v8601_v20 = vld [vmem:[#allocation44_spill] sm:$0xff] }
  0xd6   : > { %5959 = vmatprep.mubr.msk.f32.mxu1 %vm8562_vm0, %v8583_v34  ;;  %6182 = vmatprep.mubr.msk.f32.mxu0 %vm8584_vm11, %v3978_v32  ;;  %v1968_v1 = vsel %vm8595_vm13, %v8593_v46, 0.0  ;;  %vm8596_vm11 = vmmov %vm8562_vm0  ;;  %v3983_v32 = vld [vmem:[#allocation2 + $0x79] sm:$0xff]  ;;  %v3984_v34 = vld [vmem:[#allocation2 + $0x81] sm:$0xff] }
  0xd7   : > { %vm8606_vm13 = vmmov %vm8562_vm0  ;;  %v8611_v46 = vld [vmem:[#allocation10_spill] sm:$0xff] }
  0xd9   : > { %5960 = vmatmul.mubr.msk.f32.gmra.mrb[24].mxu1 %vm8588_vm12, %v1966_v40  ;;  %6183 = vmatmul.mubr.msk.f32.gmra.mrb[6].mxu0 %vm8589_vm9, %v3979_v44  ;;  %vm8599_vm12 = vmmov %vm8562_vm0  ;;  %v8607_v40 = vld [vmem:[#allocation45_spill] sm:$0xff] }
  0xda   : > { %5962 = vmatprep.mubr.msk.f32.mxu1 %vm8591_vm6, %v8590_v48  ;;  %6185 = vmatprep.mubr.msk.f32.mxu0 %vm8592_vm14, %v3980_v51  ;;  %vm8602_vm6 = vnez %v8601_v20  ;;  %vm8603_vm9 = vmmov %vm8562_vm0  ;;  %v3985_v51 = vld [vmem:[#allocation2 + $0x89] sm:$0xff]  ;;  %v7769_v48 = vld [vmem:[#allocation2 + $0x91] sm:$0xff] }
  0xdb   : > { %v1970_v23 = vsel %vm8602_vm6, %v8600_v63, 0.0  ;;  %vm8604_vm14 = vmmov %vm8562_vm0  ;;  %v8641_v20 = vld [vmem:[#allocation33_spill] sm:$0xff] }
  0xdd   : > { %5963 = vmatmul.mubr.msk.f32.gmra.mrb[26].mxu1 %vm8562_vm0, %v1968_v1  ;;  %6186 = vmatmul.mubr.msk.f32.gmra.mrb[8].mxu0 %vm8596_vm11, %v3981_v7  ;;  %vm8609_vm11 = vmmov %vm8562_vm0  ;;  %v8613_v1 = vld [vmem:[#allocation13_spill] sm:$0xff] }
  0xde   : > { %5965 = vmatprep.mubr.msk.f32.mxu1 %vm8598_vm7, %v8597_v15  ;;  %6188 = vmatprep.mubr.msk.f32.mxu0 %vm8599_vm12, %v3982_v13  ;;  %vm8608_vm7 = vnez %v8476_v36  ;;  %vm8610_vm12 = vmmov %vm8562_vm0  ;;  %v7780_v13 = vld [vmem:[#allocation2 + $0x99] sm:$0xff] }
  0xdf   : > { %v1972_v44 = vsel %vm8608_vm7, %v8607_v40, 0.0  ;;  %v8633_v36 = vld [vmem:[#allocation28_spill] sm:$0xff] }
  0xe1   : > { %5966 = vmatmul.mubr.msk.f32.gmra.mrb[28].mxu1 %vm8603_vm9, %v1970_v23  ;;  %6189 = vmatmul.mubr.msk.f32.gmra.mrb[10].mxu0 %vm8604_vm14, %v3983_v32  ;;  %vm8612_vm9 = vnez %v8611_v46  ;;  %vm8615_vm14 = vmmov %vm8562_vm0  ;;  %v7782_v23 = vld [vmem:[#allocation2 + $0xa1] sm:$0xff]  ;;  %v7795_v46 = vld [vmem:[#allocation2 + $0xa9] sm:$0xff] }
  0xe2   : > { %5968 = vmatprep.mubr.msk.f32.mxu1 %vm8606_vm13, %v8605_v49  ;;  %6191 = vmatprep.mubr.msk.f32.mxu0 %vm8562_vm0, %v3984_v34  ;;  %v8614_v7 = vsel %vm8612_vm9, %v8613_v1, 0.0  ;;  %vm8616_vm13 = vmmov %vm8562_vm0  ;;  %v8617_v32 = vld [vmem:[#allocation18_spill] sm:$0xff]  ;;  %v8619_v34 = vld [vmem:[#allocation12_spill] sm:$0xff] }
  0xe3   : > { %vm8623_vm9 = vmmov %vm8562_vm0  ;;  %v7798_v1 = vld [vmem:[#allocation2 + $0xb1] sm:$0xff] }
  0xe5   : > { %5969 = vmatmul.mubr.msk.f32.gmra.mrb[30].mxu1 %vm8609_vm11, %v1972_v44  ;;  %6192 = vmatmul.mubr.msk.f32.gmra.mrb[12].mxu0 %vm8610_vm12, %v3985_v51  ;;  %vm8618_vm11 = vmmov %vm8562_vm0  ;;  %vm8620_vm12 = vnez %v8619_v34  ;;  %v8621_v44 = vld [vmem:[#allocation17_spill] sm:$0xff]  ;;  %v8629_v34 = vld [vmem:[#allocation22_spill] sm:$0xff] }
  0xe6   : > { %5973 = vmatprep.mubr.msk.f32.mxu1 %vm8615_vm14, %v8614_v7  ;;  %6194 = vmatprep.mubr.msk.f32.mxu0 %vm8616_vm13, %v7769_v48  ;;  %v8622_v51 = vsel %vm8620_vm12, %v8621_v44, 0.0  ;;  %vm8624_vm14 = vmmov %vm8562_vm0  ;;  %v8625_v7 = vld [vmem:[#allocation23_spill] sm:$0xff] }
  0xe7   : > { %vm8626_vm13 = vmmov %vm8562_vm0 }
  0xe8   : > { %vm8631_vm12 = vmmov %vm8562_vm0 }
  0xe9   : > { %5974 = vmatmul.mubr.msk.f32.vlgmr.msra.gmra.mrb[0].mxu1 %vm8562_vm0, %v8617_v32  ;;  %6195 = vmatmul.mubr.msk.f32.gmra.mrb[14].mxu0 %vm8618_vm11, %v7780_v13  ;;  %v8627_v32 = vld [vmem:[#allocation16_spill] sm:$0xff] }
  0xea   : > { %5976 = vmatprep.mubr.msk.f32.mxu1 %vm8623_vm9, %v8622_v51  ;;  %6197 = vmatprep.mubr.msk.f32.mxu0 %vm8624_vm14, %v7782_v23  ;;  %vm8628_vm11 = vnez %v8627_v32  ;;  %vm8632_vm9 = vmmov %vm8562_vm0  ;;  %v7811_v51 = vld [vmem:[#allocation2 + $0xb9] sm:$0xff] }
  0xeb   : > { %6272 = vmatpush3.msra.mxu1 %v7625_v9  ;;  %v8630_v44 = vsel %vm8628_vm11, %v8629_v34, 0.0  ;;  %v7813_v9 = vld [vmem:[#allocation2 + $0xc1] sm:$0xff]  ;;  %vm8634_vm14 = vmmov %vm8562_vm0  ;;  %v7826_v34 = vld [vmem:[#allocation2 + $0xc9] sm:$0xff] }
  0xec   : > { %vm8639_vm11 = vmmov %vm8632_vm9 }
  0xed   : > { %5977 = vmatmul.mubr.msk.f32.gmra.mrb[2].mxu1 %vm8626_vm13, %v8625_v7  ;;  %6198 = vmatmul.mubr.msk.f32.gmra.mrb[16].mxu0 %vm8562_vm0, %v7795_v46  ;;  %vm8635_vm13 = vmmov %vm8562_vm0  ;;  %vm8636_vm0 = vnez %v8413_v43  ;;  %v8637_v7 = vld [vmem:[#allocation27_spill] sm:$0xff] }
  0xee   : > { %5979 = vmatprep.mubr.msk.f32.mxu1 %vm8631_vm12, %v8630_v44  ;;  %6200 = vmatprep.mubr.msk.f32.mxu0 %vm8632_vm9, %v7798_v1  ;;  %v8638_v32 = vsel %vm8636_vm0, %v8637_v7, 0.0  ;;  %vm8640_vm12 = vmmov %vm8632_vm9  ;;  %v7828_v44 = vld [vmem:[#allocation2 + $0xd1] sm:$0xff]  ;;  %v8649_v7 = vld [vmem:[#allocation6_spill] sm:$0xff] }
  0xef   : > { %vm8646_vm0 = vmmov %vm8632_vm9 }
  0xf0   : > { %vm8650_vm7 = vmmov %vm8646_vm0 }
  0xf1   : > { %5980 = vmatmul.mubr.msk.f32.gmra.mrb[4].mxu1 %vm8634_vm14, %v8633_v36  ;;  %6201 = vmatmul.mubr.msk.f32.gmra.mrb[18].mxu0 %vm8635_vm13, %v7811_v51  ;;  %vm8642_vm14 = vmmov %vm8632_vm9  ;;  %vm8643_vm13 = vnez %v8422_v18  ;;  %v8644_v36 = vld [vmem:[#allocation32_spill] sm:$0xff]  ;;  %v8655_v18 = vld [vmem:[#allocation7_spill] sm:$0xff] }
  0xf2   : > { %5982 = vmatprep.mubr.msk.f32.mxu1 %vm8639_vm11, %v8638_v32  ;;  %6203 = vmatprep.mubr.msk.f32.mxu0 %vm8640_vm12, %v7813_v9  ;;  %v8645_v43 = vsel %vm8643_vm13, %v8644_v36, 0.0  ;;  %vm8647_vm11 = vmmov %vm8646_vm0  ;;  %v8657_v36 = vld [vmem:[#allocation42_spill] sm:$0xff] }
  0xf3   : > { %vm8648_vm12 = vmmov %vm8646_vm0 }
  0xf4   : > { %vm8656_vm6 = vmmov %vm8646_vm0 }
  0xf5   : > { %5983 = vmatmul.mubr.msk.f32.gmra.mrb[6].mxu1 %vm8632_vm9, %v8641_v20  ;;  %6204 = vmatmul.mubr.msk.f32.gmra.mrb[20].mxu0 %vm8642_vm14, %v7826_v34  ;;  %vm8651_vm9 = vnez %v8435_v5  ;;  %v8652_v20 = vld [vmem:[#allocation37_spill] sm:$0xff]  ;;  %vm8654_vm14 = vmmov %vm8646_vm0 }
  0xf6   : > { %5985 = vmatprep.mubr.msk.f32.mxu1 %vm8646_vm0, %v8645_v43  ;;  %6206 = vmatprep.mubr.msk.f32.mxu0 %vm8647_vm11, %v7828_v44  ;;  %v8653_v32 = vsel %vm8651_vm9, %v8652_v20, 0.0  ;;  %vm8658_vm13 = vmmov %vm8646_vm0  ;;  %v8659_v43 = vld [vmem:[#allocation8_spill] sm:$0xff]  ;;  %vm8660_vm11 = vnez %v8447_v54  ;;  %v8664_v5 = vld [vmem:[#allocation9_spill] sm:$0xff] }
  0xf7   : > { %vm8666_vm9 = vmmov %vm8646_vm0  ;;  %v8667_v20 = vld [vmem:[#allocation11_spill] sm:$0xff] }
  0xf8   : > { %v7876_v54 = vld [vmem:[#allocation2 + $0x109] sm:$0xff]  ;;  %vm8691_vm3 = vmmov %vm8646_vm0 }
  0xf9   : > { %5986 = vmatmul.mubr.msk.f32.gmra.mrb[8].mxu1 %vm8648_vm12, %v7340_v28  ;;  %6207 = vmatmul.mubr.msk.f32.gmra.mrb[22].mxu0 %vm8650_vm7, %v8649_v7  ;;  %v8661_v28 = vld [vmem:[#allocation41_spill] sm:$0xff]  ;;  %vm8663_vm7 = vmmov %vm8646_vm0 }
  0xfa   : > { %5988 = vmatprep.mubr.msk.f32.mxu1 %vm8654_vm14, %v8653_v32  ;;  %6209 = vmatprep.mubr.msk.f32.mxu0 %vm8656_vm6, %v8655_v18  ;;  %v8662_v55 = vsel %vm8660_vm11, %v8661_v28, 0.0  ;;  %vm8665_vm12 = vmmov %vm8646_vm0  ;;  %v7863_v7 = vld [vmem:[#allocation2 + $0x101] sm:$0xff]  ;;  %v8669_v32 = vsel %vm7357_vm5, %v7393_v35, 0.0  ;;  %v4003_v35 = vld [vmem:[#allocation2 + $0x119] sm:$0xff] }
  0xfb   : > { %vm8668_vm6 = vmmov %vm8646_vm0  ;;  %v4360_v18 = vld [vmem:[#allocation2 + $0x2a] sm:$0xff]  ;;  %v8754_v28 = vld [vmem:[#allocation44_spill] sm:$0xff] }
  0xfc   : > { %vm8670_vm14 = vmmov %vm8646_vm0  ;;  %v4392_v50 = vsel %vm8681_vm4, %v4360_v18, 0.0 }
  0xfd   : > { %5989 = vmatmul.mubr.msk.f32.gmra.mrb[10].mxu1 %vm8658_vm13, %v8657_v36  ;;  %6210 = vmatmul.mubr.msk.f32.gmra.mrb[24].mxu0 %vm8646_vm0, %v8659_v43  ;;  %vm8671_vm13 = vmmov %vm8646_vm0  ;;  %v4362_v36 = vld [vmem:[#allocation2 + $0x3a] sm:$0xff] }
  0xfe   : > { %5991 = vmatprep.mubr.msk.f32.mxu1 %vm8663_vm7, %v8662_v55  ;;  %6212 = vmatprep.mubr.msk.f32.mxu0 %vm8665_vm12, %v8664_v5  ;;  %v4002_v55 = vld [vmem:[#allocation2 + $0x111] sm:$0xff]  ;;  %vm8672_vm11 = vmmov %vm8646_vm0  ;;  %v4366_v43 = vld [vmem:[#allocation2 + $0x5a] sm:$0xff] }
  0xff   : > { %vm8674_vm7 = vmmov %vm8646_vm0 }
 0x100   : > { %vm8675_vm5 = vmmov %vm8646_vm0 }
 0x101   : > { %5992 = vmatmul.mubr.msk.f32.gmra.mrb[12].mxu1 %vm8666_vm9, %v7405_v17  ;;  %6213 = vmatmul.mubr.msk.f32.gmra.mrb[26].mxu0 %vm8668_vm6, %v8667_v20  ;;  %v4359_v17 = vld [vmem:[#allocation2 + $0x22] sm:$0xff]  ;;  %vm8676_vm12 = vmmov %vm8646_vm0  ;;  %v4390_v20 = vld [vmem:[#allocation2 + $0x11a] sm:$0xff] }
 0x102   : > { %5994 = vmatprep.mubr.msk.f32.mxu1 %vm8670_vm14, %v8669_v32  ;;  %6215 = vmatprep.mubr.msk.f32.mxu0 %vm8671_vm13, %v7863_v7  ;;  %vm8677_vm9 = vmmov %vm8646_vm0 }
 0x103   : > { %vm8679_vm6 = vmmov %vm8646_vm0 }
 0x104   : > { %vm8680_vm14 = vmmov %vm8646_vm0 }
 0x105   : > { %5995 = vmatmul.mubr.msk.f32.gmra.mrb[14].mxu1 %vm8646_vm0, %v7437_v29  ;;  %6216 = vmatmul.mubr.msk.f32.gmra.mrb[28].mxu0 %vm8672_vm11, %v7876_v54  ;;  %v8678_v29 = vsel %vm7421_vm15, %v7452_v3, 0.0  ;;  %vm8682_vm13 = vmmov %vm8646_vm0 }
 0x106   : > { %5997 = vmatprep.mubr.msk.f32.mxu1 %vm8674_vm7, %v8673_v62  ;;  %6218 = vmatprep.mubr.msk.f32.mxu0 %vm8675_vm5, %v4002_v55  ;;  %vm8684_vm11 = vmmov %vm8646_vm0  ;;  %vm8686_vm7 = vnez %v8373_v47  ;;  %v2384_v47 = vsel %vm7502_vm8, %v7530_v12, 0.0  ;;  %v4368_v12 = vld [vmem:[#allocation2 + $0x6a] sm:$0xff] }
 0x107   : > { %vm8685_vm15 = vmmov %vm8646_vm0  ;;  %v4394_v3 = vsel %vm8686_vm7, %v4362_v36, 0.0  ;;  %v4400_v52 = vsel %vm8540_vm1, %v4368_v12, 0.0  ;;  %vm8708_vm1 = vnez %v8510_v58 }
 0x108   : > { %vm8687_vm5 = vmmov %vm8646_vm0  ;;  %v2390_v14 = vsel %vm8708_vm1, %v7676_v24, 0.0  ;;  %v4377_v24 = vld [vmem:[#allocation2 + $0xb2] sm:$0xff] }
 0x109   : > { %5998 = vmatmul.mubr.msk.f32.gmra.mrb[16].mxu1 %vm8676_vm12, %v7463_v4  ;;  %6219 = vmatmul.mubr.msk.f32.gmra.mrb[30].mxu0 %vm8677_vm9, %v4003_v35  ;;  %v4364_v4 = vld [vmem:[#allocation2 + $0x4a] sm:$0xff]  ;;  %vm8688_vm12 = vmmov %vm8646_vm0 }
 0x10a   : > { %6000 = vmatprep.mubr.msk.f32.mxu1 %vm8679_vm6, %v8678_v29  ;;  %6223 = vmatprep.mubr.msk.f32.mxu0 %vm8680_vm14, %v4359_v17  ;;  %vm8690_vm9 = vmmov %vm8646_vm0  ;;  %vm8692_vm6 = vnez %v8375_v57  ;;  %v2386_v57 = vsel %vm7526_vm10, %v7551_v31, 0.0  ;;  %v4370_v31 = vld [vmem:[#allocation2 + $0x7a] sm:$0xff] }
 0x10b   : > { %v4396_v37 = vsel %vm8692_vm6, %v4364_v4, 0.0  ;;  %vm8693_vm14 = vmmov %vm8646_vm0  ;;  %vm8707_vm6 = vnez %v8383_v21  ;;  %v4373_v21 = vld [vmem:[#allocation2 + $0x92] sm:$0xff] }
 0x10c   : > { %vm8694_vm4 = vmmov %vm8646_vm0 }
 0x10d   : > { %6001 = vmatmul.mubr.msk.f32.gmra.mrb[18].mxu1 %vm8682_vm13, %v7492_v0  ;;  %6224 = vmatmul.mubr.msk.f32.vlgmr.msra.gmra.mrb[0].mxu0 %vm8646_vm0, %v4392_v50  ;;  %v4365_v0 = vld [vmem:[#allocation2 + $0x52] sm:$0xff]  ;;  %vm8695_vm13 = vmmov %vm8646_vm0 }
 0x10e   : > { %6003 = vmatprep.mubr.msk.f32.mxu1 %vm8684_vm11, %v8683_v60  ;;  %6226 = vmatprep.mubr.msk.f32.mxu0 %vm8685_vm15, %v4361_v19  ;;  %vm8696_vm2 = vmmov %vm8646_vm0  ;;  %vm8697_vm0 = vnez %v8377_v6 }
 0x10f   : > { %v4398_v10 = vsel %vm8697_vm0, %v4366_v43, 0.0  ;;  %vm8698_vm8 = vmmov %vm8696_vm2  ;;  %vm8712_vm0 = vnez %v8387_v33 }
 0x110   : > { %vm8699_vm11 = vmmov %vm8696_vm2 }
 0x111   : > { %6004 = vmatmul.mubr.msk.f32.gmra.mrb[20].mxu1 %vm8687_vm5, %v7518_v11  ;;  %6227 = vmatmul.mubr.msk.f32.gmra.mrb[2].mxu0 %vm8688_vm12, %v4394_v3  ;;  %vm8700_vm15 = vmmov %vm8696_vm2  ;;  %vm8702_vm5 = vnez %v8505_v53  ;;  %v4402_v11 = vsel %vm8707_vm6, %v4370_v31, 0.0  ;;  %vm8722_vm6 = vnez %v8400_v8 }
 0x112   : > { %6006 = vmatprep.mubr.msk.f32.mxu1 %vm8690_vm9, %v8689_v26  ;;  %6229 = vmatprep.mubr.msk.f32.mxu0 %vm8691_vm3, %v4363_v41  ;;  %vm8701_vm7 = vmmov %vm8696_vm2  ;;  %v2388_v6 = vsel %vm8702_vm5, %v7571_v61, 0.0  ;;  %v4372_v61 = vld [vmem:[#allocation2 + $0x8a] sm:$0xff]  ;;  %vm8717_vm5 = vnez %v8393_v45 }
 0x113   : > { %vm8703_vm10 = vmmov %vm8696_vm2  ;;  %v4404_v53 = vsel %vm8712_vm0, %v4372_v61, 0.0 }
 0x114   : > { %vm8704_vm12 = vmmov %vm8696_vm2 }
 0x115   : > { %6007 = vmatmul.mubr.msk.f32.gmra.mrb[22].mxu1 %vm8693_vm14, %v7539_v56  ;;  %6230 = vmatmul.mubr.msk.f32.gmra.mrb[4].mxu0 %vm8694_vm4, %v4396_v37  ;;  %vm8705_vm9 = vmmov %vm8696_vm2  ;;  %v4371_v56 = vld [vmem:[#allocation2 + $0x82] sm:$0xff] }
 0x116   : > { %6009 = vmatprep.mubr.msk.f32.mxu1 %vm8695_vm13, %v2384_v47  ;;  %6232 = vmatprep.mubr.msk.f32.mxu0 %vm8696_vm2, %v4365_v0  ;;  %vm8706_vm3 = vmmov %vm8696_vm2 }
 0x117   : > { %vm8709_vm14 = vmmov %vm8696_vm2 }
 0x118   : > { %vm8710_vm4 = vmmov %vm8696_vm2 }
 0x119   : > { %6010 = vmatmul.mubr.msk.f32.gmra.mrb[24].mxu1 %vm8698_vm8, %v7559_v27  ;;  %6233 = vmatmul.mubr.msk.f32.gmra.mrb[6].mxu0 %vm8699_vm11, %v4398_v10  ;;  %vm8711_vm13 = vmmov %vm8696_vm2  ;;  %v4374_v27 = vld [vmem:[#allocation2 + $0x9a] sm:$0xff] }
 0x11a   : > { %6012 = vmatprep.mubr.msk.f32.mxu1 %vm8700_vm15, %v2386_v57  ;;  %6235 = vmatprep.mubr.msk.f32.mxu0 %vm8701_vm7, %v4367_v25  ;;  %vm8713_vm8 = vmmov %vm8696_vm2  ;;  %v4406_v58 = vsel %vm8717_vm5, %v4374_v27, 0.0 }
 0x11b   : > { %vm8714_vm11 = vmmov %vm8696_vm2 }
 0x11c   : > { %vm8715_vm15 = vmmov %vm8696_vm2 }
 0x11d   : > { %6013 = vmatmul.mubr.msk.f32.gmra.mrb[26].mxu1 %vm8703_vm10, %v7579_v38  ;;  %6236 = vmatmul.mubr.msk.f32.gmra.mrb[8].mxu0 %vm8704_vm12, %v4400_v52  ;;  %vm8716_vm7 = vmmov %vm8696_vm2  ;;  %v4375_v38 = vld [vmem:[#allocation2 + $0xa2] sm:$0xff] }
 0x11e   : > { %6015 = vmatprep.mubr.msk.f32.mxu1 %vm8705_vm9, %v2388_v6  ;;  %6238 = vmatprep.mubr.msk.f32.mxu0 %vm8706_vm3, %v4369_v39  ;;  %vm8718_vm10 = vmmov %vm8696_vm2 }
 0x11f   : > { %vm8719_vm12 = vmmov %vm8696_vm2 }
 0x120   : > { %vm8720_vm9 = vmmov %vm8696_vm2 }
 0x121   : > { %6016 = vmatmul.mubr.msk.f32.gmra.mrb[28].mxu1 %vm8709_vm14, %v7593_v16  ;;  %6239 = vmatmul.mubr.msk.f32.gmra.mrb[10].mxu0 %vm8710_vm4, %v4402_v11  ;;  %v4376_v16 = vld [vmem:[#allocation2 + $0xaa] sm:$0xff]  ;;  %vm8721_vm3 = vmmov %vm8696_vm2 }
 0x122   : > { %6018 = vmatprep.mubr.msk.f32.mxu1 %vm8711_vm13, %v2390_v14  ;;  %6241 = vmatprep.mubr.msk.f32.mxu0 %vm8696_vm2, %v4371_v56  ;;  %v4408_v33 = vsel %vm8722_vm6, %v4376_v16, 0.0  ;;  %vm8723_vm1 = vmmov %vm8696_vm2  ;;  %vm8727_vm2 = vnez %v8564_v42  ;;  %v2772_v42 = vld [vmem:[#allocation2 + $0xd9] sm:$0xff] }
 0x123   : > { %vm8724_vm14 = vmmov %vm8723_vm1 }
 0x124   : > { %vm8725_vm4 = vmmov %vm8723_vm1 }
 0x125   : > { %6019 = vmatmul.mubr.msk.f32.gmra.mrb[30].mxu1 %vm8713_vm8, %v7699_v22  ;;  %6242 = vmatmul.mubr.msk.f32.gmra.mrb[12].mxu0 %vm8714_vm11, %v4404_v53  ;;  %v4378_v22 = vld [vmem:[#allocation2 + $0xba] sm:$0xff]  ;;  %vm8726_vm13 = vmmov %vm8723_vm1 }
 0x126   : > { %6047 = vmatprep.mubr.msk.f32.mxu1 %vm8715_vm15, %v7769_v48  ;;  %6244 = vmatprep.mubr.msk.f32.mxu0 %vm8716_vm7, %v4373_v21  ;;  %v4410_v45 = vsel %vm8727_vm2, %v4378_v22, 0.0  ;;  %v4379_v48 = vld [vmem:[#allocation2 + $0xc2] sm:$0xff]  ;;  %vm8728_vm0 = vmmov %vm8723_vm1  ;;  %vm8732_vm7 = vnez %v8571_v59 }
 0x127   : > { %vm8729_vm8 = vmmov %vm8728_vm0  ;;  %v2774_v59 = vld [vmem:[#allocation2 + $0xe9] sm:$0xff] }
 0x128   : > { %vm8730_vm11 = vmmov %vm8728_vm0 }
 0x129   : > { %6048 = vmatmul.mubr.msk.f32.vlgmr.msra.gmra.mrb[16].mxu1 %vm8718_vm10, %v7780_v13  ;;  %6245 = vmatmul.mubr.msk.f32.gmra.mrb[14].mxu0 %vm8719_vm12, %v4406_v58  ;;  %v4380_v13 = vld [vmem:[#allocation2 + $0xca] sm:$0xff]  ;;  %vm8731_vm15 = vmmov %vm8728_vm0 }
 0x12a   : > { %6050 = vmatprep.mubr.msk.f32.mxu1 %vm8720_vm9, %v7782_v23  ;;  %6247 = vmatprep.mubr.msk.f32.mxu0 %vm8721_vm3, %v4375_v38  ;;  %v4412_v8 = vsel %vm8732_vm7, %v4380_v13, 0.0  ;;  %v4381_v23 = vld [vmem:[#allocation2 + $0xd2] sm:$0xff]  ;;  %vm8733_vm5 = vmmov %vm8728_vm0  ;;  %vm8737_vm3 = vnez %v8579_v2 }
 0x12b   : > { %vm8734_vm10 = vmmov %vm8728_vm0  ;;  %v2776_v2 = vld [vmem:[#allocation2 + $0xf9] sm:$0xff] }
 0x12c   : > { %vm8735_vm12 = vmmov %vm8728_vm0 }
 0x12d   : > { %6051 = vmatmul.mubr.msk.f32.gmra.mrb[18].mxu1 %vm8723_vm1, %v7795_v46  ;;  %6248 = vmatmul.mubr.msk.f32.gmra.mrb[16].mxu0 %vm8724_vm14, %v4408_v33  ;;  %v4382_v46 = vld [vmem:[#allocation2 + $0xda] sm:$0xff]  ;;  %vm8736_vm9 = vmmov %vm8728_vm0 }
 0x12e   : > { %6053 = vmatprep.mubr.msk.f32.mxu1 %vm8725_vm4, %v7798_v1  ;;  %6250 = vmatprep.mubr.msk.f32.mxu0 %vm8726_vm13, %v4377_v24  ;;  %v4414_v1 = vsel %vm8737_vm3, %v4382_v46, 0.0  ;;  %vm8738_vm6 = vmmov %vm8728_vm0  ;;  %vm8742_vm13 = vnez %v8586_v30  ;;  %v8751_v30 = vld [vmem:[#allocation46_spill] sm:$0xff] }
 0x12f   : > { %vm8739_vm1 = vmmov %vm8728_vm0 }
 0x130   : > { %vm8740_vm14 = vmmov %vm8728_vm0 }
 0x131   : > { %6054 = vmatmul.mubr.msk.f32.gmra.mrb[20].mxu1 %vm8728_vm0, %v7811_v51  ;;  %6251 = vmatmul.mubr.msk.f32.gmra.mrb[18].mxu0 %vm8729_vm8, %v4410_v45  ;;  %v2773_v51 = vld [vmem:[#allocation2 + $0xe1] sm:$0xff]  ;;  %vm8741_vm4 = vmmov %vm8728_vm0 }
 0x132   : > { %6056 = vmatprep.mubr.msk.f32.mxu1 %vm8730_vm11, %v7813_v9  ;;  %6253 = vmatprep.mubr.msk.f32.mxu0 %vm8731_vm15, %v4379_v48  ;;  %v4416_v9 = vsel %vm8742_vm13, %v8600_v63, 0.0  ;;  %vm8743_vm2 = vmmov %vm8728_vm0  ;;  %v8753_v63 = vld [vmem:[#allocation48_spill] sm:$0xff] }
 0x133   : > { %vm8744_vm8 = vmmov %vm8728_vm0 }
 0x134   : > { %vm8745_vm11 = vmmov %vm8728_vm0 }
 0x135   : > { %6057 = vmatmul.mubr.msk.f32.gmra.mrb[22].mxu1 %vm8733_vm5, %v7826_v34  ;;  %6254 = vmatmul.mubr.msk.f32.gmra.mrb[20].mxu0 %vm8734_vm10, %v4412_v8  ;;  %v2775_v34 = vld [vmem:[#allocation2 + $0xf1] sm:$0xff]  ;;  %vm8748_vm7 = vmmov %vm8728_vm0 }
 0x136   : > { %6059 = vmatprep.mubr.msk.f32.mxu1 %vm8735_vm12, %v7828_v44  ;;  %6256 = vmatprep.mubr.msk.f32.mxu0 %vm8736_vm9, %v4381_v23  ;;  %v8746_v44 = vld [vmem:[#allocation39_spill] sm:$0xff]  ;;  %vm8749_vm5 = vmmov %vm8728_vm0  ;;  %vm8755_vm9 = vnez %v8754_v28 }
 0x137   : > { %vm8747_vm15 = vnez %v8746_v44  ;;  %vm8750_vm10 = vmmov %vm8728_vm0  ;;  %v4420_v5 = vsel %vm8755_vm9, %v8753_v63, 0.0 }
 0x138   : > { %vm8752_vm12 = vmmov %vm8728_vm0 }
 0x139   : > { %6060 = vmatmul.mubr.msk.f32.gmra.mrb[24].mxu1 %vm8738_vm6, %v2772_v42  ;;  %6257 = vmatmul.mubr.msk.f32.gmra.mrb[22].mxu0 %vm8739_vm1, %v4414_v1  ;;  %vm8756_vm3 = vmmov %vm8728_vm0 }
 0x13a   : > { %6062 = vmatprep.mubr.msk.f32.mxu1 %vm8740_vm14, %v2773_v51  ;;  %6259 = vmatprep.mubr.msk.f32.mxu0 %vm8741_vm4, %v8597_v15  ;;  %v4418_v15 = vsel %vm8747_vm15, %v8607_v40, 0.0  ;;  %vm8757_vm6 = vmmov %vm8728_vm0  ;;  %v8759_v40 = vld [vmem:[#allocation47_spill] sm:$0xff] }
 0x13b   : > { %vm8758_vm1 = vmmov %vm8728_vm0  ;;  %vm8760_vm14 = vnez %v8759_v40 }
 0x13c   : > { %v4422_v32 = vsel %vm8760_vm14, %v4390_v20, 0.0  ;;  %vm8761_vm4 = vmmov %vm8728_vm0 }
 0x13d   : > { %6063 = vmatmul.mubr.msk.f32.gmra.mrb[26].mxu1 %vm8743_vm2, %v2774_v59  ;;  %6260 = vmatmul.mubr.msk.f32.gmra.mrb[24].mxu0 %vm8728_vm0, %v4416_v9  ;;  %vm8762_vm13 = vmmov %vm8728_vm0 }
 0x13e   : > { %6065 = vmatprep.mubr.msk.f32.mxu1 %vm8744_vm8, %v2775_v34  ;;  %6262 = vmatprep.mubr.msk.f32.mxu0 %vm8745_vm11, %v8605_v49  ;;  %v4389_v49 = vld [vmem:[#allocation2 + $0x112] sm:$0xff]  ;;  %vm8763_vm2 = vmmov %vm8728_vm0 }
 0x13f   : > { %vm8764_vm8 = vmmov %vm8728_vm0 }
 0x140   : > { %vm8765_vm11 = vmmov %vm8728_vm0 }
 0x141   : > { %6066 = vmatmul.mubr.msk.f32.gmra.mrb[28].mxu1 %vm8748_vm7, %v2776_v2  ;;  %6263 = vmatmul.mubr.msk.f32.gmra.mrb[26].mxu0 %vm8749_vm5, %v4418_v15  ;;  %vm8766_vm15 = vmmov %vm8728_vm0 }
 0x142   : > { %6068 = vmatprep.mubr.msk.f32.mxu1 %vm8750_vm10, %v7863_v7  ;;  %6265 = vmatprep.mubr.msk.f32.mxu0 %vm8752_vm12, %v8751_v30  ;;  %vm8767_vm7 = vmmov %vm8728_vm0 }
 0x143   : > { %vm8768_vm5 = vmmov %vm8728_vm0 }
 0x144   : > { %vm8769_vm10 = vmmov %vm8728_vm0 }
 0x145   : > { %6069 = vmatmul.mubr.msk.f32.gmra.mrb[30].mxu1 %vm8756_vm3, %v7876_v54  ;;  %6266 = vmatmul.mubr.msk.f32.gmra.mrb[28].mxu0 %vm8757_vm6, %v4420_v5  ;;  %vm8770_vm12 = vmmov %vm8728_vm0 }
 0x146   : > { %6268 = vmatprep.mubr.msk.f32.mxu0 %vm8758_vm1, %v4389_v49  ;;  %vm8771_vm9 = vmmov %vm8728_vm0 }
 0x147   : > { %vm8772_vm3 = vmmov %vm8728_vm0 }
 0x148   : > { %vm8773_vm6 = vmmov %vm8728_vm0 }
 0x149   : > { %6269 = vmatmul.mubr.msk.f32.gmra.mrb[30].mxu0 %vm8761_vm4, %v4422_v32  ;;  %vm8774_vm1 = vmmov %vm8728_vm0 }
 0x14a   : > { %vm8775_vm14 = vmmov %vm8728_vm0 }
 0x14b   : > { %vm8776_vm4 = vmmov %vm8728_vm0 }
 0x1bc   : > { %v5975_v7 = vpop.f32.mrb[0].mxu1 }
 0x1bd   : > { %v2556_v55 = vpop.f32.mrb[1].mxu1 }
 0x1c0   : > { %v5978_v62 = vpop.f32.mrb[2].mxu1 }
 0x1c1   : > { %v2566_v35 = vpop.f32.mrb[3].mxu1 }
 0x1c4   : > { %v5981_v17 = vpop.f32.mrb[4].mxu1 }
 0x1c5   : > { %v2576_v18 = vpop.f32.mrb[5].mxu1 }
 0x1c8   : > { %v5984_v29 = vpop.f32.mrb[6].mxu1 }
 0x1c9   : > { %v2586_v54 = vpop.f32.mrb[7].mxu1 }
 0x1cc   : > { %v8033_v50 = vpop.f32.mrb[8].mxu1 }
 0x1cd   : > { %v8035_v19 = vpop.f32.mrb[9].mxu1 }
 0x1d0   : > { %v8037_v36 = vpop.f32.mrb[10].mxu1 }
 0x1d1   : > { %v8039_v60 = vpop.f32.mrb[11].mxu1 }
 0x1d4   : > { %v8041_v3 = vpop.f32.mrb[12].mxu1 }
 0x1d5   : > { %v8043_v41 = vpop.f32.mrb[13].mxu1 }
 0x1d8   : > { %v8045_v4 = vpop.f32.mrb[14].mxu1 }
 0x1d9   : > { %v8047_v26 = vpop.f32.mrb[15].mxu1 }
 0x1e0   : > { %v6225_v37 = vpop.f32.mrb[0].mxu0 }
 0x1e1   : > { %v6273_v47 = vadd.f32 %v6225_v37, %v5975_v7  ;;  %v4587_v0 = vpop.f32.mrb[1].mxu0 }
 0x1e2   : > { %v6274_v43 = vadd.f32 %v4587_v0, %v2556_v55 }
 0x1e3   : > { %4779 = vst.msk [vmem:[%s8057_s17 + $0x8] sm:$0xff] %vm8762_vm13, %v6273_v47  ;;  %v4816_v10 = vsel %vm8728_vm0, %v6273_v47, 0.0  ;;  %v4885_v57 = vmul.f32 %v6273_v47, %v6273_v47  ;;  %vm8777_vm13 = vmmov %vm8728_vm0 }
 0x1e4   : > { %4811 = vst.msk [vmem:[%s8061_s18 + $0x8] sm:$0xff] %vm8763_vm2, %v6273_v47  ;;  %v4815_v25 = vsel %vm8766_vm15, %v6274_v43, 0.0  ;;  %v4884_v12 = vmul.f32 %v6274_v43, %v6274_v43  ;;  %v6228_v52 = vpop.f32.mrb[2].mxu0  ;;  %vm8778_vm2 = vmmov %vm8728_vm0 }
 0x1e5   : > { %4778 = vst.msk [vmem:[%s8057_s17] sm:$0xff] %vm8764_vm8, %v6274_v43  ;;  %v4917_v6 = vsel %vm8767_vm7, %v4885_v57, 0.0  ;;  %v6275_v39 = vadd.f32 %v6228_v52, %v5978_v62  ;;  %v4597_v31 = vpop.f32.mrb[3].mxu0  ;;  %v4817_v11 = vadd.f32 %v4816_v10, %v4815_v25  ;;  %vm8779_vm8 = vmmov %vm8728_vm0 }
 0x1e6   : > { %4810 = vst.msk [vmem:[%s8061_s18] sm:$0xff] %vm8765_vm11, %v6274_v43  ;;  %v4916_v14 = vsel %vm8768_vm5, %v4884_v12, 0.0  ;;  %v6276_v56 = vadd.f32 %v4597_v31, %v2566_v35  ;;  %vm8780_vm11 = vmmov %vm8728_vm0 }
 0x1e7   : > { %4781 = vst.msk [vmem:[%s8057_s17 + $0x18] sm:$0xff] %vm8769_vm10, %v6275_v39  ;;  %v4918_v61 = vadd.f32 %v4917_v6, %v4916_v14  ;;  %v4887_v53 = vmul.f32 %v6275_v39, %v6275_v39  ;;  %v4820_v24 = vsel %vm8772_vm3, %v6275_v39, 0.0  ;;  %vm8781_vm15 = vmmov %vm8728_vm0 }
 0x1e8   : > { %4780 = vst.msk [vmem:[%s8057_s17 + $0x10] sm:$0xff] %vm8770_vm12, %v6276_v56  ;;  %v4818_v21 = vsel %vm8771_vm9, %v6276_v56, 0.0  ;;  %v4886_v27 = vmul.f32 %v6276_v56, %v6276_v56  ;;  %v6231_v58 = vpop.f32.mrb[4].mxu0  ;;  %vm8782_vm7 = vmmov %vm8728_vm0 }
 0x1e9   : > { %v4819_v38 = vadd.f32 %v4818_v21, %v4817_v11  ;;  %v6277_v16 = vadd.f32 %v6231_v58, %v5981_v17  ;;  %v4607_v33 = vpop.f32.mrb[5].mxu0  ;;  %v4921_v8 = vsel %vm8775_vm14, %v4887_v53, 0.0  ;;  %vm8783_vm5 = vmmov %vm8728_vm0 }
 0x1ea   : > { %v4919_v22 = vsel %vm8773_vm6, %v4886_v27, 0.0  ;;  %v6278_v45 = vadd.f32 %v4607_v33, %v2576_v18  ;;  %vm8784_vm10 = vmmov %vm8728_vm0 }
 0x1eb   : > { %v4920_v48 = vadd.f32 %v4919_v22, %v4918_v61  ;;  %4783 = vst.msk [vmem:[%s8057_s17 + $0x28] sm:$0xff] %vm8774_vm1, %v6277_v16  ;;  %v4821_v13 = vadd.f32 %v4820_v24, %v4819_v38  ;;  %v4889_v23 = vmul.f32 %v6277_v16, %v6277_v16  ;;  %v4824_v2 = vsel %vm8778_vm2, %v6277_v16, 0.0  ;;  %vm8785_vm12 = vmmov %vm8728_vm0 }
 0x1ec   : > { %4782 = vst.msk [vmem:[%s8057_s17 + $0x20] sm:$0xff] %vm8776_vm4, %v6278_v45  ;;  %v4822_v46 = vsel %vm8777_vm13, %v6278_v45, 0.0  ;;  %v4888_v42 = vmul.f32 %v6278_v45, %v6278_v45  ;;  %v6234_v1 = vpop.f32.mrb[6].mxu0  ;;  %vm8786_vm9 = vmmov %vm8728_vm0 }
 0x1ed   : > { %v4823_v51 = vadd.f32 %v4822_v46, %v4821_v13  ;;  %v4922_v59 = vadd.f32 %v4921_v8, %v4920_v48  ;;  %v6279_v9 = vadd.f32 %v6234_v1, %v5984_v29  ;;  %v4617_v34 = vpop.f32.mrb[7].mxu0  ;;  %v4925_v28 = vsel %vm8780_vm11, %v4889_v23, 0.0  ;;  %vm8787_vm3 = vmmov %vm8728_vm0 }
 0x1ee   : > { %v4923_v44 = vsel %vm8728_vm0, %v4888_v42, 0.0  ;;  %v6280_v15 = vadd.f32 %v4617_v34, %v2586_v54  ;;  %vm8788_vm6 = vmmov %vm8728_vm0 }
 0x1ef   : > { %v4924_v30 = vadd.f32 %v4923_v44, %v4922_v59  ;;  %4785 = vst.msk [vmem:[%s8057_s17 + $0x38] sm:$0xff] %vm8779_vm8, %v6279_v9  ;;  %v4825_v63 = vadd.f32 %v4824_v2, %v4823_v51  ;;  %v4891_v5 = vmul.f32 %v6279_v9, %v6279_v9  ;;  %v4828_v35 = vsel %vm8783_vm5, %v6279_v9, 0.0  ;;  %vm8789_vm1 = vmmov %vm8728_vm0 }
 0x1f0   : > { %4784 = vst.msk [vmem:[%s8057_s17 + $0x30] sm:$0xff] %vm8781_vm15, %v6280_v15  ;;  %v4826_v49 = vsel %vm8782_vm7, %v6280_v15, 0.0  ;;  %v4890_v20 = vmul.f32 %v6280_v15, %v6280_v15  ;;  %v6237_v40 = vpop.f32.mrb[8].mxu0  ;;  %vm8790_vm14 = vmmov %vm8728_vm0 }
 0x1f1   : > { %v4827_v32 = vadd.f32 %v4826_v49, %v4825_v63  ;;  %v4926_v7 = vadd.f32 %v4925_v28, %v4924_v30  ;;  %v6281_v55 = vadd.f32 %v6237_v40, %v8033_v50  ;;  %v4627_v62 = vpop.f32.mrb[9].mxu0  ;;  %v4929_v37 = vsel %vm8786_vm9, %v4891_v5, 0.0  ;;  %vm8791_vm4 = vmmov %vm8728_vm0 }
 0x1f2   : > { %v4927_v17 = vsel %vm8784_vm10, %v4890_v20, 0.0  ;;  %v6282_v18 = vadd.f32 %v4627_v62, %v8035_v19  ;;  %vm8792_vm13 = vmmov %vm8728_vm0 }
 0x1f3   : > { %v4928_v29 = vadd.f32 %v4927_v17, %v4926_v7  ;;  %4787 = vst.msk [vmem:[%s8057_s17 + $0x48] sm:$0xff] %vm8785_vm12, %v6281_v55  ;;  %v4829_v54 = vadd.f32 %v4828_v35, %v4827_v32  ;;  %v4893_v47 = vmul.f32 %v6281_v55, %v6281_v55  ;;  %v4832_v12 = vsel %vm8789_vm1, %v6281_v55, 0.0  ;;  %vm8793_vm2 = vmmov %vm8728_vm0 }
 0x1f4   : > { %4786 = vst.msk [vmem:[%s8057_s17 + $0x40] sm:$0xff] %vm8787_vm3, %v6282_v18  ;;  %v4830_v50 = vsel %vm8788_vm6, %v6282_v18, 0.0  ;;  %v4892_v0 = vmul.f32 %v6282_v18, %v6282_v18  ;;  %v6240_v43 = vpop.f32.mrb[10].mxu0  ;;  %vm8794_vm8 = vmmov %vm8728_vm0 }
 0x1f5   : > { %v4831_v10 = vadd.f32 %v4830_v50, %v4829_v54  ;;  %v4930_v57 = vadd.f32 %v4929_v37, %v4928_v29  ;;  %v6283_v25 = vadd.f32 %v6240_v43, %v8037_v36  ;;  %v4637_v19 = vpop.f32.mrb[11].mxu0  ;;  %v4933_v11 = vsel %vm8792_vm13, %v4893_v47, 0.0  ;;  %vm8795_vm11 = vmmov %vm8728_vm0 }
 0x1f6   : > { %v4931_v52 = vsel %vm8790_vm14, %v4892_v0, 0.0  ;;  %v6284_v6 = vadd.f32 %v4637_v19, %v8039_v60  ;;  %vm8796_vm15 = vmmov %vm8728_vm0 }
 0x1f7   : > { %v4932_v39 = vadd.f32 %v4931_v52, %v4930_v57  ;;  %4789 = vst.msk [vmem:[%s8057_s17 + $0x58] sm:$0xff] %vm8791_vm4, %v6283_v25  ;;  %v4833_v31 = vadd.f32 %v4832_v12, %v4831_v10  ;;  %v4895_v14 = vmul.f32 %v6283_v25, %v6283_v25  ;;  %v4836_v58 = vsel %vm8794_vm8, %v6283_v25, 0.0  ;;  %vm8797_vm7 = vmmov %vm8728_vm0 }
 0x1f8   : > { %4788 = vst.msk [vmem:[%s8057_s17 + $0x50] sm:$0xff] %vm8793_vm2, %v6284_v6  ;;  %v4834_v36 = vsel %vm8728_vm0, %v6284_v6, 0.0  ;;  %v4894_v56 = vmul.f32 %v6284_v6, %v6284_v6  ;;  %v6243_v61 = vpop.f32.mrb[12].mxu0  ;;  %vm8798_vm5 = vmmov %vm8728_vm0 }
 0x1f9   : > { %v4835_v53 = vadd.f32 %v4834_v36, %v4833_v31  ;;  %v4934_v21 = vadd.f32 %v4933_v11, %v4932_v39  ;;  %v6285_v27 = vadd.f32 %v6243_v61, %v8041_v3  ;;  %v4647_v60 = vpop.f32.mrb[13].mxu0  ;;  %v4937_v22 = vsel %vm8797_vm7, %v4895_v14, 0.0  ;;  %vm8799_vm10 = vmmov %vm8728_vm0 }
 0x1fa   : > { %v4935_v38 = vsel %vm8795_vm11, %v4894_v56, 0.0  ;;  %v6286_v16 = vadd.f32 %v4647_v60, %v8043_v41  ;;  %vm8800_vm12 = vmmov %vm8728_vm0 }
 0x1fb   : > { %v4936_v33 = vadd.f32 %v4935_v38, %v4934_v21  ;;  %4791 = vst.msk [vmem:[%s8057_s17 + $0x68] sm:$0xff] %vm8796_vm15, %v6285_v27  ;;  %v4837_v24 = vadd.f32 %v4836_v58, %v4835_v53  ;;  %v4897_v45 = vmul.f32 %v6285_v27, %v6285_v27  ;;  %v4840_v51 = vsel %vm8800_vm12, %v6285_v27, 0.0  ;;  %vm8801_vm9 = vmmov %vm8728_vm0 }
 0x1fc   : > { %4790 = vst.msk [vmem:[%s8057_s17 + $0x60] sm:$0xff] %vm8798_vm5, %v6286_v16  ;;  %v4838_v48 = vsel %vm8799_vm10, %v6286_v16, 0.0  ;;  %v4896_v3 = vmul.f32 %v6286_v16, %v6286_v16  ;;  %v6049_v13 = vpop.f32.mrb[16].mxu1  ;;  %v6246_v8 = vpop.f32.mrb[14].mxu0  ;;  %vm8802_vm3 = vmmov %vm8728_vm0 }
 0x1fd   : > { %v4839_v23 = vadd.f32 %v4838_v48, %v4837_v24  ;;  %v4938_v46 = vadd.f32 %v4937_v22, %v4936_v33  ;;  %v6287_v41 = vadd.f32 %v6246_v8, %v8045_v4  ;;  %v3023_v42 = vpop.f32.mrb[17].mxu1  ;;  %v4657_v1 = vpop.f32.mrb[15].mxu0  ;;  %vm8803_vm6 = vmmov %vm8728_vm0 }
 0x1fe   : > { %v4939_v59 = vsel %vm8801_vm9, %v4896_v3, 0.0  ;;  %v6288_v9 = vadd.f32 %v4657_v1, %v8047_v26  ;;  %v4941_v44 = vsel %vm8803_vm6, %v4897_v45, 0.0  ;;  %vm8804_vm1 = vmmov %vm8728_vm0 }
 0x1ff   : > { %v4940_v34 = vadd.f32 %v4939_v59, %v4938_v46  ;;  %4793 = vst.msk [vmem:[%s8057_s17 + $0x78] sm:$0xff] %vm8802_vm3, %v6287_v41  ;;  %v4841_v2 = vadd.f32 %v4840_v51, %v4839_v23  ;;  %v4899_v15 = vmul.f32 %v6287_v41, %v6287_v41  ;;  %vm8805_vm14 = vmmov %vm8728_vm0 }
 0x200   : > { %4792 = vst.msk [vmem:[%s8057_s17 + $0x70] sm:$0xff] %vm8804_vm1, %v6288_v9  ;;  %v4842_v4 = vsel %vm8805_vm14, %v6288_v9, 0.0  ;;  %v4898_v30 = vmul.f32 %v6288_v9, %v6288_v9  ;;  %v6052_v63 = vpop.f32.mrb[18].mxu1  ;;  %v6249_v28 = vpop.f32.mrb[16].mxu0  ;;  %vm8806_vm4 = vmmov %vm8728_vm0 }
 0x201   : > { %v4843_v5 = vadd.f32 %v4842_v4, %v4841_v2  ;;  %v4942_v49 = vadd.f32 %v4941_v44, %v4940_v34  ;;  %v6289_v20 = vadd.f32 %v6249_v28, %v6049_v13  ;;  %v3033_v26 = vpop.f32.mrb[19].mxu1  ;;  %v4667_v40 = vpop.f32.mrb[17].mxu0  ;;  %v4844_v32 = vsel %vm8806_vm4, %v6287_v41, 0.0  ;;  %vm8807_vm13 = vmmov %vm8728_vm0 }
 0x202   : > { %v4943_v7 = vsel %vm8807_vm13, %v4898_v30, 0.0  ;;  %v6290_v55 = vadd.f32 %v4667_v40, %v3023_v42  ;;  %vm8808_vm2 = vmmov %vm8728_vm0  ;;  %v4945_v17 = vsel %vm8728_vm0, %v4899_v15, 0.0 }
 0x203   : > { %v4944_v62 = vadd.f32 %v4943_v7, %v4942_v49  ;;  %4795 = vst.msk [vmem:[%s8057_s17 + $0x88] sm:$0xff] %vm8808_vm2, %v6289_v20  ;;  %v4845_v35 = vadd.f32 %v4844_v32, %v4843_v5  ;;  %v4901_v18 = vmul.f32 %v6289_v20, %v6289_v20  ;;  %vm8809_vm8 = vmmov %vm8728_vm0 }
 0x204   : > { %4794 = vst.msk [vmem:[%s8057_s17 + $0x80] sm:$0xff] %vm8809_vm8, %v6290_v55  ;;  %vm8810_vm11 = vmmov %vm8728_vm0  ;;  %v4900_v54 = vmul.f32 %v6290_v55, %v6290_v55  ;;  %v6055_v37 = vpop.f32.mrb[20].mxu1  ;;  %v6252_v47 = vpop.f32.mrb[18].mxu0 }
 0x205   : > { %v4846_v29 = vsel %vm8810_vm11, %v6290_v55, 0.0  ;;  %v4946_v0 = vadd.f32 %v4945_v17, %v4944_v62  ;;  %v6291_v43 = vadd.f32 %v6252_v47, %v6052_v63  ;;  %v3043_v10 = vpop.f32.mrb[21].mxu1  ;;  %v4677_v57 = vpop.f32.mrb[19].mxu0  ;;  %vm8811_vm15 = vmmov %vm8728_vm0 }
 0x206   : > { %v4847_v50 = vadd.f32 %v4846_v29, %v4845_v35  ;;  %v4848_v25 = vsel %vm8811_vm15, %v6289_v20, 0.0  ;;  %vm8812_vm7 = vmmov %vm8728_vm0  ;;  %v6292_v12 = vadd.f32 %v4677_v57, %v3033_v26 }
 0x207   : > { %v4947_v19 = vsel %vm8812_vm7, %v4900_v54, 0.0  ;;  %vm8813_vm5 = vmmov %vm8728_vm0  ;;  %v4903_v31 = vmul.f32 %v6291_v43, %v6291_v43 }
 0x208   : > { %v4948_v52 = vadd.f32 %v4947_v19, %v4946_v0  ;;  %4797 = vst.msk [vmem:[%s8057_s17 + $0x98] sm:$0xff] %vm8813_vm5, %v6291_v43  ;;  %v4849_v6 = vadd.f32 %v4848_v25, %v4847_v50  ;;  %vm8814_vm10 = vmmov %vm8728_vm0  ;;  %v4902_v14 = vmul.f32 %v6292_v12, %v6292_v12  ;;  %v6058_v36 = vpop.f32.mrb[22].mxu1  ;;  %v6255_v56 = vpop.f32.mrb[20].mxu0 }
 0x209   : > { %v4949_v39 = vsel %vm8814_vm10, %v4901_v18, 0.0  ;;  %vm8815_vm12 = vmmov %vm8728_vm0  ;;  %v6293_v21 = vadd.f32 %v6255_v56, %v6055_v37  ;;  %v3053_v27 = vpop.f32.mrb[23].mxu1  ;;  %v4687_v60 = vpop.f32.mrb[21].mxu0 }
 0x20a   : > { %4796 = vst.msk [vmem:[%s8057_s17 + $0x90] sm:$0xff] %vm8815_vm12, %v6292_v12  ;;  %vm8816_vm9 = vmmov %vm8728_vm0  ;;  %v4950_v53 = vadd.f32 %v4949_v39, %v4948_v52  ;;  %v6294_v16 = vadd.f32 %v4687_v60, %v3043_v10 }
 0x20b   : > { %v4850_v11 = vsel %vm8816_vm9, %v6292_v12, 0.0  ;;  %vm8817_vm3 = vmmov %vm8728_vm0  ;;  %v4905_v45 = vmul.f32 %v6293_v21, %v6293_v21 }
 0x20c   : > { %v4851_v61 = vadd.f32 %v4850_v11, %v4849_v6  ;;  %v4852_v58 = vsel %vm8817_vm3, %v6291_v43, 0.0  ;;  %vm8818_vm6 = vmmov %vm8728_vm0  ;;  %v4904_v3 = vmul.f32 %v6294_v16, %v6294_v16  ;;  %v6061_v13 = vpop.f32.mrb[24].mxu1  ;;  %v6258_v8 = vpop.f32.mrb[22].mxu0 }
 0x20d   : > { %v4951_v38 = vsel %vm8818_vm6, %v4902_v14, 0.0  ;;  %vm8819_vm1 = vmmov %vm8728_vm0  ;;  %v6295_v41 = vadd.f32 %v6258_v8, %v6058_v36  ;;  %v3063_v42 = vpop.f32.mrb[25].mxu1  ;;  %v4697_v1 = vpop.f32.mrb[23].mxu0 }
 0x20e   : > { %v4952_v33 = vadd.f32 %v4951_v38, %v4950_v53  ;;  %4799 = vst.msk [vmem:[%s8057_s17 + $0xa8] sm:$0xff] %vm8819_vm1, %v6293_v21  ;;  %v4853_v24 = vadd.f32 %v4852_v58, %v4851_v61  ;;  %vm8820_vm14 = vmmov %vm8728_vm0  ;;  %v4955_v59 = vsel %vm8728_vm0, %v4904_v3, 0.0  ;;  %v6296_v9 = vadd.f32 %v4697_v1, %v3053_v27 }
 0x20f   : > { %v4953_v22 = vsel %vm8820_vm14, %v4903_v31, 0.0  ;;  %vm8821_vm4 = vmmov %vm8728_vm0  ;;  %v4907_v15 = vmul.f32 %v6295_v41, %v6295_v41 }
 0x210   : > { %4798 = vst.msk [vmem:[%s8057_s17 + $0xa0] sm:$0xff] %vm8821_vm4, %v6294_v16  ;;  %vm8822_vm13 = vmmov %vm8728_vm0  ;;  %v4954_v46 = vadd.f32 %v4953_v22, %v4952_v33  ;;  %v4906_v30 = vmul.f32 %v6296_v9, %v6296_v9  ;;  %v6064_v63 = vpop.f32.mrb[26].mxu1  ;;  %v6261_v28 = vpop.f32.mrb[24].mxu0 }
 0x211   : > { %v4854_v48 = vsel %vm8822_vm13, %v6294_v16, 0.0  ;;  %vm8823_vm2 = vmmov %vm8728_vm0  ;;  %v6297_v20 = vadd.f32 %v6261_v28, %v6061_v13  ;;  %v3073_v26 = vpop.f32.mrb[27].mxu1  ;;  %v4707_v40 = vpop.f32.mrb[25].mxu0 }
 0x212   : > { %v4855_v23 = vadd.f32 %v4854_v48, %v4853_v24  ;;  %v4856_v51 = vsel %vm8823_vm2, %v6293_v21, 0.0  ;;  %v4956_v34 = vadd.f32 %v4955_v59, %v4954_v46  ;;  %vm8824_vm8 = vmmov %vm8728_vm0  ;;  %v6298_v55 = vadd.f32 %v4707_v40, %v3063_v42 }
 0x213   : > { %4801 = vst.msk [vmem:[%s8057_s17 + $0xb8] sm:$0xff] %vm8824_vm8, %v6295_v41  ;;  %vm8825_vm11 = vmmov %vm8728_vm0  ;;  %v4909_v18 = vmul.f32 %v6297_v20, %v6297_v20 }
 0x214   : > { %v4857_v2 = vadd.f32 %v4856_v51, %v4855_v23  ;;  %v4957_v44 = vsel %vm8825_vm11, %v4905_v45, 0.0  ;;  %vm8826_vm15 = vmmov %vm8728_vm0  ;;  %v4908_v54 = vmul.f32 %v6298_v55, %v6298_v55  ;;  %v6067_v37 = vpop.f32.mrb[28].mxu1  ;;  %v6264_v47 = vpop.f32.mrb[26].mxu0 }
 0x215   : > { %4800 = vst.msk [vmem:[%s8057_s17 + $0xb0] sm:$0xff] %vm8826_vm15, %v6296_v9  ;;  %vm8827_vm7 = vmmov %vm8728_vm0  ;;  %v4958_v49 = vadd.f32 %v4957_v44, %v4956_v34  ;;  %v6299_v43 = vadd.f32 %v6264_v47, %v6064_v63  ;;  %v3083_v10 = vpop.f32.mrb[29].mxu1  ;;  %v4717_v57 = vpop.f32.mrb[27].mxu0 }
 0x216   : > { %v4858_v4 = vsel %vm8827_vm7, %v6296_v9, 0.0  ;;  %vm8828_vm5 = vmmov %vm8728_vm0  ;;  %v6300_v12 = vadd.f32 %v4717_v57, %v3073_v26 }
 0x217   : > { %v4859_v5 = vadd.f32 %v4858_v4, %v4857_v2  ;;  %v4860_v32 = vsel %vm8828_vm5, %v6295_v41, 0.0  ;;  %vm8829_vm10 = vmmov %vm8728_vm0  ;;  %v4911_v31 = vmul.f32 %v6299_v43, %v6299_v43 }
 0x218   : > { %v4959_v7 = vsel %vm8829_vm10, %v4906_v30, 0.0  ;;  %vm8830_vm12 = vmmov %vm8728_vm0  ;;  %v4866_v11 = vsel %vm8728_vm0, %v6300_v12, 0.0  ;;  %v4910_v14 = vmul.f32 %v6300_v12, %v6300_v12  ;;  %v6070_v36 = vpop.f32.mrb[30].mxu1  ;;  %v6267_v56 = vpop.f32.mrb[28].mxu0 }
 0x219   : > { %v4960_v62 = vadd.f32 %v4959_v7, %v4958_v49  ;;  %4803 = vst.msk [vmem:[%s8057_s17 + $0xc8] sm:$0xff] %vm8830_vm12, %v6297_v20  ;;  %v4861_v35 = vadd.f32 %v4860_v32, %v4859_v5  ;;  %vm8831_vm9 = vmmov %vm8728_vm0  ;;  %v6301_v21 = vadd.f32 %v6267_v56, %v6067_v37  ;;  %v3093_v27 = vpop.f32.mrb[31].mxu1  ;;  %v4727_v60 = vpop.f32.mrb[29].mxu0 }
 0x21a   : > { %v4961_v17 = vsel %vm8831_vm9, %v4907_v15, 0.0  ;;  %vm8832_vm3 = vmmov %vm8728_vm0  ;;  %v6302_v16 = vadd.f32 %v4727_v60, %v3083_v10 }
 0x21b   : > { %4802 = vst.msk [vmem:[%s8057_s17 + $0xc0] sm:$0xff] %vm8832_vm3, %v6298_v55  ;;  %vm8833_vm6 = vmmov %vm8728_vm0  ;;  %v4962_v0 = vadd.f32 %v4961_v17, %v4960_v62  ;;  %v4913_v45 = vmul.f32 %v6301_v21, %v6301_v21 }
 0x21c   : > { %v4862_v29 = vsel %vm8833_vm6, %v6298_v55, 0.0  ;;  %vm8834_vm1 = vmmov %vm8728_vm0  ;;  %v4912_v3 = vmul.f32 %v6302_v16, %v6302_v16  ;;  %v6270_v13 = vpop.f32.mrb[30].mxu0 }
 0x21d   : > { %v4863_v50 = vadd.f32 %v4862_v29, %v4861_v35  ;;  %v4864_v25 = vsel %vm8834_vm1, %v6297_v20, 0.0  ;;  %vm8835_vm14 = vmmov %vm8728_vm0  ;;  %v6303_v46 = vadd.f32 %v6270_v13, %v6070_v36  ;;  %v4737_v41 = vpop.f32.mrb[31].mxu0 }
 0x21e   : > { %v4963_v19 = vsel %vm8835_vm14, %v4908_v54, 0.0  ;;  %vm8836_vm4 = vmmov %vm8728_vm0  ;;  %v6304_v51 = vadd.f32 %v4737_v41, %v3093_v27 }
 0x21f   : > { %v4964_v52 = vadd.f32 %v4963_v19, %v4962_v0  ;;  %4805 = vst.msk [vmem:[%s8057_s17 + $0xd8] sm:$0xff] %vm8836_vm4, %v6299_v43  ;;  %v4865_v6 = vadd.f32 %v4864_v25, %v4863_v50  ;;  %vm8837_vm13 = vmmov %vm8728_vm0  ;;  %v4915_v2 = vmul.f32 %v6303_v46, %v6303_v46 }
 0x220   : > { %v4965_v39 = vsel %vm8837_vm13, %v4909_v18, 0.0  ;;  %vm8838_vm2 = vmmov %vm8728_vm0  ;;  %v4914_v15 = vmul.f32 %v6304_v51, %v6304_v51 }
 0x221   : > { %4804 = vst.msk [vmem:[%s8057_s17 + $0xd0] sm:$0xff] %vm8838_vm2, %v6300_v12  ;;  %v4867_v61 = vadd.f32 %v4866_v11, %v4865_v6  ;;  %v4966_v53 = vadd.f32 %v4965_v39, %v4964_v52  ;;  %vm8839_vm8 = vmmov %vm8728_vm0 }
 0x222   : > { %v4868_v58 = vsel %vm8839_vm8, %v6299_v43, 0.0  ;;  %vm8840_vm11 = vmmov %vm8728_vm0 }
 0x223   : > { %v4967_v38 = vsel %vm8840_vm11, %v4910_v14, 0.0  ;;  %vm8841_vm15 = vmmov %vm8728_vm0  ;;  %v4869_v24 = vadd.f32 %v4868_v58, %v4867_v61 }
 0x224   : > { %v4968_v33 = vadd.f32 %v4967_v38, %v4966_v53  ;;  %4807 = vst.msk [vmem:[%s8057_s17 + $0xe8] sm:$0xff] %vm8841_vm15, %v6301_v21  ;;  %vm8842_vm7 = vmmov %vm8728_vm0 }
 0x225   : > { %v4969_v22 = vsel %vm8842_vm7, %v4911_v31, 0.0  ;;  %vm8843_vm5 = vmmov %vm8728_vm0 }
 0x226   : > { %4806 = vst.msk [vmem:[%s8057_s17 + $0xe0] sm:$0xff] %vm8843_vm5, %v6302_v16  ;;  %vm8844_vm10 = vmmov %vm8728_vm0  ;;  %v4970_v23 = vadd.f32 %v4969_v22, %v4968_v33 }
 0x227   : > { %v4870_v48 = vsel %vm8844_vm10, %v6302_v16, 0.0  ;;  %vm8845_vm12 = vmmov %vm8728_vm0 }
 0x228   : > { %v4871_v8 = vadd.f32 %v4870_v48, %v4869_v24  ;;  %v4872_v42 = vsel %vm8845_vm12, %v6301_v21, 0.0  ;;  %vm8846_vm9 = vmmov %vm8728_vm0 }
 0x229   : > { %v4971_v1 = vsel %vm8846_vm9, %v4912_v3, 0.0  ;;  %vm8847_vm3 = vmmov %vm8728_vm0 }
 0x22a   : > { %v4873_v59 = vadd.f32 %v4872_v42, %v4871_v8  ;;  %v4972_v9 = vadd.f32 %v4971_v1, %v4970_v23  ;;  %4809 = vst.msk [vmem:[%s8057_s17 + $0xf8] sm:$0xff] %vm8847_vm3, %v6303_v46  ;;  %vm8848_vm6 = vmmov %vm8728_vm0 }
 0x22b   : > { %5514 = vst.msk [vmem:[%s8061_s18 + $0x18] sm:$0xff] %vm8848_vm6, %v6303_v46  ;;  %vm8849_vm1 = vmmov %vm8728_vm0 }
 0x22c   : > { %v4973_v34 = vsel %vm8849_vm1, %v4913_v45, 0.0  ;;  %vm8850_vm14 = vmmov %vm8728_vm0 }
 0x22d   : > { %4808 = vst.msk [vmem:[%s8057_s17 + $0xf0] sm:$0xff] %vm8850_vm14, %v6304_v51  ;;  %vm8851_vm4 = vmmov %vm8728_vm0  ;;  %v4974_v4 = vadd.f32 %v4973_v34, %v4972_v9 }
 0x22e   : > { %5513 = vst.msk [vmem:[%s8061_s18 + $0x10] sm:$0xff] %vm8851_vm4, %v6304_v51  ;;  %vm8852_vm13 = vmmov %vm8728_vm0 }
 0x22f   : > { %v4874_v44 = vsel %vm8852_vm13, %v6304_v51, 0.0 }
 0x230   : > { %v4875_v30 = vadd.f32 %v4874_v44, %v4873_v59 }
 0x231   : > { %6600 = shalt.err (!%p6597_p5)
}
 0x232   : > { %s6601_s10 = scalar_lea.hbm %s8195_s21, 512  ;;  %s6605_s30 = scalar_lea.hbm %s8273_s7, 1024 }
 0x233   : > { %p6602_p6 = scmp.ne.s32.totalorder %s8195_s21, %s6601_s10  ;;  %p6606_p10 = scmp.lt.u32.totalorder %s8195_s21, %s8273_s7 }
 0x234   : > { %p6607_p11 = scmp.lt.u32.totalorder %s6605_s30, %s6601_s10  ;;  %p6609_p13 = scmp.lt.u32.totalorder %s6601_s10, %s8195_s21 }
 0x235   : > { %p6603_p7 = pnand %p6602_p6, %p6750_p4 }
 0x236   : > { %p6608_p12 = por %p6607_p11, %p6606_p10 }
 0x237   : > { %p6604_p9 = pneg %p6603_p7 }
 0x238   : > { %p6610_p0 = por %p6609_p13, %p6608_p12 }
 0x23a   : > { %p6611_p1 = pnand %p6610_p0, %p6604_p9 }
 0x23c   : > { %6614 = shalt.err (!%p6611_p1)
}
 0x23d   : > { %s6668_s8 = smov 128   ;;  %s6669_s12 = smov 8   ;;  %vm8853_vm2 = vmmov %vm8728_vm0  ;;  %v4975_v28 = vsel %vm8728_vm0, %v4914_v15, 0.0  ;;  %vm4989_vm11 = vcmask 57344  }
 0x23e   : > { %6529 = dma.vmem_to_hbm [thread:$0]  (%p6750_p4), %s8197_s19, 512, %s8195_s21, %s8213_s22, %s6668_s8, %s6668_s8, %s6669_s12   ;;  %v4876_v63 = vsel %vm8853_vm2, %v6303_v46, 0.0  ;;  %v4976_v49 = vadd.f32 %v4975_v28, %v4974_v4  ;;  %vm8854_vm8 = vmmov %vm8728_vm0 }
 0x23f   : > { %v4877_v5 = vadd.f32 %v4876_v63, %v4875_v30  ;;  %v4977_v20 = vsel %vm8854_vm8, %v4915_v2, 0.0  ;;  %s5212_s15 = sshll.u32 %s6783_s23, 1 }
 0x240   : > { %v4978_v40 = vadd.f32 %v4977_v20, %v4976_v49  ;;  %s374_s21 = scalar_lea.vmem %s8272_s6, %s5212_s15 }
 0x241   : > { %v4878_v26 = vrot.slane %v4877_v5, 4 }
 0x242   : > { %v4979_v7 = vrot.slane %v4978_v40, 4 }
 0x243   : > { %v4879_v32 = vadd.f32 %v4878_v26, %v4877_v5 }
 0x244   : > { %v4980_v62 = vadd.f32 %v4979_v7, %v4978_v40 }
 0x245   : > { %v4880_v55 = vrot.slane %v4879_v32, 2 }
 0x246   : > { %v4981_v17 = vrot.slane %v4980_v62, 2 }
 0x247   : > { %v4881_v35 = vadd.f32 %v4880_v55, %v4879_v32 }
 0x248   : > { %v4982_v29 = vadd.f32 %v4981_v17, %v4980_v62 }
 0x249   : > { %v4882_v18 = vrot.slane %v4881_v35, 1 }
 0x24a   : > { %v4983_v37 = vrot.slane %v4982_v29, 1 }
 0x24b   : > { %v4883_v54 = vadd.f32 %v4882_v18, %v4881_v35 }
 0x24c   : > { %v4984_v47 = vadd.f32 %v4983_v37, %v4982_v29 }
 0x24d   : > { %4990 = vst.msk [vmem:[%s374_s21] sm:$0x1] %vm4989_vm11, %v4883_v54 }
 0x24e   : > { %4991 = vst.msk [vmem:[%s374_s21 + $0x1] sm:$0x1] %vm4989_vm11, %v4984_v47 }
 0x24f PF: > { %p6535_p4 = scmp.ge.s32.totalorder %s6665_s29, 2  ;;  %s5073_s23 = sand.u32 1, %s6645_s24  }
 0x250   : > { %s5074_s22 = scalar_lea.sflag [#allocation4], %s5073_s23 }
 0x251   : > { %p6532_p2 = pnand %p6535_p4, %p6757_p8 }
 0x253   : > { %6640 = dma.done.wait (!%p6532_p2), %s5074_s22, 512  }
 0x254   : > { %6642 = vsyncadd (!%p6532_p2), %s5074_s22, 4294966784  ;;  %s21_s29 = sadd.s32 1, %s6665_s29   ;;  %s8855_s24 = smov %s6649_s25 }
 0x255   : > { %p18_p3 = scmp.ge.s32.totalorder %s21_s29, 4   ;;  %s8856_s25 = smov %s6653_s26 }
 0x256   : > { %s8857_s26 = smov %s6763_s14  ;;  %s8858_s27 = smov %s6661_s28 }
 0x257   : > { %s8859_s28 = smov %s8861_s9  ;;  %20 = sbr.rel (!%p18_p3) target bundleno = 4 (0x4), region = 120 }
 0x25e   :  { %5079 = vsyncpa [#allocation4], 1 }
 0x25f   :  { %5081 = vsyncpa [#allocation4 + $0x1], 1 }

</bundles_post_ra>
